<compile_context>
chip_gen: v6e
topology: v6e:2x2x1
jax: 0.10.0
libtpu: 0.0.40
codegen_flags: <defaults>
</compile_context>

<pallas_src>
import numpy as np
import jax
import jax.numpy as jnp
from jax.experimental import pallas as pl
from jax.experimental.pallas import tpu as pltpu

# ----------------------------- configuration --------------------------------
N = 2
H = W = 8
HW = H * W
INPLANES = 32
PLANES = 8
EXPANSION = 4
OUTC = PLANES * EXPANSION      # 32 == INPLANES (residual add, downsample=None)
WIDTH = PLANES                 # int(planes * 64/64) * groups
GROUPS = 1                     # LESA groups
BRANCH = WIDTH                 # LESA out_planes
QK = WIDTH // GROUPS // 2      # qk_planes = 4
VP = BRANCH // GROUPS          # v_planes  = 8
QK_PAD = 8                     # q/k channel dims zero-padded to 8 (aligned slices)
PE_DIM = 2 * QK + VP           # 16
EPS = 1e-5

# Lane-dense batch fusion: GROUP_LANES lanes per kernel step (= NB images).
GROUP_LANES = 128
NB = GROUP_LANES // HW         # images per group (2)
assert GROUP_LANES % HW == 0 and NB >= 1
assert OUTC == INPLANES

# bf16 MXU operands (f32 accumulation) for the conv/qkv/reasoning/conv3 matmuls —
# the throughput lever on v6e/v7x.  The attention-logits matmul always stays f32.
# Default False so the strict f32 reference tolerance (2e-3) holds.
MXU_BF16 = False

_ar = np.arange(HW)
FLAT_IDX = jnp.asarray((_ar[:, None] - _ar[None, :] + HW - 1).reshape(-1),
                       dtype=jnp.int32)

# 3x3 taps in (kh, kw) row-major order (matching PyTorch conv weight layout).
_TAPS = [(dy, dx) for dy in (-1, 0, 1) for dx in (-1, 0, 1)]
# lane shift so that out[:, lane] = y1[:, lane + dy*W + dx]  (jnp.roll convention)
SHIFTS = [(-(dy * W + dx)) % GROUP_LANES for dy, dx in _TAPS]


def _make_tap_masks():
    """mask[t, lane] = 1 iff the source pixel (h+dy, w+dx) lies inside the image.
    Also zeroes the cyclic-wrap / cross-image lanes of the roll."""
    m = np.zeros((9, GROUP_LANES), np.float32)
    for t, (dy, dx) in enumerate(_TAPS):
        for n in range(NB):
            for h in range(H):
                for w in range(W):
                    if 0 <= h + dy < H and 0 <= w + dx < W:
                        m[t, n * HW + h * W + w] = 1.0
    return m


TAP_MASKS = _make_tap_masks()

# Weight-slab row offsets (all multiples of 8).
W1_R, WQKV_R, WX_R, WR_R, WP_R, W3_R, WSLAB_ROWS = 0, 8, 32, 40, 48, 56, 88
# Bias-slab row offsets.
B1_R, BQKV_R, BX_R, BBIN_R, BR_R, BP_R, B3_R, BSLAB_ROWS = 0, 8, 32, 40, 48, 56, 64, 96


# ------------------------------ fused kernel --------------------------------
def _bottleneck_kernel(x_ref, wslab_ref, bslab_ref, mask_ref, emb_ref, out_ref):
    """One 128-lane batch group per grid step; everything stays in VMEM/vregs."""

    def mm(a, b, *, allow_bf16=True):
        if MXU_BF16 and allow_bf16:
            a = a.astype(jnp.bfloat16)
            b = b.astype(jnp.bfloat16)
        return jnp.dot(a, b, preferred_element_type=jnp.float32)

    def dgc0(a, b, *, allow_bf16=True):   # contract dim0 of a with dim0 of b
        if MXU_BF16 and allow_bf16:
            a = a.astype(jnp.bfloat16)
            b = b.astype(jnp.bfloat16)
        return jax.lax.dot_general(a, b, (((0,), (0,)), ((), ())),
                                   preferred_element_type=jnp.float32)

    x = x_ref[...]                                                  # (INPLANES, 128)

    # conv1 (1x1) + bn1 + relu
    w1 = wslab_ref[W1_R:W1_R + WIDTH, 0:INPLANES]
    y1 = jnp.maximum(mm(w1, x) + bslab_ref[B1_R:B1_R + WIDTH, :], 0.0)   # (WIDTH, 128)

    # ---- LESA unary branch: 3x3 conv as roll-stack + ONE matmul -------------
    shifted = [y1 if SHIFTS[t] == 0 else pltpu.roll(y1, SHIFTS[t], 1)
               for t in range(9)]
    y1_stack = jnp.concatenate(shifted, axis=0) * mask_ref[...]    # (72, 128)
    wx = wslab_ref[WX_R:WX_R + BRANCH, 0:9 * WIDTH]                # (8, 72)
    unary = mm(wx, y1_stack) + bslab_ref[BX_R:BX_R + BRANCH, :]    # (BRANCH, 128)

    # ---- LESA binary branch: fused qkv + relative-position attention --------
    wqkv = wslab_ref[WQKV_R:WQKV_R + 3 * QK_PAD, 0:WIDTH]          # (24, 8)
    qkv = mm(wqkv, y1) + bslab_ref[BQKV_R:BQKV_R + 3 * QK_PAD, :]  # (24, 128)
    q = qkv[0:QK_PAD]                                              # (8, 128) zero-pad ch 4..7
    k = qkv[QK_PAD:2 * QK_PAD]                                     # (8, 128) zero-pad ch 4..7
    v = qkv[2 * QK_PAD:2 * QK_PAD + VP]                            # (8, 128) sv-scale folded

    QE = emb_ref[0:QK_PAD]                                         # (8, HW, HW)  [j, i]
    KE = emb_ref[QK_PAD:2 * QK_PAD]                                # (8, HW, HW)  [j, i]
    VE = emb_ref[2 * QK_PAD:2 * QK_PAD + VP]                       # (8, HW, HW)  [j, i]

    parts = []
    for b in range(NB):
        sl = slice(b * HW, (b + 1) * HW)
        q_n, k_n, v_n = q[:, sl], k[:, sl], v[:, sl]               # (8, HW)

        # transposed-domain logits: logitsT[j, i] = logits[i, j]
        qkT = dgc0(k_n, q_n, allow_bf16=False)                     # (HW, HW) s0 folded in q
        qrT = jnp.sum(QE * q_n[:, None, :], axis=0)                # (HW, HW) s1 folded
        krT = jnp.sum(KE * k_n[:, :, None], axis=0)                # (HW, HW) s2 folded
        # bn_similarity biases add the same constant to every logit -> cancel in softmax.
        logitsT = qkT + qrT + krT

        # softmax over the key axis j == sublane axis (cheap vreg adds + small XLU)
        mT = jnp.max(logitsT, axis=0, keepdims=True)
        eT = jnp.exp(logitsT - mT)
        simT = eT * pl.reciprocal(jnp.sum(eT, axis=0, keepdims=True), approx=True)

        sv = mm(v_n, simT)                                         # (VP, HW)
        sve = jnp.sum(VE * simT[None, :, :], axis=1)               # (VP, HW) sublane MAC
        parts.append(sv + sve)

    binary = (jnp.concatenate(parts, axis=1)
              + bslab_ref[BBIN_R:BBIN_R + BRANCH, :])              # (BRANCH, 128)

    # ---- reasoning / projection / sigmoid gate / fuse -----------------------
    rcat = jnp.concatenate([jnp.maximum(unary, 0.0),
                            jnp.maximum(binary, 0.0)], axis=0)     # (2*BRANCH, 128)
    wr = wslab_ref[WR_R:WR_R + BRANCH, 0:2 * BRANCH]
    r = jnp.maximum(mm(wr, rcat) + bslab_ref[BR_R:BR_R + BRANCH, :], 0.0)
    wp = wslab_ref[WP_R:WP_R + BRANCH, 0:BRANCH]
    gl = mm(wp, r) + bslab_ref[BP_R:BP_R + BRANCH, :]
    gate = 1.0 / (1.0 + jnp.exp(-gl))                              # exact sigmoid
    lesa = jnp.maximum(gate * binary + unary, 0.0)                 # bottleneck ReLU

    # conv3 (1x1) + bn3 + residual add + relu
    w3 = wslab_ref[W3_R:W3_R + OUTC, 0:WIDTH]
    out = mm(w3, lesa) + bslab_ref[B3_R:B3_R + OUTC, :] + x        # (OUTC, 128)
    out_ref[...] = jnp.maximum(out, 0.0).astype(out_ref.dtype)


def pallas_forward(x, prep):
    Nn = x.shape[0]
    assert Nn % NB == 0, "batch must pack into whole 128-lane groups"
    num_groups = Nn // NB

    # NCHW -> (C, N*HW): small wrapper transpose to a lane-dense layout.
    x_cm = x.reshape(Nn, INPLANES, HW).transpose(1, 0, 2).reshape(INPLANES, Nn * HW)

    def const_spec(a):
        zeros = (0,) * a.ndim
        return pl.BlockSpec(a.shape, lambda g, z=zeros: z)

    out = pl.pallas_call(
        _bottleneck_kernel,
        out_shape=jax.ShapeDtypeStruct((OUTC, Nn * HW), jnp.float32),
        grid=(num_groups,),
        in_specs=[
            pl.BlockSpec((INPLANES, GROUP_LANES), lambda g: (0, g)),   # x (per group)
            const_spec(prep["wslab"]),
            const_spec(prep["bslab"]),
            const_spec(prep["maskslab"]),
            const_spec(prep["emb"]),
        ],
        out_specs=pl.BlockSpec((OUTC, GROUP_LANES), lambda g: (0, g)),
        compiler_params=pltpu.CompilerParams(
            dimension_semantics=("parallel",)),    # v7x: one 128-lane group per TensorCore
    )(x_cm, prep["wslab"], prep["bslab"], prep["maskslab"], prep["emb"])

    return out.reshape(OUTC, Nn, H, W).transpose(1, 0, 2, 3)


# --------------------------- one-time weight prep ----------------------------
def bn_scale_bias(bn):
    g, b, m, v = bn
    s = g / jnp.sqrt(v + EPS)
    return s, b - m * s


def prepare_params(P):
    """Hoisted out of the forward hot path: fold eval-mode BatchNorms into conv
    weights, gather + pre-scale / pre-transpose the relative-position embeddings,
    and pack everything into four lane-dense constant operands."""
    sS, _bS = bn_scale_bias(P["bn_sim"])               # (3,)  biases cancel in softmax
    oS, oB = bn_scale_bias(P["bn_out"])                # (2*BRANCH,)
    oS2 = oS.reshape(BRANCH, 2)
    oB2 = oB.reshape(BRANCH, 2)

    # conv1 + bn1
    s, c = bn_scale_bias(P["bn1"])
    w1 = P["w1"][:, :, 0, 0] * s[:, None]              # (WIDTH, INPLANES)
    b1 = c

    # qkv_transform + bn_qkv; s0 folded into q, bn_output sv-scale into v;
    # q/k channel dims zero-padded to QK_PAD so in-kernel slices are 8-aligned.
    s, c = bn_scale_bias(P["bn_qkv"])
    wqkv = P["wqkv"] * s[:, None]
    bqkv = c
    wq = wqkv[:QK] * sS[0]
    bq = bqkv[:QK] * sS[0]
    wk = wqkv[QK:2 * QK]
    bk = bqkv[QK:2 * QK]
    wv = wqkv[2 * QK:] * oS2[:, 0][:, None]
    bv = bqkv[2 * QK:] * oS2[:, 0]
    zw = jnp.zeros((QK_PAD - QK, WIDTH), jnp.float32)
    zb = jnp.zeros((QK_PAD - QK,), jnp.float32)
    wqkv_pack = jnp.concatenate([wq, zw, wk, zw, wv], axis=0)       # (24, WIDTH)
    bqkv_pack = jnp.concatenate([bq, zb, bk, zb, bv], axis=0)       # (24,)

    # x_transform (3x3, pad 1) + bn_x -> single stacked (BRANCH, 9*WIDTH) weight
    s, c = bn_scale_bias(P["bn_x"])
    wx = P["wx"] * s[:, None, None, None]
    wx_taps = wx.transpose(2, 3, 0, 1).reshape(9, BRANCH, WIDTH)
    wx_stk = wx_taps.transpose(1, 0, 2).reshape(BRANCH, 9 * WIDTH)  # (8, 72)
    bx = c

    # relative-position embeddings: gather once, fold scales, orient for the
    # transposed-domain attention ([j, i]), pad q/k channels to QK_PAD.
    all_emb = P["relative"][:, FLAT_IDX].reshape(PE_DIM, HW, HW)
    qe = jnp.swapaxes(all_emb[:QK], 1, 2) * (sS[1] / sS[0])
    ke = all_emb[QK:2 * QK] * sS[2]
    ve = jnp.swapaxes(all_emb[2 * QK:], 1, 2) * oS2[:, 1][:, None, None]
    ze = jnp.zeros((QK_PAD - QK, HW, HW), jnp.float32)
    emb = jnp.concatenate([qe, ze, ke, ze, ve], axis=0)             # (24, HW, HW)
    bbin = oB2[:, 0] + oB2[:, 1]

    # reasoning (2*BRANCH -> BRANCH) + bn_r  (kept as one matmul weight)
    s, c = bn_scale_bias(P["bn_r"])
    wr = P["wr"][:, :, 0, 0] * s[:, None]
    br = c
    # projection + bn_p
    s, c = bn_scale_bias(P["bn_p"])
    wp = P["wp"][:, :, 0, 0] * s[:, None]
    bp = c
    # conv3 + bn3
    s, c = bn_scale_bias(P["bn3"])
    w3 = P["w3"][:, :, 0, 0] * s[:, None]
    b3 = c

    # ---- pack into consolidated slabs ----------------------------------------
    def pad_lanes(w):
        return jnp.pad(w, ((0, 0), (0, GROUP_LANES - w.shape[1])))

    wslab = jnp.concatenate(
        [pad_lanes(w1), pad_lanes(wqkv_pack), pad_lanes(wx_stk),
         pad_lanes(wr), pad_lanes(wp), pad_lanes(w3)], axis=0)
    assert wslab.shape == (WSLAB_ROWS, GROUP_LANES)

    def bcast(b):
        return jnp.broadcast_to(b[:, None], (b.shape[0], GROUP_LANES))

    bslab = jnp.concatenate(
        [bcast(b1), bcast(bqkv_pack), bcast(bx), bcast(bbin),
         bcast(br), bcast(bp), bcast(b3)], axis=0)
    assert bslab.shape == (BSLAB_ROWS, GROUP_LANES)

    maskslab = jnp.asarray(np.repeat(TAP_MASKS, WIDTH, axis=0), dtype=jnp.float32)

    return {"wslab": wslab, "bslab": bslab, "maskslab": maskslab, "emb": emb}


# --------------------------- parameter creation ------------------------------
def make_params(key):
    kit = iter(jax.random.split(key, 40))
    nk = lambda: next(kit)

    def conv_w(shape, fan_in):
        return jax.random.normal(nk(), shape, dtype=jnp.float32) * np.float32(
            1.0 / np.sqrt(fan_in))

    def bn(c):
        g = 1.0 + 0.1 * jax.random.normal(nk(), (c,), dtype=jnp.float32)
        b = 0.1 * jax.random.normal(nk(), (c,), dtype=jnp.float32)
        m = 0.1 * jax.random.normal(nk(), (c,), dtype=jnp.float32)
        v = 1.0 + 0.1 * jnp.abs(jax.random.normal(nk(), (c,), dtype=jnp.float32))
        return (g, b, m, v)

    P = {}
    P["w1"] = conv_w((WIDTH, INPLANES, 1, 1), INPLANES)            # conv1 1x1
    P["bn1"] = bn(WIDTH)
    P["wqkv"] = conv_w((2 * WIDTH, WIDTH), WIDTH)                  # Conv1d (out, in)
    P["bn_qkv"] = bn(2 * WIDTH)
    P["bn_sim"] = bn(3 * GROUPS)                                   # BatchNorm2d(3g)
    P["bn_out"] = bn(2 * BRANCH)                                   # BatchNorm1d(2*branch)
    P["wx"] = conv_w((BRANCH, WIDTH, 3, 3), WIDTH * 9)             # x_transform 3x3
    P["bn_x"] = bn(BRANCH)
    P["wr"] = conv_w((BRANCH, 2 * BRANCH, 1, 1), 2 * BRANCH)       # reasoning 1x1
    P["bn_r"] = bn(BRANCH)
    P["wp"] = conv_w((BRANCH, BRANCH, 1, 1), BRANCH)               # projection 1x1
    P["bn_p"] = bn(BRANCH)
    P["relative"] = jax.random.normal(nk(), (PE_DIM, 2 * HW - 1),
                                      dtype=jnp.float32) * np.float32(
                                          np.sqrt(1.0 / VP))
    P["w3"] = conv_w((PLANES * EXPANSION, WIDTH, 1, 1), WIDTH)     # conv3 1x1
    P["bn3"] = bn(PLANES * EXPANSION)
    return P


# ------------------------- pure-JAX reference (check) ------------------------
def ref_forward(x, P):
    def bn_apply(t, bn, axis=1):
        g, b, m, v = bn
        sh = [1] * t.ndim
        sh[axis] = -1
        return ((t - m.reshape(sh)) / jnp.sqrt(v.reshape(sh) + EPS)
                * g.reshape(sh) + b.reshape(sh))

    def conv2d(t, w, pad=0):
        return jax.lax.conv_general_dilated(
            t, w, (1, 1), ((pad, pad), (pad, pad)),
            dimension_numbers=("NCHW", "OIHW", "NCHW"))

    identity = x
    out = jnp.maximum(bn_apply(conv2d(x, P["w1"]), P["bn1"]), 0.0)

    unary = bn_apply(conv2d(out, P["wx"], pad=1), P["bn_x"])
    Nn, C, Hh, Ww = out.shape
    xf = out.reshape(Nn, C, Hh * Ww)
    qkv = bn_apply(jnp.einsum("oc,nci->noi", P["wqkv"], xf), P["bn_qkv"])
    q, k, v = qkv[:, :QK], qkv[:, QK:2 * QK], qkv[:, 2 * QK:]
    all_emb = P["relative"][:, FLAT_IDX].reshape(PE_DIM, HW, HW)
    q_emb, k_emb, v_emb = all_emb[:QK], all_emb[QK:2 * QK], all_emb[2 * QK:]

    qk = jnp.einsum("nci,ncj->nij", q, k)
    qr = jnp.einsum("nci,cij->nij", q, q_emb)
    kr = jnp.einsum("nci,cij->nij", k, k_emb).transpose(0, 2, 1)
    stacked = bn_apply(jnp.stack([qk, qr, kr], axis=1), P["bn_sim"], axis=1)
    logits = stacked.sum(axis=1)
    m = jnp.max(logits, axis=-1, keepdims=True)
    e = jnp.exp(logits - m)
    sim = e / jnp.sum(e, axis=-1, keepdims=True)
    sv = jnp.einsum("nij,ncj->nci", sim, v)
    sve = jnp.einsum("nij,cij->nci", sim, v_emb)
    stackedb = jnp.stack([sv, sve], axis=2).reshape(Nn, 2 * BRANCH, HW)
    binary = bn_apply(stackedb, P["bn_out"]).reshape(Nn, BRANCH, 2, HW).sum(axis=2)
    binary = binary.reshape(Nn, BRANCH, Hh, Ww)

    gate_in = jnp.concatenate([unary, binary], axis=1)
    r = jnp.maximum(gate_in, 0.0)
    r = jnp.maximum(bn_apply(conv2d(r, P["wr"]), P["bn_r"]), 0.0)
    gl = bn_apply(conv2d(r, P["wp"]), P["bn_p"])
    gate = 1.0 / (1.0 + jnp.exp(-gl))
    out = jnp.maximum(gate * binary + unary, 0.0)

    out = bn_apply(conv2d(out, P["w3"]), P["bn3"])
    return jnp.maximum(out + identity, 0.0)


# ---------------------------------- main -------------------------------------
if __name__ == "__main__":
    root = jax.random.PRNGKey(0)
    xkey, pkey = jax.random.split(root)
    params = make_params(pkey)
    x = jax.random.normal(xkey, (N, INPLANES, H, W), dtype=jnp.float32)

    prep = prepare_params(params)                 # hoisted one-time weight prep
    fwd = jax.jit(pallas_forward)
    out = jax.block_until_ready(fwd(x, prep))

    ref = ref_forward(x, params)
    np.testing.assert_allclose(np.asarray(out), np.asarray(ref),
                               rtol=2e-3, atol=2e-3)
    print("KERNEL_OK")
</pallas_src>

<mosaic_0001>
module attributes {stable_mosaic.version = 11 : i64} {
  func.func @_bottleneck_kernel(%arg0: i32, %arg1: memref<32x128xf32, #tpu.memory_space<vmem>>, %arg2: memref<88x128xf32, #tpu.memory_space<vmem>>, %arg3: memref<96x128xf32, #tpu.memory_space<vmem>>, %arg4: memref<72x128xf32, #tpu.memory_space<vmem>>, %arg5: memref<24x64x64xf32, #tpu.memory_space<vmem>>, %arg6: memref<32x128xf32, #tpu.memory_space<vmem>>) attributes {dimension_semantics = [#tpu.dimension_semantics<parallel>], iteration_bounds = array<i64: 1>, scalar_prefetch = 0 : i64, scratch_operands = 0 : i64, tpu.core_type = #tpu.core_type<tc>, window_params = [{transform_indices = @transform_0, window_bounds = array<i64: 32, 128>}, {pipeline_mode = #tpu.pipeline_mode<synchronous>, transform_indices = @transform_1, window_bounds = array<i64: 88, 128>}, {pipeline_mode = #tpu.pipeline_mode<synchronous>, transform_indices = @transform_2, window_bounds = array<i64: 96, 128>}, {pipeline_mode = #tpu.pipeline_mode<synchronous>, transform_indices = @transform_3, window_bounds = array<i64: 72, 128>}, {pipeline_mode = #tpu.pipeline_mode<synchronous>, transform_indices = @transform_4, window_bounds = array<i64: 24, 64, 64>}, {transform_indices = @transform_5, window_bounds = array<i64: 32, 128>}]} {
    %c0 = arith.constant 0 : index
    %c0_0 = arith.constant 0 : index
    %0 = vector.load %arg1[%c0, %c0_0] : memref<32x128xf32, #tpu.memory_space<vmem>>, vector<32x128xf32>
    %c0_1 = arith.constant 0 : index
    %c0_2 = arith.constant 0 : index
    %1 = vector.load %arg2[%c0_1, %c0_2] : memref<88x128xf32, #tpu.memory_space<vmem>>, vector<8x32xf32>
    %cst = arith.constant dense<0.000000e+00> : vector<8x128xf32>
    %2 = tpu.matmul %1, %0, %cst {dimension_numbers = #tpu.dot_dimension_numbers<[1], [0], [0], [1], [0, 0, 1, 1], [], []>} : vector<8x32xf32>, vector<32x128xf32>, vector<8x128xf32> -> vector<8x128xf32>
    %c0_3 = arith.constant 0 : index
    %c0_4 = arith.constant 0 : index
    %3 = vector.load %arg3[%c0_3, %c0_4] : memref<96x128xf32, #tpu.memory_space<vmem>>, vector<8x128xf32>
    %4 = arith.addf %2, %3 : vector<8x128xf32>
    %cst_5 = arith.constant 0.000000e+00 : f32
    %5 = vector.broadcast %cst_5 : f32 to vector<8x128xf32>
    %6 = arith.maximumf %4, %5 : vector<8x128xf32>
    %c9_i32 = arith.constant 9 : i32
    %7 = tpu.dynamic_rotate %6 by %c9_i32 dim 1 : vector<8x128xf32>, i32 -> vector<8x128xf32>
    %c8_i32 = arith.constant 8 : i32
    %8 = tpu.dynamic_rotate %6 by %c8_i32 dim 1 : vector<8x128xf32>, i32 -> vector<8x128xf32>
    %c7_i32 = arith.constant 7 : i32
    %9 = tpu.dynamic_rotate %6 by %c7_i32 dim 1 : vector<8x128xf32>, i32 -> vector<8x128xf32>
    %c1_i32 = arith.constant 1 : i32
    %10 = tpu.dynamic_rotate %6 by %c1_i32 dim 1 : vector<8x128xf32>, i32 -> vector<8x128xf32>
    %c127_i32 = arith.constant 127 : i32
    %11 = tpu.dynamic_rotate %6 by %c127_i32 dim 1 : vector<8x128xf32>, i32 -> vector<8x128xf32>
    %c121_i32 = arith.constant 121 : i32
    %12 = tpu.dynamic_rotate %6 by %c121_i32 dim 1 : vector<8x128xf32>, i32 -> vector<8x128xf32>
    %c120_i32 = arith.constant 120 : i32
    %13 = tpu.dynamic_rotate %6 by %c120_i32 dim 1 : vector<8x128xf32>, i32 -> vector<8x128xf32>
    %c119_i32 = arith.constant 119 : i32
    %14 = tpu.dynamic_rotate %6 by %c119_i32 dim 1 : vector<8x128xf32>, i32 -> vector<8x128xf32>
    %15 = tpu.concatenate %7, %8, %9, %10, %6, %11, %12, %13, %14 in 0 : vector<8x128xf32>, vector<8x128xf32>, vector<8x128xf32>, vector<8x128xf32>, vector<8x128xf32>, vector<8x128xf32>, vector<8x128xf32>, vector<8x128xf32>, vector<8x128xf32> -> vector<72x128xf32>
    %c0_6 = arith.constant 0 : index
    %c0_7 = arith.constant 0 : index
    %16 = vector.load %arg4[%c0_6, %c0_7] : memref<72x128xf32, #tpu.memory_space<vmem>>, vector<72x128xf32>
    %17 = arith.mulf %15, %16 : vector<72x128xf32>
    %c32 = arith.constant 32 : index
    %c0_8 = arith.constant 0 : index
    %18 = vector.load %arg2[%c32, %c0_8] : memref<88x128xf32, #tpu.memory_space<vmem>>, vector<8x72xf32>
    %cst_9 = arith.constant dense<0.000000e+00> : vector<8x128xf32>
    %19 = tpu.matmul %18, %17, %cst_9 {dimension_numbers = #tpu.dot_dimension_numbers<[1], [0], [0], [1], [0, 0, 1, 1], [], []>} : vector<8x72xf32>, vector<72x128xf32>, vector<8x128xf32> -> vector<8x128xf32>
    %c32_10 = arith.constant 32 : index
    %c0_11 = arith.constant 0 : index
    %20 = vector.load %arg3[%c32_10, %c0_11] : memref<96x128xf32, #tpu.memory_space<vmem>>, vector<8x128xf32>
    %21 = arith.addf %19, %20 : vector<8x128xf32>
    %c8 = arith.constant 8 : index
    %c0_12 = arith.constant 0 : index
    %22 = vector.load %arg2[%c8, %c0_12] : memref<88x128xf32, #tpu.memory_space<vmem>>, vector<24x8xf32>
    %cst_13 = arith.constant dense<0.000000e+00> : vector<24x128xf32>
    %23 = tpu.matmul %22, %6, %cst_13 {dimension_numbers = #tpu.dot_dimension_numbers<[1], [0], [0], [1], [0, 0, 1, 1], [], []>} : vector<24x8xf32>, vector<8x128xf32>, vector<24x128xf32> -> vector<24x128xf32>
    %c8_14 = arith.constant 8 : index
    %c0_15 = arith.constant 0 : index
    %24 = vector.load %arg3[%c8_14, %c0_15] : memref<96x128xf32, #tpu.memory_space<vmem>>, vector<24x128xf32>
    %25 = arith.addf %23, %24 : vector<24x128xf32>
    %26 = vector.extract_strided_slice %25 {offsets = [0, 0], sizes = [8, 128], strides = [1, 1]} : vector<24x128xf32> to vector<8x128xf32>
    %27 = vector.extract_strided_slice %25 {offsets = [8, 0], sizes = [8, 128], strides = [1, 1]} : vector<24x128xf32> to vector<8x128xf32>
    %28 = vector.extract_strided_slice %25 {offsets = [16, 0], sizes = [8, 128], strides = [1, 1]} : vector<24x128xf32> to vector<8x128xf32>
    %c0_16 = arith.constant 0 : index
    %c0_17 = arith.constant 0 : index
    %c0_18 = arith.constant 0 : index
    %29 = vector.load %arg5[%c0_16, %c0_17, %c0_18] : memref<24x64x64xf32, #tpu.memory_space<vmem>>, vector<8x64x64xf32>
    %c8_19 = arith.constant 8 : index
    %c0_20 = arith.constant 0 : index
    %c0_21 = arith.constant 0 : index
    %30 = vector.load %arg5[%c8_19, %c0_20, %c0_21] : memref<24x64x64xf32, #tpu.memory_space<vmem>>, vector<8x64x64xf32>
    %c16 = arith.constant 16 : index
    %c0_22 = arith.constant 0 : index
    %c0_23 = arith.constant 0 : index
    %31 = vector.load %arg5[%c16, %c0_22, %c0_23] : memref<24x64x64xf32, #tpu.memory_space<vmem>>, vector<8x64x64xf32>
    %32 = vector.extract_strided_slice %26 {offsets = [0, 0], sizes = [8, 64], strides = [1, 1]} : vector<8x128xf32> to vector<8x64xf32>
    %33 = vector.extract_strided_slice %27 {offsets = [0, 0], sizes = [8, 64], strides = [1, 1]} : vector<8x128xf32> to vector<8x64xf32>
    %34 = vector.extract_strided_slice %28 {offsets = [0, 0], sizes = [8, 64], strides = [1, 1]} : vector<8x128xf32> to vector<8x64xf32>
    %cst_24 = arith.constant dense<0.000000e+00> : vector<64x64xf32>
    %35 = tpu.matmul %33, %32, %cst_24 {dimension_numbers = #tpu.dot_dimension_numbers<[0], [0], [1], [1], [0, 1, 1, 1], [], []>} : vector<8x64xf32>, vector<8x64xf32>, vector<64x64xf32> -> vector<64x64xf32>
    %36 = vector.shape_cast %32 : vector<8x64xf32> to vector<8x1x64xf32>
    %37 = vector.broadcast %36 : vector<8x1x64xf32> to vector<8x64x64xf32>
    %38 = arith.mulf %29, %37 : vector<8x64x64xf32>
    %cst_25 = arith.constant dense<0.000000e+00> : vector<64x64xf32>
    %39 = vector.multi_reduction <add>, %38, %cst_25 [0] : vector<8x64x64xf32> to vector<64x64xf32>
    %40 = vector.shape_cast %33 : vector<8x64xf32> to vector<8x64x1xf32>
    %41 = vector.broadcast %40 : vector<8x64x1xf32> to vector<8x64x64xf32>
    %42 = arith.mulf %30, %41 : vector<8x64x64xf32>
    %cst_26 = arith.constant dense<0.000000e+00> : vector<64x64xf32>
    %43 = vector.multi_reduction <add>, %42, %cst_26 [0] : vector<8x64x64xf32> to vector<64x64xf32>
    %44 = arith.addf %35, %39 : vector<64x64xf32>
    %45 = arith.addf %44, %43 : vector<64x64xf32>
    %cst_27 = arith.constant dense<0xFF800000> : vector<64xf32>
    %46 = vector.multi_reduction <maximumf>, %45, %cst_27 [0] : vector<64x64xf32> to vector<64xf32>
    %47 = vector.shape_cast %46 : vector<64xf32> to vector<1x64xf32>
    %48 = vector.broadcast %47 : vector<1x64xf32> to vector<64x64xf32>
    %49 = arith.subf %45, %48 : vector<64x64xf32>
    %50 = math.exp %49 : vector<64x64xf32>
    %cst_28 = arith.constant dense<0.000000e+00> : vector<64xf32>
    %51 = vector.multi_reduction <add>, %50, %cst_28 [0] : vector<64x64xf32> to vector<64xf32>
    %52 = vector.shape_cast %51 : vector<64xf32> to vector<1x64xf32>
    %53 = tpu.reciprocal %52 {approx = true} : vector<1x64xf32> -> vector<1x64xf32>
    %54 = vector.broadcast %53 : vector<1x64xf32> to vector<64x64xf32>
    %55 = arith.mulf %50, %54 : vector<64x64xf32>
    %cst_29 = arith.constant dense<0.000000e+00> : vector<8x64xf32>
    %56 = tpu.matmul %34, %55, %cst_29 {dimension_numbers = #tpu.dot_dimension_numbers<[1], [0], [0], [1], [0, 0, 1, 1], [], []>} : vector<8x64xf32>, vector<64x64xf32>, vector<8x64xf32> -> vector<8x64xf32>
    %57 = vector.shape_cast %55 : vector<64x64xf32> to vector<1x64x64xf32>
    %58 = vector.broadcast %57 : vector<1x64x64xf32> to vector<8x64x64xf32>
    %59 = arith.mulf %31, %58 : vector<8x64x64xf32>
    %cst_30 = arith.constant dense<0.000000e+00> : vector<8x64xf32>
    %60 = vector.multi_reduction <add>, %59, %cst_30 [1] : vector<8x64x64xf32> to vector<8x64xf32>
    %61 = arith.addf %56, %60 : vector<8x64xf32>
    %62 = vector.extract_strided_slice %26 {offsets = [0, 64], sizes = [8, 64], strides = [1, 1]} : vector<8x128xf32> to vector<8x64xf32>
    %63 = vector.extract_strided_slice %27 {offsets = [0, 64], sizes = [8, 64], strides = [1, 1]} : vector<8x128xf32> to vector<8x64xf32>
    %64 = vector.extract_strided_slice %28 {offsets = [0, 64], sizes = [8, 64], strides = [1, 1]} : vector<8x128xf32> to vector<8x64xf32>
    %cst_31 = arith.constant dense<0.000000e+00> : vector<64x64xf32>
    %65 = tpu.matmul %63, %62, %cst_31 {dimension_numbers = #tpu.dot_dimension_numbers<[0], [0], [1], [1], [0, 1, 1, 1], [], []>} : vector<8x64xf32>, vector<8x64xf32>, vector<64x64xf32> -> vector<64x64xf32>
    %66 = vector.shape_cast %62 : vector<8x64xf32> to vector<8x1x64xf32>
    %67 = vector.broadcast %66 : vector<8x1x64xf32> to vector<8x64x64xf32>
    %68 = arith.mulf %29, %67 : vector<8x64x64xf32>
    %cst_32 = arith.constant dense<0.000000e+00> : vector<64x64xf32>
    %69 = vector.multi_reduction <add>, %68, %cst_32 [0] : vector<8x64x64xf32> to vector<64x64xf32>
    %70 = vector.shape_cast %63 : vector<8x64xf32> to vector<8x64x1xf32>
    %71 = vector.broadcast %70 : vector<8x64x1xf32> to vector<8x64x64xf32>
    %72 = arith.mulf %30, %71 : vector<8x64x64xf32>
    %cst_33 = arith.constant dense<0.000000e+00> : vector<64x64xf32>
    %73 = vector.multi_reduction <add>, %72, %cst_33 [0] : vector<8x64x64xf32> to vector<64x64xf32>
    %74 = arith.addf %65, %69 : vector<64x64xf32>
    %75 = arith.addf %74, %73 : vector<64x64xf32>
    %cst_34 = arith.constant dense<0xFF800000> : vector<64xf32>
    %76 = vector.multi_reduction <maximumf>, %75, %cst_34 [0] : vector<64x64xf32> to vector<64xf32>
    %77 = vector.shape_cast %76 : vector<64xf32> to vector<1x64xf32>
    %78 = vector.broadcast %77 : vector<1x64xf32> to vector<64x64xf32>
    %79 = arith.subf %75, %78 : vector<64x64xf32>
    %80 = math.exp %79 : vector<64x64xf32>
    %cst_35 = arith.constant dense<0.000000e+00> : vector<64xf32>
    %81 = vector.multi_reduction <add>, %80, %cst_35 [0] : vector<64x64xf32> to vector<64xf32>
    %82 = vector.shape_cast %81 : vector<64xf32> to vector<1x64xf32>
    %83 = tpu.reciprocal %82 {approx = true} : vector<1x64xf32> -> vector<1x64xf32>
    %84 = vector.broadcast %83 : vector<1x64xf32> to vector<64x64xf32>
    %85 = arith.mulf %80, %84 : vector<64x64xf32>
    %cst_36 = arith.constant dense<0.000000e+00> : vector<8x64xf32>
    %86 = tpu.matmul %64, %85, %cst_36 {dimension_numbers = #tpu.dot_dimension_numbers<[1], [0], [0], [1], [0, 0, 1, 1], [], []>} : vector<8x64xf32>, vector<64x64xf32>, vector<8x64xf32> -> vector<8x64xf32>
    %87 = vector.shape_cast %85 : vector<64x64xf32> to vector<1x64x64xf32>
    %88 = vector.broadcast %87 : vector<1x64x64xf32> to vector<8x64x64xf32>
    %89 = arith.mulf %31, %88 : vector<8x64x64xf32>
    %cst_37 = arith.constant dense<0.000000e+00> : vector<8x64xf32>
    %90 = vector.multi_reduction <add>, %89, %cst_37 [1] : vector<8x64x64xf32> to vector<8x64xf32>
    %91 = arith.addf %86, %90 : vector<8x64xf32>
    %92 = tpu.concatenate %61, %91 in 1 : vector<8x64xf32>, vector<8x64xf32> -> vector<8x128xf32>
    %c40 = arith.constant 40 : index
    %c0_38 = arith.constant 0 : index
    %93 = vector.load %arg3[%c40, %c0_38] : memref<96x128xf32, #tpu.memory_space<vmem>>, vector<8x128xf32>
    %94 = arith.addf %92, %93 : vector<8x128xf32>
    %cst_39 = arith.constant 0.000000e+00 : f32
    %95 = vector.broadcast %cst_39 : f32 to vector<8x128xf32>
    %96 = arith.maximumf %21, %95 : vector<8x128xf32>
    %cst_40 = arith.constant 0.000000e+00 : f32
    %97 = vector.broadcast %cst_40 : f32 to vector<8x128xf32>
    %98 = arith.maximumf %94, %97 : vector<8x128xf32>
    %99 = tpu.concatenate %96, %98 in 0 : vector<8x128xf32>, vector<8x128xf32> -> vector<16x128xf32>
    %c40_41 = arith.constant 40 : index
    %c0_42 = arith.constant 0 : index
    %100 = vector.load %arg2[%c40_41, %c0_42] : memref<88x128xf32, #tpu.memory_space<vmem>>, vector<8x16xf32>
    %cst_43 = arith.constant dense<0.000000e+00> : vector<8x128xf32>
    %101 = tpu.matmul %100, %99, %cst_43 {dimension_numbers = #tpu.dot_dimension_numbers<[1], [0], [0], [1], [0, 0, 1, 1], [], []>} : vector<8x16xf32>, vector<16x128xf32>, vector<8x128xf32> -> vector<8x128xf32>
    %c48 = arith.constant 48 : index
    %c0_44 = arith.constant 0 : index
    %102 = vector.load %arg3[%c48, %c0_44] : memref<96x128xf32, #tpu.memory_space<vmem>>, vector<8x128xf32>
    %103 = arith.addf %101, %102 : vector<8x128xf32>
    %cst_45 = arith.constant 0.000000e+00 : f32
    %104 = vector.broadcast %cst_45 : f32 to vector<8x128xf32>
    %105 = arith.maximumf %103, %104 : vector<8x128xf32>
    %c48_46 = arith.constant 48 : index
    %c0_47 = arith.constant 0 : index
    %106 = vector.load %arg2[%c48_46, %c0_47] : memref<88x128xf32, #tpu.memory_space<vmem>>, vector<8x8xf32>
    %cst_48 = arith.constant dense<0.000000e+00> : vector<8x128xf32>
    %107 = tpu.matmul %106, %105, %cst_48 {dimension_numbers = #tpu.dot_dimension_numbers<[1], [0], [0], [1], [0, 0, 1, 1], [], []>} : vector<8x8xf32>, vector<8x128xf32>, vector<8x128xf32> -> vector<8x128xf32>
    %c56 = arith.constant 56 : index
    %c0_49 = arith.constant 0 : index
    %108 = vector.load %arg3[%c56, %c0_49] : memref<96x128xf32, #tpu.memory_space<vmem>>, vector<8x128xf32>
    %109 = arith.addf %107, %108 : vector<8x128xf32>
    %cst_50 = arith.constant 0.000000e+00 : f32
    %110 = vector.broadcast %cst_50 : f32 to vector<8x128xf32>
    %111 = arith.subf %110, %109 : vector<8x128xf32>
    %112 = math.exp %111 : vector<8x128xf32>
    %cst_51 = arith.constant 1.000000e+00 : f32
    %113 = vector.broadcast %cst_51 : f32 to vector<8x128xf32>
    %114 = arith.addf %113, %112 : vector<8x128xf32>
    %cst_52 = arith.constant 1.000000e+00 : f32
    %115 = vector.broadcast %cst_52 : f32 to vector<8x128xf32>
    %116 = arith.divf %115, %114 : vector<8x128xf32>
    %117 = arith.mulf %116, %94 : vector<8x128xf32>
    %118 = arith.addf %117, %21 : vector<8x128xf32>
    %cst_53 = arith.constant 0.000000e+00 : f32
    %119 = vector.broadcast %cst_53 : f32 to vector<8x128xf32>
    %120 = arith.maximumf %118, %119 : vector<8x128xf32>
    %c56_54 = arith.constant 56 : index
    %c0_55 = arith.constant 0 : index
    %121 = vector.load %arg2[%c56_54, %c0_55] : memref<88x128xf32, #tpu.memory_space<vmem>>, vector<32x8xf32>
    %cst_56 = arith.constant dense<0.000000e+00> : vector<32x128xf32>
    %122 = tpu.matmul %121, %120, %cst_56 {dimension_numbers = #tpu.dot_dimension_numbers<[1], [0], [0], [1], [0, 0, 1, 1], [], []>} : vector<32x8xf32>, vector<8x128xf32>, vector<32x128xf32> -> vector<32x128xf32>
    %c64 = arith.constant 64 : index
    %c0_57 = arith.constant 0 : index
    %123 = vector.load %arg3[%c64, %c0_57] : memref<96x128xf32, #tpu.memory_space<vmem>>, vector<32x128xf32>
    %124 = arith.addf %122, %123 : vector<32x128xf32>
    %125 = arith.addf %124, %0 : vector<32x128xf32>
    %cst_58 = arith.constant 0.000000e+00 : f32
    %126 = vector.broadcast %cst_58 : f32 to vector<32x128xf32>
    %127 = arith.maximumf %125, %126 : vector<32x128xf32>
    %c0_59 = arith.constant 0 : index
    %c0_60 = arith.constant 0 : index
    %128 = vector.load %arg6[%c0_59, %c0_60] : memref<32x128xf32, #tpu.memory_space<vmem>>, vector<32x128xf32>
    tpu.vector_store %arg6[%c0_59, %c0_60], %127 {strides = array<i32>} : memref<32x128xf32, #tpu.memory_space<vmem>>, vector<32x128xf32>,
    return
  }
  func.func @transform_0(%arg0: i32) -> (i32, i32) {
    %c0_i32 = arith.constant 0 : i32
    %c0_i32_0 = arith.constant 0 : i32
    return %c0_i32, %arg0 : i32, i32
  }
  func.func @transform_1(%arg0: i32) -> (i32, i32) {
    %c0_i32 = arith.constant 0 : i32
    %c0_i32_0 = arith.constant 0 : i32
    %c0_i32_1 = arith.constant 0 : i32
    return %c0_i32, %c0_i32_0 : i32, i32
  }
  func.func @transform_2(%arg0: i32) -> (i32, i32) {
    %c0_i32 = arith.constant 0 : i32
    %c0_i32_0 = arith.constant 0 : i32
    %c0_i32_1 = arith.constant 0 : i32
    return %c0_i32, %c0_i32_0 : i32, i32
  }
  func.func @transform_3(%arg0: i32) -> (i32, i32) {
    %c0_i32 = arith.constant 0 : i32
    %c0_i32_0 = arith.constant 0 : i32
    %c0_i32_1 = arith.constant 0 : i32
    return %c0_i32, %c0_i32_0 : i32, i32
  }
  func.func @transform_4(%arg0: i32) -> (i32, i32, i32) {
    %c0_i32 = arith.constant 0 : i32
    %c0_i32_0 = arith.constant 0 : i32
    %c0_i32_1 = arith.constant 0 : i32
    %c0_i32_2 = arith.constant 0 : i32
    return %c0_i32, %c0_i32_0, %c0_i32_1 : i32, i32, i32
  }
  func.func @transform_5(%arg0: i32) -> (i32, i32) {
    %c0_i32 = arith.constant 0 : i32
    %c0_i32_0 = arith.constant 0 : i32
    return %c0_i32, %arg0 : i32, i32
  }
}

</mosaic_0001>

<bundles_post_ra>
// kernel: pallas_forward.1
= control target key start
LH: loop header
LB: loop body
LE: loop exit
PB: predicated region body
PF: predicated region fallthrough
CT: control target
= control target key end

     0   :  { %10 = vsyncpa [#allocation3], 0  ;;  %s3802_s18 = smov [#allocation2]   ;;  %s5933_s0 = inlined_call_operand.vmem [shape: f32[32,128], index: 0, kind: input, shape index: {}]   ;;  %s5934_s1 = inlined_call_operand.vmem [shape: f32[88,128], index: 1, kind: input, shape index: {}]   ;;  %s5935_s2 = inlined_call_operand.vmem [shape: f32[96,128], index: 2, kind: input, shape index: {}]   ;;  %s5936_s3 = inlined_call_operand.vmem [shape: f32[72,128], index: 3, kind: input, shape index: {}]   ;;  %s5937_s4 = inlined_call_operand.hbm [shape: f32[24,64,64], index: 4, kind: input, shape index: {}]   ;;  %s5938_s5 = inlined_call_operand.vmem [shape: f32[32,128], index: 5, kind: output, shape index: {}]  }
   0x1   :  { %s24_s19 = sshll.u32 %s3802_s18, 4  ;;  %s25_s19 = int_to_ptr.vmem [resolvable:$true] %s24_s19 }
   0x2   :  { %s3788_s20 = scalar_lea.vmem %s25_s19, 24576  ;;  %p3793_p1 = scmp.lt.s32.totalorder %s25_s19, %s25_s19 }
   0x3   :  { %p3789_p0 = scmp.ne.s32.totalorder %s25_s19, %s3788_s20  ;;  %p3794_p2 = scmp.lt.s32.totalorder %s3788_s20, %s3788_s20 }
   0x5   :  { %p3795_p3 = por %p3794_p2, %p3793_p1 }
   0x7   :  { %p3796_p4 = pnand %p3795_p3, %p3789_p0 }
   0x9   :  { %3799 = shalt.err (!%p3796_p4)
}
   0xa   :  { %s3803_s21 = smov 128   ;;  %s3804_s22 = smov 8  }
   0xb   :  { %30 = dma.hbm_to_vmem [thread:$0]  %s5937_s4, 24576, %s25_s19, [#allocation3], %s3803_s21, %s3803_s21, %s3804_s22  }
   0xc   :  { %3800 = dma.done.wait [#allocation3], 24576  }
   0xd   :  { %3801 = vsyncadd [#allocation3], 4294942720  ;;  %v5939_v0 = vmov 0.0   ;;  %vm3806_vm0 = vmmov 0   ;;  %v37_v1 = vld [vmem:[%s5933_s0 + $0x18] sm:$0xff]  ;;  %v36_v2 = vld [vmem:[%s5933_s0 + $0x10] sm:$0xff]  ;;  %v520_v42 = vlaneseq }
   0xe   :  { %3433 = vmatprep.subr.mxu0 %v5939_v0  ;;  %3441 = vmatprep.mubr.msk.f32.mxu0 %vm3806_vm0, %v5939_v0  ;;  %v35_v3 = vld [vmem:[%s5933_s0 + $0x8] sm:$0xff]  ;;  %v34_v4 = vld [vmem:[%s5933_s0] sm:$0xff]  ;;  %vm40_vm1 = vcmask 261120   ;;  %vm231_vm2 = vcmask 64512   ;;  %s3807_s13 = smov 121   ;;  %s3808_s14 = smov 119  }
   0xf   :  { %3444 = vmatprep.subr.mxu1 %v5939_v0  ;;  %3462 = vmatprep.mubr.msk.f32.mxu1 %vm3806_vm0, %v5939_v0  ;;  %v38_v5 = vld [vmem:[%s5934_s1] sm:$0xff]  ;;  %v225_v11 = vld [vmem:[%s5934_s1 + $0x8] sm:$0xff]  ;;  %v226_v12 = vld [vmem:[%s5934_s1 + $0x10] sm:$0xff]  ;;  %s3809_s17 = smov 127   ;;  %s3810_s18 = smov 120   ;;  %vm151_vm3 = vcmask 588800  }
  0x10   :  { %3434 = vmatpush3.msra.mxu0 %v37_v1  ;;  %v39_v6 = vld [vmem:[%s5935_s2] sm:$0xff]  ;;  %s3811_s19 = smov 7   ;;  %s3812_s20 = smov 1   ;;  %v138_v17 = vld [vmem:[%s5936_s3 + $0x38] sm:$0xff]  ;;  %v137_v18 = vld [vmem:[%s5936_s3 + $0x30] sm:$0xff]  ;;  %v3932_v44 = vshrl.u32 %v520_v42, 7 }
  0x11   :  { %3435 = vmatprep.subr.mxu0 %v5939_v0  ;;  %s3813_s21 = smov 9   ;;  %v139_v13 = vld [vmem:[%s5936_s3 + $0x40] sm:$0xff]  ;;  %v136_v22 = vld [vmem:[%s5936_s3 + $0x28] sm:$0xff]  ;;  %v134_v28 = vld [vmem:[%s5936_s3 + $0x18] sm:$0xff]  ;;  %v3814_v40 = vmov 1966171168  }
  0x12   :  { %3436 = vmatpush3.msra.mxu0 %v36_v2  ;;  %v135_v25 = vld [vmem:[%s5936_s3 + $0x20] sm:$0xff]  ;;  %v133_v30 = vld [vmem:[%s5936_s3 + $0x10] sm:$0xff]  ;;  %v132_v32 = vld [vmem:[%s5936_s3 + $0x8] sm:$0xff]  ;;  %v518_v41 = vunpack.c.l.s4 %v3814_v40  ;;  %v567_v53 = vsub.s32 0, %v3932_v44  ;;  %vm669_vm4 = vcmask 523264   ;;  %vm1738_vm5 = vcmask 1041409  }
  0x13   :  { %3437 = vmatprep.subr.mxu0 %v5939_v0  ;;  %v131_v35 = vld [vmem:[%s5936_s3] sm:$0xff]  ;;  %v228_v45 = vld [vmem:[%s5935_s2 + $0x8] sm:$0xff]  ;;  %v229_v50 = vld [vmem:[%s5935_s2 + $0x10] sm:$0xff]  ;;  %vm1740_vm6 = vcmask 1042434   ;;  %vm1742_vm7 = vcmask 1043459   ;;  %vm1744_vm8 = vcmask 1044484  }
  0x14   :  { %3438 = vmatpush3.msra.mxu0 %v35_v3  ;;  %v149_v39 = vld [vmem:[%s5934_s1 + $0x20] sm:$0xff]  ;;  %v519_v43 = vunpack.c.0.s8 %v518_v41  ;;  %vm1746_vm9 = vcmask 1045509   ;;  %vm1748_vm10 = vcmask 1046534   ;;  %vm1750_vm11 = vcmask 1047559  }
  0x15   :  { %3439 = vmatprep.subr.mxu0 %v5939_v0  ;;  %v353_v42 = vld [vmem:[#allocation2 + $0x100] sm:$0xff]  ;;  %vm3058_vm12 = vcmask 130048  }
  0x16   :  { %3440 = vmatpush3.msra.mxu0 %v34_v4  ;;  %v522_v46 = vsub.s32 %v519_v43, %v3932_v44  ;;  %v361_v43 = vld [vmem:[#allocation2 + $0x140] sm:$0xff] }
  0x17   :  { %3442 = vmatmul.mubr.msk.f32.vlgmr.msra.gmra.mxu0 %vm40_vm1, %v38_v5  ;;  %3465 = vmatprep.subr.mxu0 %v5939_v0 }
  0x18   :  { %3467 = vmatprep.mubr.msk.f32.mxu0 %vm3806_vm0, %v5939_v0 }
  0xd7   :  { %v110_v7 = vpop.f32.mrf.mxu0 }
  0xd8   :  { %v111_v8 = vadd.f32 %v110_v7, %v39_v6  ;;  %v322_v7 = vld [vmem:[#allocation2 + $0x8] sm:$0xff] }
  0xd9   :  { %v3443_v9 = vpop.f32.mrf.mxu0 }
  0xda   :  { %v114_v10 = vmax.f32 %v111_v8, 0.0 }
  0xdc   :  { %125 = vrot.lane.b32.xlu1 %v114_v10, %s3807_s13  ;;  %129 = vrot.lane.b32.xlu0 %v114_v10, %s3808_s14  ;;  %v144_v29 = vmul.f32 %v135_v25, %v114_v10  ;;  %v337_v25 = vld [vmem:[#allocation2 + $0x80] sm:$0xff] }
  0xdd   :  { %3466 = vmatpush3.msra.mxu0 %v114_v10 }
  0xde   :  { %3468 = vmatmul.mubr.msk.f32.vlgmr.msra.gmra.mxu0 %vm231_vm2, %v225_v11  ;;  %3490 = vmatprep.subr.mxu0 %v5939_v0  ;;  %v338_v11 = vld [vmem:[#allocation2 + $0x88] sm:$0xff] }
  0xdf   :  { %3470 = vmatprep.mubr.msk.f32.mxu0 %vm3806_vm0, %v5939_v0 }
  0xe0   :  { %123 = vrot.lane.b32.xlu1 %v114_v10, %s3809_s17  ;;  %127 = vrot.lane.b32.xlu0 %v114_v10, %s3810_s18 }
  0xe2   :  { %3471 = vmatmul.mubr.msk.f32.gmra.mxu0 %vm231_vm2, %v226_v12 }
  0xe3   :  { %3473 = vmatprep.mubr.msk.f32.mxu0 %vm3806_vm0, %v5939_v0 }
  0xe4   :  { %119 = vrot.lane.b32.xlu1 %v114_v10, %s3811_s19  ;;  %121 = vrot.lane.b32.xlu0 %v114_v10, %s3812_s20 }
  0xe8   :  { %115 = vrot.lane.b32.xlu1 %v114_v10, %s3813_s21  ;;  %117 = vrot.lane.b32.xlu0 %v114_v10, %s3804_s22  ;;  %v330_v10 = vld [vmem:[#allocation2 + $0x48] sm:$0xff]  ;;  %s3815_s21 = smov 64  }
 0x14e   :  { %v126_v14 = vpop.permute.xlu1 %125  ;;  %v130_v15 = vpop.permute.xlu0 %129 }
 0x14f   :  { %v148_v16 = vmul.f32 %v139_v13, %v130_v15  ;;  %v146_v23 = vmul.f32 %v137_v18, %v126_v14 }
 0x151   :  { %3445 = vmatpush3.msra.mxu1 %v148_v16  ;;  %v346_v16 = vld [vmem:[#allocation2 + $0xc8] sm:$0xff] }
 0x152   :  { %v124_v19 = vpop.permute.xlu1 %123  ;;  %v128_v20 = vpop.permute.xlu0 %127  ;;  %3446 = vmatprep.subr.mxu1 %v5939_v0 }
 0x153   :  { %v147_v21 = vmul.f32 %v138_v17, %v128_v20  ;;  %v145_v26 = vmul.f32 %v136_v22, %v124_v19  ;;  %v354_v19 = vld [vmem:[#allocation2 + $0x108] sm:$0xff] }
 0x154   :  { %v362_v20 = vld [vmem:[#allocation2 + $0x148] sm:$0xff] }
 0x155   :  { %3447 = vmatpush3.msra.mxu1 %v147_v21 }
 0x156   :  { %3448 = vmatprep.subr.mxu1 %v5939_v0  ;;  %v122_v24 = vpop.permute.xlu0 %121  ;;  %v120_v27 = vpop.permute.xlu1 %119 }
 0x157   :  { %3449 = vmatpush3.msra.mxu1 %v146_v23  ;;  %v143_v31 = vmul.f32 %v134_v28, %v122_v24  ;;  %v142_v34 = vmul.f32 %v133_v30, %v120_v27  ;;  %v321_v23 = vld [vmem:[#allocation2] sm:$0xff] }
 0x158   :  { %3450 = vmatprep.subr.mxu1 %v5939_v0  ;;  %v329_v24 = vld [vmem:[#allocation2 + $0x40] sm:$0xff] }
 0x159   :  { %3451 = vmatpush3.msra.mxu1 %v145_v26  ;;  %v370_v26 = vld [vmem:[#allocation2 + $0x188] sm:$0xff] }
 0x15a   :  { %3452 = vmatprep.subr.mxu1 %v5939_v0  ;;  %v118_v33 = vpop.permute.xlu0 %117  ;;  %v116_v36 = vpop.permute.xlu1 %115 }
 0x15b   :  { %3453 = vmatpush3.msra.mxu1 %v144_v29  ;;  %v141_v37 = vmul.f32 %v132_v32, %v118_v33  ;;  %v140_v38 = vmul.f32 %v131_v35, %v116_v36  ;;  %v345_v33 = vld [vmem:[#allocation2 + $0xc0] sm:$0xff] }
 0x15c   :  { %3454 = vmatprep.subr.mxu1 %v5939_v0 }
 0x15d   :  { %3455 = vmatpush3.msra.mxu1 %v143_v31 }
 0x15e   :  { %3456 = vmatprep.subr.mxu1 %v5939_v0 }
 0x15f   :  { %3457 = vmatpush3.msra.mxu1 %v142_v34  ;;  %v378_v34 = vld [vmem:[#allocation2 + $0x1c8] sm:$0xff] }
 0x160   :  { %3458 = vmatprep.subr.mxu1 %v5939_v0 }
 0x161   :  { %3459 = vmatpush3.msra.mxu1 %v141_v37 }
 0x162   :  { %3460 = vmatprep.subr.mxu1 %v5939_v0 }
 0x163   :  { %3461 = vmatpush3.msra.mxu1 %v140_v38 }
 0x164   :  { %3463 = vmatmul.mubr.msk.f32.vlgmr.msra.gmra.mxu1 %vm151_vm3, %v149_v39  ;;  %v827_v39 = vsub.s32 1, %v3932_v44 }
 0x19e   :  { %v307_v47 = vpop.f32.mrf.mxu0 }
 0x19f   :  { %v3938_v48 = vadd.f32 %v307_v47, %v228_v45 }
 0x1a0   :  { %v3469_v49 = vpop.f32.mrf.mxu0 }
 0x1a1   :  { %v516_v51 = vcombine.high %v3938_v48, %v3938_v48  ;;  %v523_v52 = vrot.slane %v3938_v48, %v522_v46  ;;  %3476 = vmatprep.subr.mxu1 %v3938_v48 }
 0x1a2   :  { %v312_v54 = vpop.f32.mrf.mxu0  ;;  %3477 = vmatpush3.msra.mxu1 %v3938_v48 }
 0x1a3   :  { %v530_v55 = vrot.slane %v516_v51, %v522_v46  ;;  %v531_v56 = vcombine.high %v523_v52, %v523_v52  ;;  %v539_v57 = vrot.slane %v523_v52, %v522_v46  ;;  %v3949_v58 = vadd.f32 %v312_v54, %v229_v50  ;;  %3523 = vmatprep.subr.mxu1 %v5939_v0  ;;  %v324_v50 = vld [vmem:[#allocation2 + $0x18] sm:$0xff] }
 0x1a4   :  { %v3472_v59 = vpop.f32.mrf.mxu0  ;;  %v332_v51 = vld [vmem:[#allocation2 + $0x58] sm:$0xff] }
 0x1a5   :  { %v532_v60 = vcombine.high %v530_v55, %v530_v55  ;;  %v546_v61 = vrot.slane %v530_v55, %v522_v46  ;;  %v553_v62 = vrot.slane %v531_v56, %v522_v46  ;;  %v561_v63 = vcombine.high %v539_v57, %v539_v57  ;;  %1254 = vxpose.xlu0.b32.start.end [1/1] (short) (narrow) %v3949_v58, 64  ;;  %v369_v55 = vld [vmem:[#allocation2 + $0x180] sm:$0xff] }
 0x1a6   :  { %v3953_v1 = vrot.slane %v539_v57, %v567_v53  ;;  %v3956_v2 = vrot.slane %v3949_v58, %v567_v53  ;;  %v340_v57 = vld [vmem:[#allocation2 + $0x98] sm:$0xff] }
 0x1a7   :  { %v560_v3 = vrot.slane %v532_v60, %v522_v46  ;;  %v562_v4 = vcombine.high %v546_v61, %v546_v61  ;;  %v563_v5 = vcombine.high %v553_v62, %v553_v62  ;;  %v3958_v6 = vrot.slane %v553_v62, %v567_v53  ;;  %v377_v60 = vld [vmem:[#allocation2 + $0x1c0] sm:$0xff] }
 0x1a8   :  { %v3960_v8 = vrot.slane %v561_v63, %v567_v53  ;;  %v3962_v9 = vrot.slane %v546_v61, %v567_v53  ;;  %795 = vbcast.lane.b32.xlu1 %v3956_v2, 256  ;;  %v606_v17 = vmul.f32 %v3953_v1, %v322_v7  ;;  %v605_v36 = vmul.f32 %v3953_v1, %v321_v23  ;;  %v356_v23 = vld [vmem:[#allocation2 + $0x118] sm:$0xff] }
 0x1a9   :  { %v564_v12 = vcombine.high %v560_v3, %v560_v3  ;;  %v3965_v13 = vrot.slane %v563_v5, %v567_v53  ;;  %v3967_v14 = vrot.slane %v560_v3, %v567_v53  ;;  %v3969_v15 = vrot.slane %v562_v4, %v567_v53  ;;  %v348_v5 = vld [vmem:[#allocation2 + $0xd8] sm:$0xff] }
 0x1aa   :  { %5973 = vst [vmem:[#allocation5_spill] sm:$0xff] %v3962_v9  ;;  %v614_v21 = vmul.f32 %v3958_v6, %v330_v10  ;;  %v622_v22 = vmul.f32 %v3960_v8, %v338_v11  ;;  %v685_v28 = vsel %vm669_vm4, %v606_v17, 0.0  ;;  %v638_v30 = vmul.f32 %v3962_v9, %v354_v19 }
 0x1ab   :  { %5974 = vst [vmem:[#allocation6_spill] sm:$0xff] %v3969_v15  ;;  %v3972_v18 = vrot.slane %v564_v12, %v567_v53  ;;  %v630_v27 = vmul.f32 %v3965_v13, %v346_v16  ;;  %v646_v31 = vmul.f32 %v3967_v14, %v362_v20  ;;  %v613_v37 = vmul.f32 %v3958_v6, %v329_v24  ;;  %v323_v24 = vld [vmem:[#allocation2 + $0x10] sm:$0xff] }
 0x1ac   :  { %799 = vbcast.lane.b32.xlu1 %v3956_v2, 264  ;;  %v686_v29 = vsel %vm669_vm4, %v614_v21, 0.0  ;;  %v688_v35 = vsel %vm669_vm4, %v622_v22, 0.0  ;;  %v621_v38 = vmul.f32 %v3960_v8, %v337_v25  ;;  %v654_v40 = vmul.f32 %v3969_v15, %v370_v26 }
 0x1ad   :  { %5975 = vst [vmem:[#allocation7_spill] sm:$0xff] %v3972_v18  ;;  %v687_v32 = vadd.f32 %v686_v29, %v685_v28  ;;  %v690_v45 = vsel %vm669_vm4, %v630_v27, 0.0  ;;  %v629_v46 = vmul.f32 %v3965_v13, %v345_v33  ;;  %v670_v47 = vsel %vm669_vm4, %v605_v36, 0.0  ;;  %v331_v29 = vld [vmem:[#allocation2 + $0x50] sm:$0xff]  ;;  %v364_v33 = vld [vmem:[#allocation2 + $0x158] sm:$0xff] }
 0x1ae   :  { %v671_v49 = vsel %vm669_vm4, %v613_v37, 0.0  ;;  %v662_v52 = vmul.f32 %v3972_v18, %v378_v34  ;;  %v692_v54 = vsel %vm669_vm4, %v638_v30, 0.0  ;;  %v694_v59 = vsel %vm669_vm4, %v646_v31, 0.0  ;;  %v372_v37 = vld [vmem:[#allocation2 + $0x198] sm:$0xff] }
 0x1af   :  { %v689_v41 = vadd.f32 %v688_v35, %v687_v32  ;;  %v672_v56 = vadd.f32 %v671_v49, %v670_v47  ;;  %v637_v61 = vmul.f32 %v3962_v9, %v353_v42  ;;  %v645_v62 = vmul.f32 %v3967_v14, %v361_v43  ;;  %v339_v35 = vld [vmem:[#allocation2 + $0x90] sm:$0xff] }
 0x1b0   :  { %803 = vbcast.lane.b32.xlu1 %v3956_v2, 272  ;;  %v673_v63 = vsel %vm669_vm4, %v621_v38, 0.0  ;;  %v608_v7 = vmul.f32 %v3953_v1, %v324_v50  ;;  %v616_v10 = vmul.f32 %v3958_v6, %v332_v51  ;;  %v696_v11 = vsel %vm669_vm4, %v654_v40, 0.0  ;;  %v380_v38 = vld [vmem:[#allocation2 + $0x1d8] sm:$0xff]  ;;  %v347_v47 = vld [vmem:[#allocation2 + $0xd0] sm:$0xff] }
 0x1b1   :  { %v691_v53 = vadd.f32 %v690_v45, %v689_v41  ;;  %v674_v4 = vadd.f32 %v673_v63, %v672_v56  ;;  %v653_v12 = vmul.f32 %v3969_v15, %v369_v55  ;;  %v675_v16 = vsel %vm669_vm4, %v629_v46, 0.0 }
 0x1b2   :  { %v624_v17 = vmul.f32 %v3960_v8, %v340_v57  ;;  %v698_v20 = vsel %vm669_vm4, %v662_v52, 0.0  ;;  %v661_v21 = vmul.f32 %v3972_v18, %v377_v60  ;;  %v677_v25 = vsel %vm669_vm4, %v637_v61, 0.0  ;;  %v4028_v60 = vld [vmem:[#allocation2 + $0x28] sm:$0xff] }
 0x1b3   :  { %v693_v3 = vadd.f32 %v692_v54, %v691_v53  ;;  %v676_v22 = vadd.f32 %v675_v16, %v674_v4  ;;  %v632_v26 = vmul.f32 %v3965_v13, %v348_v5  ;;  %v715_v27 = vsel %vm669_vm4, %v608_v7, 0.0  ;;  %v4034_v5 = vld [vmem:[#allocation2 + $0x68] sm:$0xff] }
 0x1b4   :  { %807 = vbcast.lane.b32.xlu1 %v3956_v2, 280  ;;  %v716_v28 = vsel %vm669_vm4, %v616_v10, 0.0  ;;  %v679_v32 = vsel %vm669_vm4, %v645_v62, 0.0  ;;  %v681_v36 = vsel %vm669_vm4, %v653_v12, 0.0  ;;  %v640_v40 = vmul.f32 %v3962_v9, %v356_v23  ;;  %v363_v62 = vld [vmem:[#allocation2 + $0x150] sm:$0xff]  ;;  %v4043_v16 = vld [vmem:[#allocation2 + $0xa8] sm:$0xff] }
 0x1b5   :  { %v695_v19 = vadd.f32 %v694_v59, %v693_v3  ;;  %v678_v31 = vadd.f32 %v677_v25, %v676_v22  ;;  %v717_v34 = vadd.f32 %v716_v28, %v715_v27  ;;  %v718_v41 = vsel %vm669_vm4, %v624_v17, 0.0  ;;  %v355_v59 = vld [vmem:[#allocation2 + $0x110] sm:$0xff] }
 0x1b6   :  { %v607_v42 = vmul.f32 %v3953_v1, %v323_v24  ;;  %v615_v49 = vmul.f32 %v3958_v6, %v331_v29  ;;  %v683_v50 = vsel %vm669_vm4, %v661_v21, 0.0  ;;  %v648_v51 = vmul.f32 %v3967_v14, %v364_v33 }
 0x1b7   :  { %v697_v30 = vadd.f32 %v696_v11, %v695_v19  ;;  %v680_v45 = vadd.f32 %v679_v32, %v678_v31  ;;  %v719_v46 = vadd.f32 %v718_v41, %v717_v34  ;;  %v720_v52 = vsel %vm669_vm4, %v632_v26, 0.0  ;;  %v371_v19 = vld [vmem:[#allocation2 + $0x190] sm:$0xff]  ;;  %v350_v26 = vld [vmem:[#allocation2 + $0xe8] sm:$0xff] }
 0x1b8   :  { %811 = vbcast.lane.b32.xlu1 %v3956_v2, 288  ;;  %v623_v53 = vmul.f32 %v3960_v8, %v339_v35  ;;  %v656_v55 = vmul.f32 %v3969_v15, %v372_v37  ;;  %v664_v56 = vmul.f32 %v3972_v18, %v380_v38  ;;  %v722_v61 = vsel %vm669_vm4, %v640_v40, 0.0  ;;  %v4061_v37 = vld [vmem:[#allocation2 + $0x20] sm:$0xff] }
 0x1b9   :  { %v4018_v43 = vadd.f32 %v698_v20, %v697_v30  ;;  %v682_v54 = vadd.f32 %v681_v36, %v680_v45  ;;  %v721_v57 = vadd.f32 %v720_v52, %v719_v46  ;;  %v631_v63 = vmul.f32 %v3965_v13, %v347_v47  ;;  %v379_v20 = vld [vmem:[#allocation2 + $0x1d0] sm:$0xff]  ;;  %v358_v36 = vld [vmem:[#allocation2 + $0x128] sm:$0xff]  ;;  %v4063_v38 = vld [vmem:[#allocation2 + $0x60] sm:$0xff] }
 0x1ba   :  { %v700_v3 = vsel %vm669_vm4, %v607_v42, 0.0  ;;  %v701_v4 = vsel %vm669_vm4, %v615_v49, 0.0  ;;  %v4039_v7 = vrot.slane %v3949_v58, %v827_v39  ;;  %v724_v17 = vsel %vm669_vm4, %v648_v51, 0.0  ;;  %v4069_v46 = vld [vmem:[#allocation2 + $0xa0] sm:$0xff]  ;;  %v366_v51 = vld [vmem:[#allocation2 + $0x168] sm:$0xff] }
 0x1bb   :  { %5976 = vst [vmem:[#allocation8_spill] sm:$0xff] %v4018_v43  ;;  %v4041_v10 = vadd.f32 %v683_v50, %v682_v54  ;;  %v723_v11 = vadd.f32 %v722_v61, %v721_v57  ;;  %v702_v12 = vadd.f32 %v701_v4, %v700_v3  ;;  %v639_v21 = vmul.f32 %v3962_v9, %v355_v59  ;;  %v357_v3 = vld [vmem:[#allocation2 + $0x120] sm:$0xff]  ;;  %v412_v43 = vld [vmem:[#allocation2 + $0x2d0] sm:$0xff] }
 0x1bc   :  { %815 = vbcast.lane.b32.xlu1 %v3956_v2, 296  ;;  %v703_v22 = vsel %vm669_vm4, %v623_v53, 0.0  ;;  %v610_v23 = vmul.f32 %v3953_v1, %v4028_v60  ;;  %v647_v24 = vmul.f32 %v3967_v14, %v363_v62  ;;  %v618_v27 = vmul.f32 %v3958_v6, %v4034_v5  ;;  %v349_v53 = vld [vmem:[#allocation2 + $0xe0] sm:$0xff]  ;;  %v374_v62 = vld [vmem:[#allocation2 + $0x1a8] sm:$0xff] }
 0x1bd   :  { %5977 = vst [vmem:[#allocation9_spill] sm:$0xff] %v4041_v10  ;;  %v725_v39 = vadd.f32 %v724_v17, %v723_v11  ;;  %v704_v25 = vadd.f32 %v703_v22, %v702_v12  ;;  %v726_v28 = vsel %vm669_vm4, %v656_v55, 0.0  ;;  %v728_v29 = vsel %vm669_vm4, %v664_v56, 0.0  ;;  %v382_v12 = vld [vmem:[#allocation2 + $0x1e8] sm:$0xff]  ;;  %v4341_v10 = vld [vmem:[#allocation2 + $0x230] sm:$0xff] }
 0x1be   :  { %v705_v30 = vsel %vm669_vm4, %v631_v63, 0.0  ;;  %v626_v31 = vmul.f32 %v3960_v8, %v4043_v16  ;;  %v655_v33 = vmul.f32 %v3969_v15, %v371_v19  ;;  %v663_v34 = vmul.f32 %v3972_v18, %v379_v20  ;;  %6004 = vst [vmem:[#allocation36_spill] sm:$0xff] %v4341_v10 }
 0x1bf   :  { %v727_v32 = vadd.f32 %v726_v28, %v725_v39  ;;  %v706_v35 = vadd.f32 %v705_v30, %v704_v25  ;;  %v707_v40 = vsel %vm669_vm4, %v639_v21, 0.0  ;;  %v634_v41 = vmul.f32 %v3965_v13, %v350_v26  ;;  %v4093_v25 = vld [vmem:[#allocation2 + $0x78] sm:$0xff]  ;;  %v365_v28 = vld [vmem:[#allocation2 + $0x160] sm:$0xff] }
 0x1c0   :  { %819 = vbcast.lane.b32.xlu1 %v3956_v2, 304  ;;  %v745_v42 = vsel %vm669_vm4, %v610_v23, 0.0  ;;  %v746_v45 = vsel %vm669_vm4, %v618_v27, 0.0  ;;  %v709_v50 = vsel %vm669_vm4, %v647_v24, 0.0  ;;  %v642_v54 = vmul.f32 %v3962_v9, %v358_v36  ;;  %v4091_v24 = vld [vmem:[#allocation2 + $0x38] sm:$0xff] }
 0x1c1   :  { %v4072_v47 = vadd.f32 %v728_v29, %v727_v32  ;;  %v708_v49 = vadd.f32 %v707_v40, %v706_v35  ;;  %v747_v52 = vadd.f32 %v746_v45, %v745_v42  ;;  %v748_v55 = vsel %vm669_vm4, %v626_v31, 0.0  ;;  %v4098_v31 = vld [vmem:[#allocation2 + $0xb8] sm:$0xff]  ;;  %v373_v35 = vld [vmem:[#allocation2 + $0x1a0] sm:$0xff] }
 0x1c2   :  { %v609_v56 = vmul.f32 %v3953_v1, %v4061_v37  ;;  %v617_v57 = vmul.f32 %v3958_v6, %v4063_v38  ;;  %v711_v61 = vsel %vm669_vm4, %v655_v33, 0.0  ;;  %v625_v4 = vmul.f32 %v3960_v8, %v4069_v46  ;;  %v352_v42 = vld [vmem:[#allocation2 + $0xf8] sm:$0xff] }
 0x1c3   :  { %5978 = vst [vmem:[#allocation10_spill] sm:$0xff] %v4072_v47  ;;  %v710_v59 = vadd.f32 %v709_v50, %v708_v49  ;;  %v749_v63 = vadd.f32 %v748_v55, %v747_v52  ;;  %v713_v11 = vsel %vm669_vm4, %v663_v34, 0.0  ;;  %v650_v17 = vmul.f32 %v3967_v14, %v366_v51  ;;  %v381_v51 = vld [vmem:[#allocation2 + $0x1e0] sm:$0xff] }
 0x1c4   :  { %823 = vbcast.lane.b32.xlu1 %v3956_v2, 312  ;;  %v750_v19 = vsel %vm669_vm4, %v634_v41, 0.0  ;;  %v633_v20 = vmul.f32 %v3965_v13, %v349_v53  ;;  %v730_v23 = vsel %vm669_vm4, %v609_v56, 0.0  ;;  %v731_v39 = vsel %vm669_vm4, %v617_v57, 0.0 }
 0x1c5   :  { %v712_v21 = vadd.f32 %v711_v61, %v710_v59  ;;  %v751_v22 = vadd.f32 %v750_v19, %v749_v63  ;;  %v658_v26 = vmul.f32 %v3969_v15, %v374_v62  ;;  %v752_v27 = vsel %vm669_vm4, %v642_v54, 0.0  ;;  %v360_v61 = vld [vmem:[#allocation2 + $0x138] sm:$0xff] }
 0x1c6   :  { %v641_v29 = vmul.f32 %v3962_v9, %v357_v3  ;;  %v732_v30 = vadd.f32 %v731_v39, %v730_v23  ;;  %v666_v33 = vmul.f32 %v3972_v18, %v382_v12  ;;  %v733_v36 = vsel %vm669_vm4, %v625_v4, 0.0  ;;  %v4122_v12 = vld [vmem:[#allocation2 + $0x70] sm:$0xff] }
 0x1c7   :  { %v4100_v32 = vadd.f32 %v713_v11, %v712_v21  ;;  %v753_v34 = vadd.f32 %v752_v27, %v751_v22  ;;  %v754_v40 = vsel %vm669_vm4, %v650_v17, 0.0  ;;  %v612_v45 = vmul.f32 %v3953_v1, %v4091_v24  ;;  %v4120_v11 = vld [vmem:[#allocation2 + $0x30] sm:$0xff]  ;;  %v368_v21 = vld [vmem:[#allocation2 + $0x178] sm:$0xff] }
 0x1c8   :  { %834 = vbcast.lane.b32.xlu1 %v4039_v7, 264  ;;  %v734_v41 = vadd.f32 %v733_v36, %v732_v30  ;;  %v620_v49 = vmul.f32 %v3958_v6, %v4093_v25  ;;  %v649_v52 = vmul.f32 %v3967_v14, %v365_v28  ;;  %v735_v53 = vsel %vm669_vm4, %v633_v20, 0.0  ;;  %v4126_v23 = vld [vmem:[#allocation2 + $0xb0] sm:$0xff]  ;;  %v376_v27 = vld [vmem:[#allocation2 + $0x1b8] sm:$0xff] }
 0x1c9   :  { %5979 = vst [vmem:[#allocation11_spill] sm:$0xff] %v4100_v32  ;;  %v755_v50 = vadd.f32 %v754_v40, %v753_v34  ;;  %v628_v54 = vmul.f32 %v3960_v8, %v4098_v31  ;;  %v756_v55 = vsel %vm669_vm4, %v658_v26, 0.0  ;;  %v657_v56 = vmul.f32 %v3969_v15, %v373_v35  ;;  %v351_v34 = vld [vmem:[#allocation2 + $0xf0] sm:$0xff] }
 0x1ca   :  { %v736_v57 = vadd.f32 %v735_v53, %v734_v41  ;;  %v737_v59 = vsel %vm669_vm4, %v641_v29, 0.0  ;;  %v636_v63 = vmul.f32 %v3965_v13, %v352_v42  ;;  %v775_v3 = vsel %vm669_vm4, %v612_v45, 0.0 }
 0x1cb   :  { %v757_v62 = vadd.f32 %v756_v55, %v755_v50  ;;  %v776_v4 = vsel %vm669_vm4, %v620_v49, 0.0  ;;  %v758_v17 = vsel %vm669_vm4, %v666_v33, 0.0  ;;  %v665_v19 = vmul.f32 %v3972_v18, %v381_v51  ;;  %v384_v51 = vld [vmem:[#allocation2 + $0x1f8] sm:$0xff] }
 0x1cc   :  { %838 = vbcast.lane.b32.xlu1 %v4039_v7, 272  ;;  %v738_v20 = vadd.f32 %v737_v59, %v736_v57  ;;  %v777_v22 = vadd.f32 %v776_v4, %v775_v3  ;;  %v739_v26 = vsel %vm669_vm4, %v649_v52, 0.0  ;;  %v644_v28 = vmul.f32 %v3962_v9, %v360_v61 }
 0x1cd   :  { %v4129_v39 = vadd.f32 %v758_v17, %v757_v62  ;;  %v778_v29 = vsel %vm669_vm4, %v628_v54, 0.0  ;;  %v611_v35 = vmul.f32 %v3953_v1, %v4120_v11  ;;  %v619_v36 = vmul.f32 %v3958_v6, %v4122_v12  ;;  %v359_v54 = vld [vmem:[#allocation2 + $0x130] sm:$0xff] }
 0x1ce   :  { %v740_v30 = vadd.f32 %v739_v26, %v738_v20  ;;  %v779_v33 = vadd.f32 %v778_v29, %v777_v22  ;;  %v741_v40 = vsel %vm669_vm4, %v657_v56, 0.0  ;;  %v652_v41 = vmul.f32 %v3967_v14, %v368_v21  ;;  %v375_v22 = vld [vmem:[#allocation2 + $0x1b0] sm:$0xff] }
 0x1cf   :  { %5980 = vst [vmem:[#allocation12_spill] sm:$0xff] %v4129_v39  ;;  %v780_v42 = vsel %vm669_vm4, %v636_v63, 0.0  ;;  %v627_v45 = vmul.f32 %v3960_v8, %v4126_v23  ;;  %v743_v50 = vsel %vm669_vm4, %v665_v19, 0.0  ;;  %v660_v52 = vmul.f32 %v3969_v15, %v376_v27  ;;  %v367_v63 = vld [vmem:[#allocation2 + $0x170] sm:$0xff]  ;;  %v406_v39 = vld [vmem:[#allocation2 + $0x2a0] sm:$0xff] }
 0x1d0   :  { %842 = vbcast.lane.b32.xlu1 %v4039_v7, 280  ;;  %v742_v49 = vadd.f32 %v741_v40, %v740_v30  ;;  %v781_v53 = vadd.f32 %v780_v42, %v779_v33  ;;  %v782_v55 = vsel %vm669_vm4, %v644_v28, 0.0  ;;  %v635_v56 = vmul.f32 %v3965_v13, %v351_v34  ;;  %v383_v33 = vld [vmem:[#allocation2 + $0x1f0] sm:$0xff] }
 0x1d1   :  { %v760_v57 = vsel %vm669_vm4, %v611_v35, 0.0  ;;  %v761_v59 = vsel %vm669_vm4, %v619_v36, 0.0  ;;  %v668_v4 = vmul.f32 %v3972_v18, %v384_v51  ;;  %v784_v17 = vsel %vm669_vm4, %v652_v41, 0.0 }
 0x1d2   :  { %v4150_v61 = vadd.f32 %v743_v50, %v742_v49  ;;  %v783_v62 = vadd.f32 %v782_v55, %v781_v53  ;;  %v762_v3 = vadd.f32 %v761_v59, %v760_v57  ;;  %v643_v19 = vmul.f32 %v3962_v9, %v359_v54 }
 0x1d3   :  { %v763_v20 = vsel %vm669_vm4, %v627_v45, 0.0  ;;  %v786_v27 = vsel %vm669_vm4, %v660_v52, 0.0  ;;  %v651_v28 = vmul.f32 %v3967_v14, %v367_v63  ;;  %v765_v29 = vsel %vm669_vm4, %v635_v56, 0.0 }
 0x1d4   :  { %846 = vbcast.lane.b32.xlu1 %v4039_v7, 288  ;;  %5981 = vst [vmem:[#allocation13_spill] sm:$0xff] %v4150_v61  ;;  %v785_v21 = vadd.f32 %v784_v17, %v783_v62  ;;  %v764_v26 = vadd.f32 %v763_v20, %v762_v3  ;;  %v788_v35 = vsel %vm669_vm4, %v668_v4, 0.0  ;;  %v659_v36 = vmul.f32 %v3969_v15, %v375_v22  ;;  %v4317_v15 = vld [vmem:[#allocation2 + $0x210] sm:$0xff] }
 0x1d5   :  { %v767_v40 = vsel %vm669_vm4, %v643_v19, 0.0  ;;  %v667_v45 = vmul.f32 %v3972_v18, %v383_v33  ;;  %v769_v49 = vsel %vm669_vm4, %v651_v28, 0.0  ;;  %v862_v51 = vsub.s32 2, %v3932_v44  ;;  %5997 = vst [vmem:[#allocation29_spill] sm:$0xff] %v4317_v15  ;;  %v4327_v18 = vld [vmem:[#allocation2 + $0x220] sm:$0xff] }
 0x1d6   :  { %v787_v30 = vadd.f32 %v786_v27, %v785_v21  ;;  %v766_v34 = vadd.f32 %v765_v29, %v764_v26  ;;  %v771_v52 = vsel %vm669_vm4, %v659_v36, 0.0  ;;  %v897_v57 = vsub.s32 3, %v3932_v44  ;;  %v227_v26 = vld [vmem:[%s5934_s1 + $0x18] sm:$0xff]  ;;  %6000 = vst [vmem:[#allocation32_spill] sm:$0xff] %v4327_v18 }
 0x1d7   :  { %v773_v54 = vsel %vm669_vm4, %v667_v45, 0.0  ;;  %v4175_v56 = vrot.slane %v3949_v58, %v862_v51  ;;  %v932_v62 = vsub.s32 4, %v3932_v44  ;;  %v967_v3 = vsub.s32 5, %v3932_v44  ;;  %3474 = vmatmul.mubr.msk.f32.gmra.mxu0 %vm231_vm2, %v227_v26 }
 0x1d8   :  { %850 = vbcast.lane.b32.xlu1 %v4039_v7, 296  ;;  %v4163_v41 = vadd.f32 %v788_v35, %v787_v30  ;;  %v768_v42 = vadd.f32 %v767_v40, %v766_v34  ;;  %v4182_v59 = vrot.slane %v3949_v58, %v897_v57  ;;  %v1002_v17 = vsub.s32 6, %v3932_v44  ;;  %3506 = vmatprep.mubr.msk.f32.mxu0 %vm3806_vm0, %v5939_v0 }
 0x1d9   :  { %5984 = vst [vmem:[#allocation16_spill] sm:$0xff] %v4175_v56  ;;  %v4192_v63 = vrot.slane %v3949_v58, %v932_v62  ;;  %v4204_v4 = vrot.slane %v3949_v58, %v967_v3  ;;  %v1037_v28 = vsub.s32 7, %v3932_v44 }
 0x1da   :  { %5982 = vst [vmem:[#allocation14_spill] sm:$0xff] %v4163_v41  ;;  %v770_v50 = vadd.f32 %v769_v49, %v768_v42  ;;  %5985 = vst [vmem:[#allocation17_spill] sm:$0xff] %v4182_v59  ;;  %v4216_v19 = vrot.slane %v3949_v58, %v1002_v17 }
 0x1db   :  { %5986 = vst [vmem:[#allocation18_spill] sm:$0xff] %v4204_v4  ;;  %v4244_v33 = vrot.slane %v3949_v58, %v1037_v28 }
 0x1dc   :  { %854 = vbcast.lane.b32.xlu1 %v4039_v7, 304  ;;  %v772_v53 = vadd.f32 %v771_v52, %v770_v50  ;;  %5987 = vst [vmem:[#allocation19_spill] sm:$0xff] %v4216_v19 }
 0x1dd   :  { %5988 = vst [vmem:[#allocation20_spill] sm:$0xff] %v4244_v33 }
 0x1de   :  { %v4172_v55 = vadd.f32 %v773_v54, %v772_v53 }
 0x1e0   :  { %858 = vbcast.lane.b32.xlu1 %v4039_v7, 312  ;;  %5983 = vst [vmem:[#allocation15_spill] sm:$0xff] %v4172_v55 }
 0x1e4   :  { %865 = vbcast.lane.b32.xlu1 %v4175_v56, 256 }
 0x1e8   :  { %869 = vbcast.lane.b32.xlu1 %v4175_v56, 264 }
 0x1ea   :  { %830 = vbcast.lane.b32.xlu0 %v4039_v7, 256 }
 0x1ec   :  { %873 = vbcast.lane.b32.xlu1 %v4175_v56, 272 }
 0x1ee   :  { %908 = vbcast.lane.b32.xlu0 %v4182_v59, 272 }
 0x1f0   :  { %877 = vbcast.lane.b32.xlu1 %v4175_v56, 280 }
 0x1f2   :  { %916 = vbcast.lane.b32.xlu0 %v4182_v59, 288 }
 0x1f4   :  { %881 = vbcast.lane.b32.xlu1 %v4175_v56, 288 }
 0x1f6   :  { %924 = vbcast.lane.b32.xlu0 %v4182_v59, 304 }
 0x1f8   :  { %885 = vbcast.lane.b32.xlu1 %v4175_v56, 296 }
 0x1fa   :  { %935 = vbcast.lane.b32.xlu0 %v4192_v63, 256 }
 0x1fc   :  { %889 = vbcast.lane.b32.xlu1 %v4175_v56, 304 }
 0x1fe   :  { %943 = vbcast.lane.b32.xlu0 %v4192_v63, 272 }
 0x200   :  { %893 = vbcast.lane.b32.xlu1 %v4175_v56, 312 }
 0x202   :  { %951 = vbcast.lane.b32.xlu0 %v4192_v63, 288 }
 0x204   :  { %900 = vbcast.lane.b32.xlu1 %v4182_v59, 256 }
 0x206   :  { %959 = vbcast.lane.b32.xlu0 %v4192_v63, 304 }
 0x208   :  { %904 = vbcast.lane.b32.xlu1 %v4182_v59, 264 }
 0x20a   :  { %970 = vbcast.lane.b32.xlu0 %v4204_v4, 256 }
 0x20c   :  { %912 = vbcast.lane.b32.xlu1 %v4182_v59, 280 }
 0x20e   :  { %978 = vbcast.lane.b32.xlu0 %v4204_v4, 272 }
 0x210   :  { %920 = vbcast.lane.b32.xlu1 %v4182_v59, 296 }
 0x212   :  { %986 = vbcast.lane.b32.xlu0 %v4204_v4, 288 }
 0x214   :  { %928 = vbcast.lane.b32.xlu1 %v4182_v59, 312 }
 0x216   :  { %994 = vbcast.lane.b32.xlu0 %v4204_v4, 304 }
 0x218   :  { %939 = vbcast.lane.b32.xlu1 %v4192_v63, 264 }
 0x21a   :  { %v4219_v20 = vpop.permute.xlu1 %795  ;;  %1005 = vbcast.lane.b32.xlu0 %v4216_v19, 256 }
 0x21c   :  { %947 = vbcast.lane.b32.xlu1 %v4192_v63, 280 }
 0x21e   :  { %v4223_v21 = vpop.permute.xlu1 %799  ;;  %1013 = vbcast.lane.b32.xlu0 %v4216_v19, 272 }
 0x220   :  { %955 = vbcast.lane.b32.xlu1 %v4192_v63, 296 }
 0x221   :  { %v1270_v22 = vpop.trf.xlu0 }
 0x222   :  { %v4230_v27 = vpop.permute.xlu1 %803  ;;  %3478 = vmatprep.mubr.msk.f32.mxu1 %vm231_vm2, %v1270_v22  ;;  %1021 = vbcast.lane.b32.xlu0 %v4216_v19, 288 }
 0x223   :  { %v1072_v41 = vmul.f32 %v4230_v27, %v4317_v15  ;;  %v4335_v15 = vld [vmem:[#allocation2 + $0x240] sm:$0xff] }
 0x224   :  { %963 = vbcast.lane.b32.xlu1 %v4192_v63, 312  ;;  %6002 = vst [vmem:[#allocation34_spill] sm:$0xff] %v4335_v15 }
 0x225   :  { %v1271_v29 = vpop.trf.xlu0  ;;  %v1164_v27 = vsel %vm669_vm4, %v1072_v41, 0.0 }
 0x226   :  { %v4239_v30 = vpop.permute.xlu1 %807  ;;  %3479 = vmatmul.mubr.msk.f32.vlgmr.msra.gmra.mxu1 %vm231_vm2, %v1271_v29  ;;  %1029 = vbcast.lane.b32.xlu0 %v4216_v19, 304 }
 0x228   :  { %974 = vbcast.lane.b32.xlu1 %v4204_v4, 264 }
 0x229   :  { %v1272_v34 = vpop.trf.xlu0 }
 0x22a   :  { %v4247_v35 = vpop.permute.xlu1 %811  ;;  %3481 = vmatprep.mubr.msk.f32.mxu1 %vm231_vm2, %v1272_v34  ;;  %1040 = vbcast.lane.b32.xlu0 %v4244_v33, 256 }
 0x22c   :  { %982 = vbcast.lane.b32.xlu1 %v4204_v4, 280 }
 0x22d   :  { %v1273_v44 = vpop.trf.xlu0 }
 0x22e   :  { %v4252_v36 = vpop.permute.xlu1 %815  ;;  %3482 = vmatmul.mubr.msk.f32.gmra.mxu1 %vm231_vm2, %v1273_v44  ;;  %1048 = vbcast.lane.b32.xlu0 %v4244_v33, 272 }
 0x22f   :  { %5989 = vst [vmem:[#allocation21_spill] sm:$0xff] %v4252_v36 }
 0x230   :  { %990 = vbcast.lane.b32.xlu1 %v4204_v4, 296 }
 0x231   :  { %v1274_v40 = vpop.trf.xlu0 }
 0x232   :  { %v4257_v42 = vpop.permute.xlu1 %819  ;;  %3484 = vmatprep.mubr.msk.f32.mxu1 %vm231_vm2, %v1274_v40  ;;  %1056 = vbcast.lane.b32.xlu0 %v4244_v33, 288  ;;  %v4304_v40 = vpop.f32.mrf.mxu1 }
 0x233   :  { %5994 = vst [vmem:[#allocation26_spill] sm:$0xff] %v4304_v40 }
 0x234   :  { %998 = vbcast.lane.b32.xlu1 %v4204_v4, 312  ;;  %v408_v4 = vld [vmem:[#allocation2 + $0x2b0] sm:$0xff] }
 0x235   :  { %v1275_v45 = vpop.trf.xlu0 }
 0x236   :  { %v4262_v49 = vpop.permute.xlu1 %823  ;;  %3485 = vmatmul.mubr.msk.f32.gmra.mxu1 %vm231_vm2, %v1275_v45  ;;  %1064 = vbcast.lane.b32.xlu0 %v4244_v33, 304  ;;  %v3464_v45 = vpop.f32.mrf.mxu1 }
 0x237   :  { %5990 = vst [vmem:[#allocation22_spill] sm:$0xff] %v4262_v49  ;;  %v404_v45 = vld [vmem:[#allocation2 + $0x290] sm:$0xff] }
 0x238   :  { %1009 = vbcast.lane.b32.xlu1 %v4216_v19, 264 }
 0x239   :  { %v1276_v50 = vpop.trf.xlu0 }
 0x23a   :  { %v4267_v51 = vpop.permute.xlu1 %834  ;;  %3487 = vmatprep.mubr.msk.f32.mxu1 %vm231_vm2, %v1276_v50  ;;  %2475 = vrot.lane.b32.xlu0 %v3949_v58, %s3815_s21 }
 0x23c   :  { %1017 = vbcast.lane.b32.xlu1 %v4216_v19, 280 }
 0x23d   :  { %v1277_v52 = vpop.trf.xlu0 }
 0x23e   :  { %v839_v53 = vpop.permute.xlu1 %838  ;;  %3488 = vmatmul.mubr.msk.f32.gmra.mxu1 %vm231_vm2, %v1277_v52 }
 0x23f   :  { %3539 = vmatprep.mubr.msk.f32.mxu1 %vm3806_vm0, %v5939_v0  ;;  %v4315_v0 = vld [vmem:[#allocation2 + $0x250] sm:$0xff] }
 0x240   :  { %1025 = vbcast.lane.b32.xlu1 %v4216_v19, 296  ;;  %5996 = vst [vmem:[#allocation28_spill] sm:$0xff] %v4315_v0 }
 0x242   :  { %v4277_v54 = vpop.permute.xlu1 %842 }
 0x244   :  { %1033 = vbcast.lane.b32.xlu1 %v4216_v19, 312  ;;  %v4325_v19 = vld [vmem:[#allocation2 + $0x260] sm:$0xff] }
 0x245   :  { %5999 = vst [vmem:[#allocation31_spill] sm:$0xff] %v4325_v19 }
 0x246   :  { %v847_v57 = vpop.permute.xlu1 %846 }
 0x247   :  { %v1082_v47 = vmul.f32 %v847_v57, %v4325_v19 }
 0x248   :  { %1044 = vbcast.lane.b32.xlu1 %v4244_v33, 264 }
 0x24a   :  { %v4281_v62 = vpop.permute.xlu1 %850 }
 0x24b   :  { %5991 = vst [vmem:[#allocation23_spill] sm:$0xff] %v4281_v62  ;;  %v422_v62 = vld [vmem:[#allocation2 + $0x320] sm:$0xff] }
 0x24c   :  { %1052 = vbcast.lane.b32.xlu1 %v4244_v33, 280 }
 0x24e   :  { %v855_v58 = vpop.permute.xlu1 %854 }
 0x250   :  { %1060 = vbcast.lane.b32.xlu1 %v4244_v33, 296 }
 0x252   :  { %v4285_v3 = vpop.permute.xlu1 %858 }
 0x253   :  { %5992 = vst [vmem:[#allocation24_spill] sm:$0xff] %v4285_v3  ;;  %v1195_v3 = vsel %vm669_vm4, %v1082_v47, 0.0 }
 0x254   :  { %1068 = vbcast.lane.b32.xlu1 %v4244_v33, 312  ;;  %v1080_v33 = vmul.f32 %v839_v53, %v4315_v0  ;;  %v420_v53 = vld [vmem:[#allocation2 + $0x310] sm:$0xff] }
 0x256   :  { %v4288_v17 = vpop.permute.xlu1 %865  ;;  %v1165_v32 = vsel %vm669_vm4, %v1080_v33, 0.0 }
 0x258   :  { %2510 = vrot.lane.b32.xlu1 %v3938_v48, %s3815_s21 }
 0x25a   :  { %v4292_v22 = vpop.permute.xlu1 %869 }
 0x25b   :  { %5993 = vst [vmem:[#allocation25_spill] sm:$0xff] %v4292_v22  ;;  %v1166_v22 = vadd.f32 %v1165_v32, %v1164_v27 }
 0x25c   :  { %1826 = vrot.lane.b32.xlu1 %v3953_v1, %s3815_s21  ;;  %v831_v26 = vpop.permute.xlu0 %830 }
 0x25d   :  { %v1078_v36 = vmul.f32 %v831_v26, %v4335_v15 }
 0x25e   :  { %v874_v28 = vpop.permute.xlu1 %873 }
 0x25f   :  { %v1088_v9 = vmul.f32 %v874_v28, %v404_v45  ;;  %v4337_v28 = vld [vmem:[#allocation2 + $0x200] sm:$0xff]  ;;  %v1074_v45 = vmul.f32 %v4247_v35, %v4327_v18 }
 0x260   :  { %1828 = vrot.lane.b32.xlu1 %v3958_v6, %s3815_s21  ;;  %v909_v29 = vpop.permute.xlu0 %908  ;;  %6003 = vst [vmem:[#allocation35_spill] sm:$0xff] %v4337_v28 }
 0x261   :  { %v1167_v33 = vsel %vm669_vm4, %v1088_v9, 0.0  ;;  %v1096_v19 = vmul.f32 %v909_v29, %v412_v43  ;;  %v1070_v9 = vmul.f32 %v4219_v20, %v4337_v28  ;;  %v1076_v43 = vmul.f32 %v4257_v42, %v4341_v10  ;;  %v414_v29 = vld [vmem:[#allocation2 + $0x2e0] sm:$0xff] }
 0x262   :  { %v4298_v34 = vpop.permute.xlu1 %877  ;;  %v410_v20 = vld [vmem:[#allocation2 + $0x2c0] sm:$0xff] }
 0x263   :  { %v1169_v26 = vsel %vm669_vm4, %v1096_v19, 0.0 }
 0x264   :  { %1830 = vrot.lane.b32.xlu1 %v3960_v8, %s3815_s21  ;;  %v4302_v44 = vpop.permute.xlu0 %916 }
 0x266   :  { %v882_v48 = vpop.permute.xlu1 %881 }
 0x267   :  { %v1090_v57 = vmul.f32 %v882_v48, %v406_v39  ;;  %v1168_v39 = vadd.f32 %v1167_v33, %v1166_v22  ;;  %v424_v33 = vld [vmem:[#allocation2 + $0x330] sm:$0xff] }
 0x268   :  { %2036 = vbcast.lane.b32.xlu1 %v3956_v2, 320  ;;  %v4307_v1 = vpop.permute.xlu0 %924 }
 0x269   :  { %v1197_v48 = vsel %vm669_vm4, %v1090_v57, 0.0  ;;  %v1134_v57 = vsel %vm669_vm4, %v1070_v9, 0.0 }
 0x26a   :  { %v4309_v50 = vpop.permute.xlu1 %885 }
 0x26b   :  { %5995 = vst [vmem:[#allocation27_spill] sm:$0xff] %v4309_v50 }
 0x26c   :  { %2040 = vbcast.lane.b32.xlu1 %v3956_v2, 328  ;;  %v4312_v6 = vpop.permute.xlu0 %935 }
 0x26e   :  { %v890_v52 = vpop.permute.xlu1 %889 }
 0x26f   :  { %v1092_v32 = vmul.f32 %v890_v52, %v408_v4  ;;  %v1135_v4 = vsel %vm669_vm4, %v1078_v36, 0.0  ;;  %v1098_v52 = vmul.f32 %v4302_v44, %v414_v29  ;;  %v430_v44 = vld [vmem:[#allocation2 + $0x360] sm:$0xff] }
 0x270   :  { %2044 = vbcast.lane.b32.xlu1 %v3956_v2, 336  ;;  %v944_v8 = vpop.permute.xlu0 %943 }
 0x271   :  { %v1104_v41 = vmul.f32 %v944_v8, %v420_v53  ;;  %v428_v8 = vld [vmem:[#allocation2 + $0x350] sm:$0xff]  ;;  %v1227_v10 = vsel %vm669_vm4, %v1092_v32, 0.0  ;;  %v1199_v32 = vsel %vm669_vm4, %v1098_v52, 0.0 }
 0x272   :  { %v4319_v40 = vpop.permute.xlu1 %893 }
 0x273   :  { %5998 = vst [vmem:[#allocation30_spill] sm:$0xff] %v4319_v40  ;;  %v4331_v40 = vld [vmem:[#allocation2 + $0x270] sm:$0xff]  ;;  %v1171_v42 = vsel %vm669_vm4, %v1104_v41, 0.0  ;;  %v1136_v41 = vadd.f32 %v1135_v4, %v1134_v57 }
 0x274   :  { %2048 = vbcast.lane.b32.xlu1 %v3956_v2, 344  ;;  %v952_v55 = vpop.permute.xlu0 %951  ;;  %6001 = vst [vmem:[#allocation33_spill] sm:$0xff] %v4331_v40  ;;  %v1084_v49 = vmul.f32 %v855_v58, %v4331_v40  ;;  %v1194_v58 = vsel %vm669_vm4, %v1074_v45, 0.0  ;;  %v4360_v40 = vld [vmem:[#allocation2 + $0x280] sm:$0xff]  ;;  %v416_v45 = vld [vmem:[#allocation2 + $0x2f0] sm:$0xff] }
 0x275   :  { %v1196_v53 = vadd.f32 %v1195_v3, %v1194_v58  ;;  %6005 = vst [vmem:[#allocation37_spill] sm:$0xff] %v4360_v40  ;;  %v1106_v22 = vmul.f32 %v952_v55, %v422_v62  ;;  %v1224_v3 = vsel %vm669_vm4, %v1076_v43, 0.0  ;;  %v1170_v58 = vadd.f32 %v1169_v26, %v1168_v39  ;;  %v426_v26 = vld [vmem:[#allocation2 + $0x340] sm:$0xff] }
 0x276   :  { %v901_v61 = vpop.permute.xlu1 %900  ;;  %v1225_v27 = vsel %vm669_vm4, %v1084_v49, 0.0  ;;  %v1086_v55 = vmul.f32 %v4288_v17, %v4360_v40  ;;  %v1100_v28 = vmul.f32 %v4307_v1, %v416_v45 }
 0x277   :  { %v1198_v49 = vadd.f32 %v1197_v48, %v1196_v53  ;;  %v1094_v36 = vmul.f32 %v901_v61, %v410_v20  ;;  %v1226_v29 = vadd.f32 %v1225_v27, %v1224_v3  ;;  %v1172_v15 = vadd.f32 %v1171_v42, %v1170_v58  ;;  %v418_v48 = vld [vmem:[#allocation2 + $0x300] sm:$0xff] }
 0x278   :  { %2052 = vbcast.lane.b32.xlu1 %v3956_v2, 352  ;;  %v960_v0 = vpop.permute.xlu0 %959  ;;  %v1201_v9 = vsel %vm669_vm4, %v1106_v22, 0.0  ;;  %v1137_v27 = vsel %vm669_vm4, %v1086_v55, 0.0  ;;  %v1229_v4 = vsel %vm669_vm4, %v1100_v28, 0.0  ;;  %v1102_v52 = vmul.f32 %v4312_v6, %v418_v48  ;;  %v434_v55 = vld [vmem:[#allocation2 + $0x380] sm:$0xff] }
 0x279   :  { %v1108_v43 = vmul.f32 %v960_v0, %v424_v33  ;;  %v1228_v17 = vadd.f32 %v1227_v10, %v1226_v29  ;;  %v1200_v53 = vadd.f32 %v1199_v32, %v1198_v49  ;;  %v1139_v1 = vsel %vm669_vm4, %v1094_v36, 0.0  ;;  %v432_v0 = vld [vmem:[#allocation2 + $0x370] sm:$0xff] }
 0x27a   :  { %v4344_v50 = vpop.permute.xlu1 %904  ;;  %v1138_v22 = vadd.f32 %v1137_v27, %v1136_v41  ;;  %v1141_v28 = vsel %vm669_vm4, %v1102_v52, 0.0 }
 0x27b   :  { %v1231_v45 = vsel %vm669_vm4, %v1108_v43, 0.0  ;;  %v1230_v3 = vadd.f32 %v1229_v4, %v1228_v17  ;;  %v440_v4 = vld [vmem:[#allocation2 + $0x3b0] sm:$0xff] }
 0x27c   :  { %2060 = vbcast.lane.b32.xlu1 %v3956_v2, 368  ;;  %v971_v35 = vpop.permute.xlu0 %970 }
 0x27d   :  { %v1110_v33 = vmul.f32 %v971_v35, %v426_v26  ;;  %v1232_v36 = vadd.f32 %v1231_v45, %v1230_v3 }
 0x27e   :  { %v4357_v47 = vpop.permute.xlu1 %912 }
 0x27f   :  { %v1143_v6 = vsel %vm669_vm4, %v1110_v33, 0.0 }
 0x280   :  { %2064 = vbcast.lane.b32.xlu1 %v3956_v2, 376  ;;  %v979_v19 = vpop.permute.xlu0 %978 }
 0x281   :  { %v1112_v18 = vmul.f32 %v979_v19, %v428_v8  ;;  %v1140_v19 = vadd.f32 %v1139_v1, %v1138_v22 }
 0x282   :  { %v4371_v62 = vpop.permute.xlu1 %920 }
 0x283   :  { %v1173_v39 = vsel %vm669_vm4, %v1112_v18, 0.0  ;;  %v1202_v18 = vadd.f32 %v1201_v9, %v1200_v53  ;;  %v1142_v41 = vadd.f32 %v1141_v28, %v1140_v19  ;;  %v442_v19 = vld [vmem:[#allocation2 + $0x3c0] sm:$0xff]  ;;  %v444_v28 = vld [vmem:[#allocation2 + $0x3d0] sm:$0xff] }
 0x284   :  { %2068 = vbcast.lane.b32.xlu1 %v4039_v7, 320  ;;  %v987_v61 = vpop.permute.xlu0 %986  ;;  %v1174_v8 = vadd.f32 %v1173_v39, %v1172_v15  ;;  %v436_v39 = vld [vmem:[#allocation2 + $0x390] sm:$0xff] }
 0x285   :  { %v1114_v20 = vmul.f32 %v987_v61, %v430_v44  ;;  %v1144_v32 = vadd.f32 %v1143_v6, %v1142_v41 }
 0x286   :  { %v4380_v42 = vpop.permute.xlu1 %928 }
 0x287   :  { %v1203_v15 = vsel %vm669_vm4, %v1114_v20, 0.0  ;;  %v438_v20 = vld [vmem:[#allocation2 + $0x3a0] sm:$0xff] }
 0x288   :  { %2072 = vbcast.lane.b32.xlu1 %v4039_v7, 328  ;;  %v995_v10 = vpop.permute.xlu0 %994  ;;  %v1204_v57 = vadd.f32 %v1203_v15, %v1202_v18 }
 0x289   :  { %v1116_v49 = vmul.f32 %v995_v10, %v432_v0 }
 0x28a   :  { %v4387_v58 = vpop.permute.xlu1 %939 }
 0x28b   :  { %v1233_v44 = vsel %vm669_vm4, %v1116_v49, 0.0 }
 0x28c   :  { %2076 = vbcast.lane.b32.xlu1 %v4039_v7, 336  ;;  %v1006_v35 = vpop.permute.xlu0 %1005  ;;  %v1234_v29 = vadd.f32 %v1233_v44, %v1232_v36 }
 0x28d   :  { %v1118_v9 = vmul.f32 %v1006_v35, %v434_v55 }
 0x28e   :  { %v4393_v43 = vpop.permute.xlu1 %947 }
 0x28f   :  { %v1145_v48 = vsel %vm669_vm4, %v1118_v9, 0.0  ;;  %v446_v9 = vld [vmem:[#allocation2 + $0x3e0] sm:$0xff] }
 0x290   :  { %2080 = vbcast.lane.b32.xlu1 %v4039_v7, 344  ;;  %v1014_v26 = vpop.permute.xlu0 %1013  ;;  %v1146_v61 = vadd.f32 %v1145_v48, %v1144_v32 }
 0x291   :  { %v1120_v17 = vmul.f32 %v1014_v26, %v436_v39 }
 0x292   :  { %v4397_v53 = vpop.permute.xlu1 %955 }
 0x293   :  { %v1175_v27 = vsel %vm669_vm4, %v1120_v17, 0.0  ;;  %v448_v17 = vld [vmem:[#allocation2 + $0x3f0] sm:$0xff] }
 0x294   :  { %2084 = vbcast.lane.b32.xlu1 %v4039_v7, 352  ;;  %v1022_v1 = vpop.permute.xlu0 %1021  ;;  %v1176_v0 = vadd.f32 %v1175_v27, %v1174_v8 }
 0x295   :  { %v1122_v22 = vmul.f32 %v1022_v1, %v438_v20 }
 0x296   :  { %v4401_v18 = vpop.permute.xlu1 %963 }
 0x297   :  { %v1205_v52 = vsel %vm669_vm4, %v1122_v22, 0.0 }
 0x298   :  { %2088 = vbcast.lane.b32.xlu1 %v4039_v7, 360  ;;  %v1030_v45 = vpop.permute.xlu0 %1029  ;;  %v1206_v33 = vadd.f32 %v1205_v52, %v1204_v57 }
 0x299   :  { %v1124_v15 = vmul.f32 %v1030_v45, %v440_v4 }
 0x29a   :  { %v4405_v10 = vpop.permute.xlu1 %974 }
 0x29b   :  { %v1235_v3 = vsel %vm669_vm4, %v1124_v15, 0.0 }
 0x29c   :  { %2092 = vbcast.lane.b32.xlu1 %v4039_v7, 368  ;;  %v1041_v49 = vpop.permute.xlu0 %1040  ;;  %v1236_v8 = vadd.f32 %v1235_v3, %v1234_v29 }
 0x29d   :  { %v1126_v55 = vmul.f32 %v1041_v49, %v442_v19 }
 0x29e   :  { %v4409_v36 = vpop.permute.xlu1 %982 }
 0x29f   :  { %v1147_v6 = vsel %vm669_vm4, %v1126_v55, 0.0  ;;  %v4460_v55 = vld [vmem:[#allocation2 + $0x218] sm:$0xff] }
 0x2a0   :  { %2096 = vbcast.lane.b32.xlu1 %v4039_v7, 376  ;;  %v1049_v44 = vpop.permute.xlu0 %1048  ;;  %v4413_v57 = vadd.f32 %v1147_v6, %v1146_v61  ;;  %6012 = vst [vmem:[#allocation44_spill] sm:$0xff] %v4460_v55 }
 0x2a1   :  { %v1128_v35 = vmul.f32 %v1049_v44, %v444_v28  ;;  %v4462_v28 = vld [vmem:[#allocation2 + $0x258] sm:$0xff] }
 0x2a2   :  { %v4415_v41 = vpop.permute.xlu1 %990  ;;  %6013 = vst [vmem:[#allocation45_spill] sm:$0xff] %v4462_v28 }
 0x2a3   :  { %v1177_v39 = vsel %vm669_vm4, %v1128_v35, 0.0  ;;  %v3618_v35 = vld [vmem:[#allocation2 + $0x8] sm:$0xff] }
 0x2a4   :  { %1832 = vrot.lane.b32.xlu1 %v3965_v13, %s3815_s21  ;;  %v1057_v29 = vpop.permute.xlu0 %1056  ;;  %v4420_v32 = vadd.f32 %v1177_v39, %v1176_v0  ;;  %v3619_v39 = vld [vmem:[#allocation2] sm:$0xff] }
 0x2a5   :  { %v1130_v48 = vmul.f32 %v1057_v29, %v446_v9 }
 0x2a6   :  { %v4422_v26 = vpop.permute.xlu1 %998 }
 0x2a7   :  { %v1207_v7 = vsel %vm669_vm4, %v1130_v48, 0.0  ;;  %v3620_v48 = vld [vmem:[#allocation2 + $0x18] sm:$0xff] }
 0x2a8   :  { %2100 = vbcast.lane.b32.xlu1 %v4175_v56, 320  ;;  %v1065_v61 = vpop.permute.xlu0 %1064  ;;  %v4426_v20 = vadd.f32 %v1207_v7, %v1206_v33  ;;  %v3621_v7 = vld [vmem:[#allocation2 + $0x10] sm:$0xff] }
 0x2a9   :  { %v1132_v27 = vmul.f32 %v1065_v61, %v448_v17 }
 0x2aa   :  { %6006 = vst [vmem:[#allocation38_spill] sm:$0xff] %v4426_v20  ;;  %v4428_v1 = vpop.permute.xlu1 %1009 }
 0x2ab   :  { %v1237_v22 = vsel %vm669_vm4, %v1132_v27, 0.0  ;;  %v4471_v27 = vmul.f32 %v4239_v30, %v4460_v55  ;;  %v3624_v55 = vld [vmem:[#allocation2 + $0x58] sm:$0xff] }
 0x2ac   :  { %2104 = vbcast.lane.b32.xlu1 %v4175_v56, 328  ;;  %v2476_v13 = vpop.permute.xlu0 %2475  ;;  %v4432_v0 = vadd.f32 %v1237_v22, %v1236_v8  ;;  %v4457_v8 = vld [vmem:[#allocation2 + $0x208] sm:$0xff]  ;;  %v4475_v22 = vmul.f32 %v4277_v54, %v4462_v28  ;;  %v3623_v28 = vld [vmem:[#allocation2 + $0x40] sm:$0xff] }
 0x2ad   :  { %2478 = vxpose.xlu0.b32.start.end [1/1] (short) (narrow) %v2476_v13, 64  ;;  %6011 = vst [vmem:[#allocation43_spill] sm:$0xff] %v4457_v8  ;;  %v4466_v44 = vmul.f32 %v4223_v21, %v4457_v8 }
 0x2ae   :  { %6007 = vst [vmem:[#allocation39_spill] sm:$0xff] %v4432_v0  ;;  %v4434_v4 = vpop.permute.xlu1 %1017  ;;  %v3622_v0 = vld [vmem:[#allocation2 + $0x48] sm:$0xff] }
 0x2b0   :  { %2108 = vbcast.lane.b32.xlu1 %v4175_v56, 336 }
 0x2b2   :  { %v4437_v52 = vpop.permute.xlu1 %1025 }
 0x2b4   :  { %2112 = vbcast.lane.b32.xlu1 %v4175_v56, 344 }
 0x2b6   :  { %v4440_v45 = vpop.permute.xlu1 %1033 }
 0x2b7   :  { %6008 = vst [vmem:[#allocation40_spill] sm:$0xff] %v4440_v45 }
 0x2b8   :  { %2116 = vbcast.lane.b32.xlu1 %v4175_v56, 352 }
 0x2ba   :  { %v4443_v33 = vpop.permute.xlu1 %1044 }
 0x2bc   :  { %2120 = vbcast.lane.b32.xlu1 %v4175_v56, 360 }
 0x2be   :  { %v4446_v15 = vpop.permute.xlu1 %1052 }
 0x2c0   :  { %2128 = vbcast.lane.b32.xlu1 %v4175_v56, 376 }
 0x2c2   :  { %v4449_v19 = vpop.permute.xlu1 %1060 }
 0x2c4   :  { %2132 = vbcast.lane.b32.xlu1 %v4182_v59, 320 }
 0x2c6   :  { %v4452_v3 = vpop.permute.xlu1 %1068 }
 0x2c7   :  { %6009 = vst [vmem:[#allocation41_spill] sm:$0xff] %v4452_v3 }
 0x2c8   :  { %2140 = vbcast.lane.b32.xlu1 %v4182_v59, 336 }
 0x2ca   :  { %v4455_v49 = vpop.permute.xlu1 %2510 }
 0x2cb   :  { %6010 = vst [vmem:[#allocation42_spill] sm:$0xff] %v4455_v49 }
 0x2cc   :  { %2148 = vbcast.lane.b32.xlu1 %v4182_v59, 352 }
 0x2ce   :  { %v1827_v6 = vpop.permute.xlu1 %1826 }
 0x2cf   :  { %v1851_v9 = vmul.f32 %v3618_v35, %v1827_v6  ;;  %v1850_v29 = vmul.f32 %v3619_v39, %v1827_v6  ;;  %v1853_v17 = vmul.f32 %v3620_v48, %v1827_v6  ;;  %v1852_v61 = vmul.f32 %v3621_v7, %v1827_v6 }
 0x2d0   :  { %2156 = vbcast.lane.b32.xlu1 %v4182_v59, 368  ;;  %v1855_v21 = vmul.f32 %v1827_v6, %v4028_v60  ;;  %v1854_v13 = vmul.f32 %v1827_v6, %v4061_v37  ;;  %v1857_v48 = vmul.f32 %v1827_v6, %v4091_v24  ;;  %v4483_v7 = vmul.f32 %v1827_v6, %v4120_v11  ;;  %v3625_v59 = vld [vmem:[#allocation2 + $0x50] sm:$0xff] }
 0x2d1   :  { %v1929_v35 = vsel %vm669_vm4, %v1851_v9, 0.0  ;;  %v1914_v39 = vsel %vm669_vm4, %v1850_v29, 0.0  ;;  %v1959_v30 = vsel %vm669_vm4, %v1853_v17, 0.0  ;;  %v1944_v40 = vsel %vm669_vm4, %v1852_v61, 0.0 }
 0x2d2   :  { %v1829_v49 = vpop.permute.xlu1 %1828  ;;  %v1989_v54 = vsel %vm669_vm4, %v1855_v21, 0.0  ;;  %v1974_v60 = vsel %vm669_vm4, %v1854_v13, 0.0 }
 0x2d3   :  { %v1859_v37 = vmul.f32 %v3622_v0, %v1829_v49  ;;  %v1858_v9 = vmul.f32 %v3623_v28, %v1829_v49  ;;  %v1861_v29 = vmul.f32 %v3624_v55, %v1829_v49  ;;  %v1860_v24 = vmul.f32 %v3625_v59, %v1829_v49 }
 0x2d4   :  { %1836 = vrot.lane.b32.xlu1 %v3967_v14, %s3815_s21  ;;  %v1863_v11 = vmul.f32 %v1829_v49, %v4034_v5  ;;  %v1862_v6 = vmul.f32 %v1829_v49, %v4063_v38  ;;  %v1865_v17 = vmul.f32 %v1829_v49, %v4093_v25  ;;  %v1864_v61 = vmul.f32 %v1829_v49, %v4122_v12  ;;  %v3626_v5 = vld [vmem:[#allocation2 + $0x88] sm:$0xff]  ;;  %v3627_v38 = vld [vmem:[#allocation2 + $0x80] sm:$0xff]  ;;  %v3628_v25 = vld [vmem:[#allocation2 + $0x98] sm:$0xff] }
 0x2d5   :  { %v1930_v21 = vsel %vm669_vm4, %v1859_v37, 0.0  ;;  %v1915_v0 = vsel %vm669_vm4, %v1858_v9, 0.0  ;;  %v1960_v28 = vsel %vm669_vm4, %v1861_v29, 0.0  ;;  %v1945_v55 = vsel %vm669_vm4, %v1860_v24, 0.0  ;;  %v3629_v12 = vld [vmem:[#allocation2 + $0x90] sm:$0xff] }
 0x2d6   :  { %v1831_v59 = vpop.permute.xlu1 %1830  ;;  %v1931_v13 = vadd.f32 %v1930_v21, %v1929_v35  ;;  %v1916_v20 = vadd.f32 %v1915_v0, %v1914_v39  ;;  %v1961_v14 = vadd.f32 %v1960_v28, %v1959_v30  ;;  %v1946_v8 = vadd.f32 %v1945_v55, %v1944_v40  ;;  %v4510_v0 = vld [vmem:[#allocation2 + $0x298] sm:$0xff]  ;;  %v4523_v55 = vld [vmem:[#allocation2 + $0x248] sm:$0xff] }
 0x2d7   :  { %v1867_v3 = vmul.f32 %v3626_v5, %v1831_v59  ;;  %v1866_v56 = vmul.f32 %v3627_v38, %v1831_v59  ;;  %v1869_v45 = vmul.f32 %v3628_v25, %v1831_v59  ;;  %v1868_v49 = vmul.f32 %v3629_v12, %v1831_v59  ;;  %6014 = vst [vmem:[#allocation46_spill] sm:$0xff] %v4510_v0  ;;  %v4525_v5 = vld [vmem:[#allocation2 + $0x268] sm:$0xff]  ;;  %v413_v38 = vld [vmem:[#allocation2 + $0x2d8] sm:$0xff] }
 0x2d8   :  { %2168 = vbcast.lane.b32.xlu1 %v4192_v63, 328  ;;  %v1871_v37 = vmul.f32 %v1831_v59, %v4043_v16  ;;  %v1990_v9 = vsel %vm669_vm4, %v1863_v11, 0.0  ;;  %v1870_v29 = vmul.f32 %v1831_v59, %v4069_v46  ;;  %v1975_v35 = vsel %vm669_vm4, %v1862_v6, 0.0  ;;  %6015 = vst [vmem:[#allocation47_spill] sm:$0xff] %v4525_v5 }
 0x2d9   :  { %v1932_v40 = vsel %vm669_vm4, %v1867_v3, 0.0  ;;  %v1917_v39 = vsel %vm669_vm4, %v1866_v56, 0.0  ;;  %v1962_v30 = vsel %vm669_vm4, %v1869_v45, 0.0  ;;  %v1947_v24 = vsel %vm669_vm4, %v1868_v49, 0.0 }
 0x2da   :  { %v4508_v21 = vpop.permute.xlu1 %2036  ;;  %v4512_v28 = vadd.f32 %v1932_v40, %v1931_v13  ;;  %v4514_v16 = vadd.f32 %v1917_v39, %v1916_v20  ;;  %v4516_v11 = vadd.f32 %v1962_v30, %v1961_v14  ;;  %v4518_v46 = vadd.f32 %v1947_v24, %v1946_v8  ;;  %v421_v39 = vld [vmem:[#allocation2 + $0x318] sm:$0xff] }
 0x2db   :  { %v1991_v6 = vadd.f32 %v1990_v9, %v1989_v54  ;;  %v1992_v3 = vsel %vm669_vm4, %v1871_v37, 0.0  ;;  %v1976_v56 = vadd.f32 %v1975_v35, %v1974_v60  ;;  %v2019_v45 = vsel %vm669_vm4, %v1857_v48, 0.0  ;;  %v4531_v54 = vld [vmem:[#allocation2 + $0x228] sm:$0xff]  ;;  %v4533_v60 = vld [vmem:[#allocation2 + $0x278] sm:$0xff]  ;;  %v6017_v35 = vld [vmem:[#allocation23_spill] sm:$0xff] }
 0x2dc   :  { %2176 = vbcast.lane.b32.xlu1 %v4192_v63, 344  ;;  %v1977_v13 = vsel %vm669_vm4, %v1870_v29, 0.0  ;;  %v1873_v20 = vmul.f32 %v1831_v59, %v4098_v31  ;;  %v2020_v14 = vsel %vm669_vm4, %v1865_v17, 0.0  ;;  %v1872_v8 = vmul.f32 %v1831_v59, %v4126_v23  ;;  %6016 = vst [vmem:[#allocation48_spill] sm:$0xff] %v4531_v54  ;;  %v4543_v31 = vld [vmem:[#allocation2 + $0x238] sm:$0xff]  ;;  %v4545_v17 = vld [vmem:[#allocation2 + $0x288] sm:$0xff] }
 0x2dd   :  { %v1089_v48 = vmul.f32 %v4298_v34, %v4510_v0  ;;  %v4537_v25 = vadd.f32 %v1992_v3, %v1991_v6  ;;  %v4539_v12 = vadd.f32 %v1977_v13, %v1976_v56  ;;  %v2021_v49 = vadd.f32 %v2020_v14, %v2019_v45  ;;  %v6019_v56 = vld [vmem:[#allocation21_spill] sm:$0xff]  ;;  %v429_v45 = vld [vmem:[#allocation2 + $0x358] sm:$0xff]  ;;  %v6020_v13 = vld [vmem:[#allocation22_spill] sm:$0xff] }
 0x2de   :  { %v4541_v37 = vpop.permute.xlu1 %2040  ;;  %v2022_v23 = vsel %vm669_vm4, %v1873_v20, 0.0  ;;  %v2004_v59 = vsel %vm669_vm4, %v4483_v7, 0.0  ;;  %v2005_v9 = vsel %vm669_vm4, %v1864_v61, 0.0  ;;  %v2007_v34 = vsel %vm669_vm4, %v1872_v8, 0.0  ;;  %v6018_v61 = vld [vmem:[#allocation24_spill] sm:$0xff]  ;;  %v6021_v14 = vld [vmem:[#allocation25_spill] sm:$0xff] }
 0x2df   :  { %v1079_v29 = vmul.f32 %v4267_v51, %v4523_v55  ;;  %v1083_v40 = vmul.f32 %v6017_v35, %v4525_v5  ;;  %v4556_v30 = vadd.f32 %v2022_v23, %v2021_v49  ;;  %v2006_v24 = vadd.f32 %v2005_v9, %v2004_v59  ;;  %v4570_v49 = vld [vmem:[#allocation2 + $0x2a8] sm:$0xff]  ;;  %v445_v5 = vld [vmem:[#allocation2 + $0x3d8] sm:$0xff] }
 0x2e0   :  { %v1097_v6 = vmul.f32 %v4357_v47, %v413_v38  ;;  %2184 = vbcast.lane.b32.xlu1 %v4192_v63, 360  ;;  %v1180_v7 = vsel %vm669_vm4, %v4475_v22, 0.0  ;;  %v1085_v3 = vmul.f32 %v6018_v61, %v4533_v60  ;;  %v1075_v51 = vmul.f32 %v6019_v56, %v4531_v54  ;;  %6022 = vst [vmem:[#allocation23_spill] sm:$0xff] %v4570_v49  ;;  %v4580_v9 = vld [vmem:[#allocation2 + $0x2c8] sm:$0xff]  ;;  %v437_v61 = vld [vmem:[#allocation2 + $0x398] sm:$0xff] }
 0x2e1   :  { %v1077_v20 = vmul.f32 %v6020_v13, %v4543_v31  ;;  %v1087_v8 = vmul.f32 %v6021_v14, %v4545_v17  ;;  %v4572_v47 = vadd.f32 %v2007_v34, %v2006_v24  ;;  %v1179_v22 = vsel %vm669_vm4, %v4471_v27, 0.0  ;;  %6024 = vst [vmem:[#allocation21_spill] sm:$0xff] %v4580_v9  ;;  %v415_v35 = vld [vmem:[#allocation2 + $0x2e8] sm:$0xff]  ;;  %v4586_v14 = vpop.f32.mrf.mxu0 }
 0x2e2   :  { %v4574_v38 = vpop.permute.xlu1 %2044  ;;  %v1182_v23 = vsel %vm669_vm4, %v1089_v48, 0.0  ;;  %v1105_v59 = vmul.f32 %v4393_v43, %v421_v39  ;;  %v1149_v56 = vsel %vm669_vm4, %v4466_v44, 0.0  ;;  %v1150_v13 = vsel %vm669_vm4, %v1079_v29, 0.0  ;;  %6025 = vst [vmem:[#allocation22_spill] sm:$0xff] %v4586_v14  ;;  %v6026_v39 = vld [vmem:[#allocation27_spill] sm:$0xff] }
 0x2e3   :  { %6023 = vst [vmem:[#allocation24_spill] sm:$0xff] %v4572_v47  ;;  %v1181_v34 = vadd.f32 %v1180_v7, %v1179_v22  ;;  %v1210_v24 = vsel %vm669_vm4, %v1083_v40, 0.0  ;;  %v1184_v27 = vsel %vm669_vm4, %v1097_v6, 0.0  ;;  %v1113_v48 = vmul.f32 %v4409_v36, %v429_v45  ;;  %v419_v22 = vld [vmem:[#allocation2 + $0x308] sm:$0xff]  ;;  %v3475_v14 = vpop.f32.mrf.mxu0 }
 0x2e4   :  { %2192 = vbcast.lane.b32.xlu1 %v4192_v63, 376  ;;  %v1240_v43 = vsel %vm669_vm4, %v1085_v3, 0.0  ;;  %v1091_v54 = vmul.f32 %v6026_v39, %v4570_v49  ;;  %v1209_v44 = vsel %vm669_vm4, %v1075_v51, 0.0  ;;  %v1239_v29 = vsel %vm669_vm4, %v1077_v20, 0.0  ;;  %v423_v49 = vld [vmem:[#allocation2 + $0x328] sm:$0xff] }
 0x2e5   :  { %v1152_v40 = vsel %vm669_vm4, %v1087_v8, 0.0  ;;  %v1183_v7 = vadd.f32 %v1182_v23, %v1181_v34  ;;  %v1095_v36 = vmul.f32 %v4344_v50, %v4580_v9  ;;  %v1099_v6 = vmul.f32 %v4371_v62, %v415_v35  ;;  %v427_v20 = vld [vmem:[#allocation2 + $0x348] sm:$0xff] }
 0x2e6   :  { %v1121_v3 = vmul.f32 %v4434_v4, %v437_v61  ;;  %v4601_v45 = vpop.permute.xlu1 %2048  ;;  %v4603_v39 = vpop.f32.mrf.mxu1  ;;  %v1186_v51 = vsel %vm669_vm4, %v1105_v59, 0.0  ;;  %v1151_v0 = vadd.f32 %v1150_v13, %v1149_v56  ;;  %v1211_v8 = vadd.f32 %v1210_v24, %v1209_v44  ;;  %v6027_v62 = vld [vmem:[#allocation18_spill] sm:$0xff]  ;;  %v4612_v61 = vld [vmem:[#allocation2 + $0x2b8] sm:$0xff]  ;;  %v6028_v56 = vld [vmem:[#allocation9_spill] sm:$0xff] }
 0x2e7   :  { %v4606_v23 = vadd.f32 %v1240_v43, %v1239_v29  ;;  %v1185_v34 = vadd.f32 %v1184_v27, %v1183_v7  ;;  %v1188_v14 = vsel %vm669_vm4, %v1113_v48, 0.0  ;;  %v1129_v50 = vmul.f32 %v4446_v15, %v445_v5  ;;  %v431_v9 = vld [vmem:[#allocation2 + $0x368] sm:$0xff]  ;;  %v417_v29 = vld [vmem:[#allocation2 + $0x2f8] sm:$0xff] }
 0x2e8   :  { %2196 = vbcast.lane.b32.xlu1 %v6027_v62, 320  ;;  %v1376_v4 = vpop.f32.mrf.mxu1  ;;  %v1212_v35 = vsel %vm669_vm4, %v1091_v54, 0.0  ;;  %v1103_v59 = vmul.f32 %v4387_v58, %v419_v22  ;;  %v435_v47 = vld [vmem:[#allocation2 + $0x388] sm:$0xff]  ;;  %v1153_v24 = vadd.f32 %v1152_v40, %v1151_v0  ;;  %v1107_v27 = vmul.f32 %v4397_v53, %v423_v49 }
 0x2e9   :  { %v1377_v13 = vadd.f32 %v1376_v4, %v6028_v56  ;;  %v1187_v43 = vadd.f32 %v1186_v51, %v1185_v34  ;;  %v1154_v48 = vsel %vm669_vm4, %v1095_v36, 0.0  ;;  %v1214_v15 = vsel %vm669_vm4, %v1099_v6, 0.0  ;;  %v439_v58 = vld [vmem:[#allocation2 + $0x3a8] sm:$0xff] }
 0x2ea   :  { %v1111_v5 = vmul.f32 %v4405_v10, %v427_v20  ;;  %v1190_v54 = vsel %vm669_vm4, %v1121_v3, 0.0  ;;  %v4621_v44 = vpop.permute.xlu1 %2052  ;;  %v443_v7 = vld [vmem:[#allocation2 + $0x3c8] sm:$0xff]  ;;  %v1213_v22 = vadd.f32 %v1212_v35, %v1211_v8  ;;  %v1115_v49 = vmul.f32 %v4415_v41, %v431_v9  ;;  %v425_v35 = vld [vmem:[#allocation2 + $0x338] sm:$0xff] }
 0x2eb   :  { %v6029_v4 = vld [vmem:[#allocation30_spill] sm:$0xff]  ;;  %v4626_v40 = vadd.f32 %v1377_v13, %v4413_v57  ;;  %v1189_v53 = vadd.f32 %v1188_v14, %v1187_v43  ;;  %v1119_v36 = vmul.f32 %v4428_v1, %v435_v47  ;;  %v1192_v10 = vsel %vm669_vm4, %v1129_v50, 0.0  ;;  %v433_v50 = vld [vmem:[#allocation2 + $0x378] sm:$0xff] }
 0x2ec   :  { %v1093_v0 = vmul.f32 %v6029_v4, %v4612_v61  ;;  %2204 = vbcast.lane.b32.xlu1 %v6027_v62, 336  ;;  %v1156_v6 = vsel %vm669_vm4, %v1103_v59, 0.0  ;;  %v447_v3 = vld [vmem:[#allocation2 + $0x3e8] sm:$0xff]  ;;  %v1155_v51 = vadd.f32 %v1154_v48, %v1153_v24  ;;  %v1215_v8 = vadd.f32 %v1214_v15, %v1213_v22 }
 0x2ed   :  { %v1191_v20 = vadd.f32 %v1190_v54, %v1189_v53  ;;  %v1216_v34 = vsel %vm669_vm4, %v1107_v27, 0.0  ;;  %v1101_v57 = vmul.f32 %v4380_v42, %v417_v29  ;;  %v1158_v14 = vsel %vm669_vm4, %v1111_v5, 0.0  ;;  %v6030_v59 = vld [vmem:[#allocation10_spill] sm:$0xff]  ;;  %v441_v5 = vld [vmem:[#allocation2 + $0x3b8] sm:$0xff]  ;;  %v6031_v54 = vld [vmem:[#allocation11_spill] sm:$0xff] }
 0x2ee   :  { %v1123_v41 = vmul.f32 %v4437_v52, %v439_v58  ;;  %v1127_v1 = vmul.f32 %v4443_v33, %v443_v7  ;;  %v4638_v47 = vpop.permute.xlu1 %2060  ;;  %v3483_v9 = vpop.f32.mrf.mxu1  ;;  %v1242_v13 = vsel %vm669_vm4, %v1093_v0, 0.0  ;;  %v1157_v24 = vadd.f32 %v1156_v6, %v1155_v51 }
 0x2ef   :  { %v1392_v56 = vadd.f32 %v3483_v9, %v6030_v59  ;;  %v1193_v43 = vadd.f32 %v1192_v10, %v1191_v20  ;;  %v1218_v27 = vsel %vm669_vm4, %v1115_v49, 0.0  ;;  %v1160_v42 = vsel %vm669_vm4, %v1119_v36, 0.0  ;;  %v6032_v49 = vld [vmem:[#allocation8_spill] sm:$0xff] }
 0x2f0   :  { %v1131_v48 = vmul.f32 %v4449_v19, %v447_v3  ;;  %2212 = vbcast.lane.b32.xlu1 %v6027_v62, 352  ;;  %v1386_v52 = vpop.f32.mrf.mxu1  ;;  %v1217_v33 = vadd.f32 %v1216_v34, %v1215_v8  ;;  %v1109_v15 = vmul.f32 %v4401_v18, %v425_v35  ;;  %v1159_v58 = vadd.f32 %v1158_v14, %v1157_v24  ;;  %v6033_v3 = vld [vmem:[#allocation40_spill] sm:$0xff] }
 0x2f1   :  { %v1387_v29 = vadd.f32 %v1386_v52, %v6031_v54  ;;  %v4648_v7 = vadd.f32 %v1392_v56, %v1193_v43  ;;  %v1244_v22 = vsel %vm669_vm4, %v1101_v57, 0.0  ;;  %v1117_v4 = vmul.f32 %v4422_v26, %v433_v50  ;;  %v449_v34 = vld [vmem:[#allocation2 + $0x3f8] sm:$0xff]  ;;  %v6036_v50 = vld [vmem:[#allocation34_spill] sm:$0xff]  ;;  %v6040_v52 = vld [vmem:[#allocation7_spill] sm:$0xff] }
 0x2f2   :  { %v1220_v0 = vsel %vm669_vm4, %v1123_v41, 0.0  ;;  %v1162_v19 = vsel %vm669_vm4, %v1127_v1, 0.0  ;;  %v4654_v53 = vpop.permute.xlu1 %2064  ;;  %2056 = vbcast.lane.b32.xlu0 %v3956_v2, 360  ;;  %v1382_v18 = vadd.f32 %v4603_v39, %v6032_v49  ;;  %v1161_v10 = vadd.f32 %v1160_v42, %v1159_v58  ;;  %v6034_v2 = vld [vmem:[#allocation35_spill] sm:$0xff]  ;;  %v6035_v1 = vld [vmem:[#allocation16_spill] sm:$0xff] }
 0x2f3   :  { %v4660_v36 = vadd.f32 %v1387_v29, %v4420_v32  ;;  %v1219_v6 = vadd.f32 %v1218_v27, %v1217_v33  ;;  %v1125_v51 = vmul.f32 %v6033_v3, %v441_v5  ;;  %v1222_v26 = vsel %vm669_vm4, %v1131_v48, 0.0  ;;  %v6037_v56 = vld [vmem:[#allocation12_spill] sm:$0xff]  ;;  %v6038_v27 = vld [vmem:[#allocation41_spill] sm:$0xff]  ;;  %v6039_v42 = vld [vmem:[#allocation43_spill] sm:$0xff] }
 0x2f4   :  { %2220 = vbcast.lane.b32.xlu1 %v6027_v62, 368  ;;  %v1243_v20 = vadd.f32 %v1242_v13, %v4606_v23  ;;  %v1246_v8 = vsel %vm669_vm4, %v1109_v15, 0.0  ;;  %v2290_v57 = vmul.f32 %v4508_v21, %v6034_v2  ;;  %v1163_v39 = vadd.f32 %v1162_v19, %v1161_v10  ;;  %v6041_v29 = vld [vmem:[#allocation13_spill] sm:$0xff] }
 0x2f5   :  { %v1221_v35 = vadd.f32 %v1220_v0, %v1219_v6  ;;  %v1248_v32 = vsel %vm669_vm4, %v1117_v4, 0.0  ;;  %v1250_v43 = vsel %vm669_vm4, %v1125_v51, 0.0  ;;  %v1133_v21 = vmul.f32 %v6038_v27, %v449_v34  ;;  %v6042_v19 = vld [vmem:[#allocation5_spill] sm:$0xff] }
 0x2f6   :  { %v2069_v14 = vpop.permute.xlu1 %2068  ;;  %v3486_v41 = vpop.f32.mrf.mxu1  ;;  %2124 = vbcast.lane.b32.xlu0 %v6035_v1, 368  ;;  %v1245_v9 = vadd.f32 %v1244_v22, %v1243_v20  ;;  %v4673_v23 = vadd.f32 %v1382_v18, %v1163_v39  ;;  %v2291_v48 = vmul.f32 %v4541_v37, %v6039_v42  ;;  %v2354_v5 = vsel %vm669_vm4, %v2290_v57, 0.0  ;;  %v6043_v18 = vld [vmem:[#allocation38_spill] sm:$0xff]  ;;  %v6044_v20 = vld [vmem:[#allocation19_spill] sm:$0xff]  ;;  %v6045_v2 = vld [vmem:[#allocation29_spill] sm:$0xff] }
 0x2f7   :  { %v2298_v59 = vmul.f32 %v2069_v14, %v6036_v50  ;;  %v1402_v24 = vadd.f32 %v3486_v41, %v6037_v56  ;;  %v1223_v13 = vadd.f32 %v1222_v26, %v1221_v35  ;;  %v1252_v51 = vsel %vm669_vm4, %v1133_v21, 0.0  ;;  %v6046_v1 = vld [vmem:[#allocation17_spill] sm:$0xff]  ;;  %v6047_v50 = vld [vmem:[#allocation28_spill] sm:$0xff]  ;;  %v6048_v56 = vld [vmem:[#allocation14_spill] sm:$0xff] }
 0x2f8   :  { %1840 = vrot.lane.b32.xlu1 %v6040_v52, %s3815_s21  ;;  %v1396_v33 = vpop.f32.mrf.mxu1  ;;  %v1247_v15 = vadd.f32 %v1246_v8, %v1245_v9  ;;  %v1424_v6 = vsel %vm669_vm4, %v4673_v23, -inf  ;;  %v2369_v26 = vsel %vm669_vm4, %v2291_v48, 0.0  ;;  %v1423_v39 = vsel %vm669_vm4, %v4626_v40, -inf  ;;  %v6050_v52 = vld [vmem:[#allocation15_spill] sm:$0xff] }
 0x2f9   :  { %v2355_v54 = vsel %vm669_vm4, %v2298_v59, 0.0  ;;  %v1397_v58 = vadd.f32 %v1396_v33, %v6041_v29  ;;  %v4684_v22 = vadd.f32 %v1402_v24, %v1223_v13  ;;  %v6049_v13 = vld [vmem:[#allocation44_spill] sm:$0xff]  ;;  %v6051_v29 = vld [vmem:[#allocation45_spill] sm:$0xff] }
 0x2fa   :  { %v4686_v4 = vadd.f32 %v2355_v54, %v2354_v5  ;;  %v2073_v0 = vpop.permute.xlu1 %2072  ;;  %1834 = vrot.lane.b32.xlu0 %v6042_v19, %s3815_s21  ;;  %v1249_v37 = vadd.f32 %v1248_v32, %v1247_v15 }
 0x2fb   :  { %v2299_v49 = vmul.f32 %v2073_v0, %v4523_v55  ;;  %v4692_v10 = vadd.f32 %v1397_v58, %v6043_v18  ;;  %v1429_v3 = vsel %vm669_vm4, %v4684_v22, -inf  ;;  %v2292_v55 = vmul.f32 %v4574_v38, %v6045_v2  ;;  %v6052_v0 = vld [vmem:[#allocation39_spill] sm:$0xff] }
 0x2fc   :  { %2232 = vbcast.lane.b32.xlu1 %v6044_v20, 328  ;;  %v1251_v8 = vadd.f32 %v1250_v43, %v1249_v37  ;;  %v1430_v34 = vmax.f32 %v1424_v6, %v1429_v3  ;;  %v2293_v43 = vmul.f32 %v4601_v45, %v6049_v13  ;;  %v1426_v37 = vsel %vm669_vm4, %v4648_v7, -inf  ;;  %v6053_v6 = vld [vmem:[#allocation32_spill] sm:$0xff] }
 0x2fd   :  { %v2370_v57 = vsel %vm669_vm4, %v2299_v49, 0.0  ;;  %v1427_v35 = vsel %vm669_vm4, %v4692_v10, -inf  ;;  %v2384_v42 = vsel %vm669_vm4, %v2292_v55, 0.0  ;;  %v2294_v3 = vmul.f32 %v4621_v44, %v6053_v6  ;;  %v3631_v6 = vld [vmem:[#allocation2 + $0xc0] sm:$0xff] }
 0x2fe   :  { %v4708_v32 = vadd.f32 %v2370_v57, %v2369_v26  ;;  %v2077_v14 = vpop.permute.xlu1 %2076  ;;  %v3489_v41 = vpop.f32.mrf.mxu1  ;;  %2136 = vbcast.lane.b32.xlu0 %v6046_v1, 328  ;;  %v1428_v9 = vmax.f32 %v1423_v39, %v1427_v35  ;;  %v1253_v38 = vadd.f32 %v1252_v51, %v1251_v8  ;;  %v2399_v49 = vsel %vm669_vm4, %v2293_v43, 0.0  ;;  %v6054_v57 = vld [vmem:[#allocation31_spill] sm:$0xff] }
 0x2ff   :  { %v2300_v59 = vmul.f32 %v2077_v14, %v6047_v50  ;;  %v1412_v24 = vadd.f32 %v3489_v41, %v6048_v56  ;;  %v1425_v26 = vsel %vm669_vm4, %v4660_v36, -inf  ;;  %v2414_v44 = vsel %vm669_vm4, %v2294_v3, 0.0 }
 0x300   :  { %2240 = vbcast.lane.b32.xlu1 %v6044_v20, 344  ;;  %v1406_v27 = vpop.f32.mrf.mxu1  ;;  %v1435_v21 = vmax.f32 %v1428_v9, %v1430_v34 }
 0x301   :  { %v2385_v48 = vsel %vm669_vm4, %v2300_v59, 0.0  ;;  %v1407_v33 = vadd.f32 %v1406_v27, %v6050_v52  ;;  %v4719_v15 = vadd.f32 %v1412_v24, %v1253_v38  ;;  %v6055_v59 = vld [vmem:[#allocation20_spill] sm:$0xff]  ;;  %v6057_v27 = vld [vmem:[#allocation33_spill] sm:$0xff] }
 0x302   :  { %v4721_v5 = vadd.f32 %v2385_v48, %v2384_v42  ;;  %v2081_v54 = vpop.permute.xlu1 %2080  ;;  %2144 = vbcast.lane.b32.xlu0 %v6046_v1, 344  ;;  %v6056_v24 = vld [vmem:[#allocation36_spill] sm:$0xff] }
 0x303   :  { %v2301_v58 = vmul.f32 %v2081_v54, %v6051_v29  ;;  %v1433_v45 = vsel %vm669_vm4, %v4719_v15, -inf  ;;  %v4728_v19 = vadd.f32 %v1407_v33, %v6052_v0  ;;  %v2296_v38 = vmul.f32 %v4638_v47, %v6056_v24  ;;  %v3633_v24 = vld [vmem:[#allocation2 + $0xd0] sm:$0xff] }
 0x304   :  { %2248 = vbcast.lane.b32.xlu1 %v6044_v20, 360  ;;  %v1434_v18 = vmax.f32 %v1426_v37, %v1433_v45 }
 0x305   :  { %v2400_v51 = vsel %vm669_vm4, %v2301_v58, 0.0  ;;  %v1431_v8 = vsel %vm669_vm4, %v4728_v19, -inf  ;;  %v2444_v52 = vsel %vm669_vm4, %v2296_v38, 0.0  ;;  %v3634_v38 = vld [vmem:[#allocation2 + $0xe8] sm:$0xff] }
 0x306   :  { %v4741_v34 = vadd.f32 %v2400_v51, %v2399_v49  ;;  %v2085_v2 = vpop.permute.xlu1 %2084  ;;  %2152 = vbcast.lane.b32.xlu0 %v6046_v1, 360  ;;  %v1432_v55 = vmax.f32 %v1425_v26, %v1431_v8  ;;  %v3630_v49 = vld [vmem:[#allocation2 + $0xc8] sm:$0xff] }
 0x307   :  { %v2302_v39 = vmul.f32 %v2085_v2, %v6054_v57 }
 0x308   :  { %2256 = vbcast.lane.b32.xlu1 %v6044_v20, 376  ;;  %v1436_v35 = vmax.f32 %v1432_v55, %v1434_v18 }
 0x309   :  { %v2415_v14 = vsel %vm669_vm4, %v2302_v39, 0.0 }
 0x30a   :  { %v4748_v41 = vadd.f32 %v2415_v14, %v2414_v44  ;;  %v4750_v9 = vpop.permute.xlu1 %2088  ;;  %2160 = vbcast.lane.b32.xlu0 %v6046_v1, 376  ;;  %v1437_v50 = vmax.f32 %v1435_v21, %v1436_v35  ;;  %v2297_v1 = vmul.f32 %v4654_v53, %v4543_v31 }
 0x30c   :  { %2264 = vbcast.lane.b32.xlu1 %v6055_v59, 328  ;;  %v1438_v56 = vrot.slane %v1437_v50, 4  ;;  %v2459_v45 = vsel %vm669_vm4, %v2297_v1, 0.0 }
 0x30e   :  { %v2093_v13 = vpop.permute.xlu1 %2092  ;;  %2164 = vbcast.lane.b32.xlu0 %v4192_v63, 320  ;;  %v1439_v43 = vmax.f32 %v1437_v50, %v1438_v56  ;;  %v6058_v50 = vld [vmem:[#allocation37_spill] sm:$0xff] }
 0x30f   :  { %v2304_v42 = vmul.f32 %v2093_v13, %v6057_v27 }
 0x310   :  { %2272 = vbcast.lane.b32.xlu1 %v6055_v59, 344  ;;  %v1440_v48 = vrot.slane %v1439_v43, 2 }
 0x311   :  { %v2445_v21 = vsel %vm669_vm4, %v2304_v42, 0.0 }
 0x312   :  { %v4763_v33 = vadd.f32 %v2445_v21, %v2444_v52  ;;  %v2097_v54 = vpop.permute.xlu1 %2096  ;;  %2172 = vbcast.lane.b32.xlu0 %v4192_v63, 336  ;;  %v1441_v47 = vmax.f32 %v1439_v43, %v1440_v48  ;;  %v6059_v52 = vld [vmem:[#allocation6_spill] sm:$0xff] }
 0x313   :  { %v2305_v29 = vmul.f32 %v2097_v54, %v4533_v60 }
 0x314   :  { %2280 = vbcast.lane.b32.xlu1 %v6055_v59, 360  ;;  %v1442_v58 = vrot.slane %v1441_v47, 1 }
 0x315   :  { %v2460_v0 = vsel %vm669_vm4, %v2305_v29, 0.0 }
 0x316   :  { %v4770_v37 = vadd.f32 %v2460_v0, %v2459_v45  ;;  %v4772_v31 = vpop.permute.xlu1 %1832  ;;  %2180 = vbcast.lane.b32.xlu0 %v4192_v63, 352  ;;  %v1443_v53 = vmax.f32 %v1441_v47, %v1442_v58  ;;  %v3635_v45 = vld [vmem:[#allocation2 + $0xe0] sm:$0xff] }
 0x317   :  { %v1875_v18 = vmul.f32 %v3630_v49, %v4772_v31  ;;  %v1874_v60 = vmul.f32 %v3631_v6, %v4772_v31 }
 0x318   :  { %2288 = vbcast.lane.b32.xlu1 %v6055_v59, 376  ;;  %v1444_v3 = vsub.f32 %v4626_v40, %v1443_v53  ;;  %v1445_v51 = vsub.f32 %v4673_v23, %v1443_v53  ;;  %v1446_v26 = vsub.f32 %v4660_v36, %v1443_v53  ;;  %v1447_v8 = vsub.f32 %v4648_v7, %v1443_v53  ;;  %v3632_v23 = vld [vmem:[#allocation2 + $0xd8] sm:$0xff] }
 0x319   :  { %v1448_v2 = vsub.f32 %v4692_v10, %v1443_v53  ;;  %v1449_v55 = vsub.f32 %v4684_v22, %v1443_v53  ;;  %v1450_v57 = vsub.f32 %v4728_v19, %v1443_v53  ;;  %v1451_v39 = vsub.f32 %v4719_v15, %v1443_v53  ;;  %v3636_v53 = vld [vmem:[#allocation2 + $0xf8] sm:$0xff] }
 0x31a   :  { %v2101_v35 = vpop.permute.xlu1 %2100  ;;  %2188 = vbcast.lane.b32.xlu0 %v4192_v63, 368  ;;  %v1452_v44 = vmul.f32 1.442695, %v1444_v3  ;;  %v1454_v14 = vmul.f32 1.442695, %v1445_v51  ;;  %v1934_v40 = vsel %vm669_vm4, %v1875_v18, 0.0  ;;  %v1877_v36 = vmul.f32 %v3632_v23, %v4772_v31 }
 0x31b   :  { %v2306_v7 = vmul.f32 %v2101_v35, %v6058_v50  ;;  %v1456_v56 = vmul.f32 1.442695, %v1446_v26  ;;  %v1458_v10 = vmul.f32 1.442695, %v1447_v8  ;;  %v1876_v22 = vmul.f32 %v3633_v24, %v4772_v31  ;;  %v3638_v51 = vld [vmem:[#allocation2 + $0x290] sm:$0xff] }
 0x31c   :  { %3578 = vpow2.f32 %v1452_v44  ;;  %v1460_v19 = vmul.f32 1.442695, %v1448_v2  ;;  %v1462_v15 = vmul.f32 1.442695, %v1449_v55  ;;  %v1879_v63 = vmul.f32 %v3634_v38, %v4772_v31 }
 0x31d   :  { %v2357_v13 = vsel %vm669_vm4, %v2306_v7, 0.0  ;;  %3580 = vpow2.f32 %v1454_v14  ;;  %v4794_v43 = vadd.f32 %v1934_v40, %v4512_v28  ;;  %v1919_v27 = vsel %vm669_vm4, %v1874_v60, 0.0  ;;  %v3637_v60 = vld [vmem:[#allocation2 + $0xf0] sm:$0xff]  ;;  %v3639_v7 = vld [vmem:[#allocation2 + $0x2a0] sm:$0xff] }
 0x31e   :  { %v4798_v42 = vadd.f32 %v2357_v13, %v4686_v4  ;;  %v2105_v48 = vpop.permute.xlu1 %2104  ;;  %1838 = vrot.lane.b32.xlu0 %v6059_v52, %s3815_s21  ;;  %3582 = vpow2.f32 %v1456_v56  ;;  %v4803_v1 = vadd.f32 %v1919_v27, %v4514_v16  ;;  %v1964_v21 = vsel %vm669_vm4, %v1877_v36, 0.0 }
 0x31f   :  { %v2307_v54 = vmul.f32 %v2105_v48, %v4545_v17  ;;  %3584 = vpow2.f32 %v1458_v10  ;;  %v4808_v28 = vadd.f32 %v1964_v21, %v4516_v11  ;;  %v1949_v47 = vsel %vm669_vm4, %v1876_v22, 0.0 }
 0x320   :  { %6060 = vst [vmem:[#allocation25_spill] sm:$0xff] %v4803_v1  ;;  %v1464_v4 = vmul.f32 1.442695, %v1450_v57  ;;  %v4812_v29 = vadd.f32 %v1949_v47, %v4518_v46  ;;  %v1994_v58 = vsel %vm669_vm4, %v1879_v63, 0.0  ;;  %v1878_v16 = vmul.f32 %v3635_v45, %v4772_v31  ;;  %v6066_v57 = vld [vmem:[#allocation24_spill] sm:$0xff] }
 0x321   :  { %6061 = vst [vmem:[#allocation27_spill] sm:$0xff] %v4808_v28  ;;  %v2372_v0 = vsel %vm669_vm4, %v2307_v54, 0.0  ;;  %3586 = vpow2.f32 %v1460_v19  ;;  %v4818_v17 = vadd.f32 %v1994_v58, %v4537_v25  ;;  %v1881_v11 = vmul.f32 %v3636_v53, %v4772_v31 }
 0x322   :  { %6062 = vst [vmem:[#allocation18_spill] sm:$0xff] %v4812_v29  ;;  %v4822_v49 = vadd.f32 %v2372_v0, %v4708_v32  ;;  %v2109_v18 = vpop.permute.xlu1 %2108  ;;  %2200 = vbcast.lane.b32.xlu0 %v6027_v62, 328  ;;  %v1466_v46 = vmul.f32 1.442695, %v1451_v39  ;;  %v1979_v6 = vsel %vm669_vm4, %v1878_v16, 0.0  ;;  %v1880_v3 = vmul.f32 %v3637_v60, %v4772_v31  ;;  %v509_v29 = vld [vmem:[#allocation2 + $0x5d0] sm:$0xff] }
 0x323   :  { %6063 = vst [vmem:[#allocation9_spill] sm:$0xff] %v4818_v17  ;;  %v2308_v26 = vmul.f32 %v3638_v51, %v2109_v18  ;;  %3588 = vpow2.f32 %v1462_v15  ;;  %v4828_v25 = vadd.f32 %v1979_v6, %v4539_v12  ;;  %v2024_v8 = vsel %vm669_vm4, %v1881_v11, 0.0  ;;  %v6068_v12 = vld [vmem:[#allocation46_spill] sm:$0xff]  ;;  %v3640_v6 = vld [vmem:[#allocation2 + $0x2c0] sm:$0xff]  ;;  %v478_v17 = vld [vmem:[#allocation2 + $0x4d8] sm:$0xff] }
 0x324   :  { %v4832_v32 = vadd.f32 %v2024_v8, %v4556_v30  ;;  %v2009_v2 = vsel %vm669_vm4, %v1880_v3, 0.0  ;;  %3590 = vpow2.f32 %v1464_v4 }
 0x325   :  { %6064 = vst [vmem:[#allocation30_spill] sm:$0xff] %v4828_v25  ;;  %v2387_v55 = vsel %vm669_vm4, %v2308_v26, 0.0  ;;  %v4837_v39 = vadd.f32 %v2009_v2, %v6066_v57  ;;  %3592 = vpow2.f32 %v1466_v46  ;;  %v476_v25 = vld [vmem:[#allocation2 + $0x4c8] sm:$0xff] }
 0x326   :  { %6065 = vst [vmem:[#allocation10_spill] sm:$0xff] %v4832_v32  ;;  %v2388_v31 = vadd.f32 %v2387_v55, %v4721_v5  ;;  %v2113_v35 = vpop.permute.xlu1 %2112  ;;  %2208 = vbcast.lane.b32.xlu0 %v6027_v62, 344  ;;  %v3641_v55 = vld [vmem:[#allocation2 + $0x2d0] sm:$0xff] }
 0x327   :  { %6067 = vst [vmem:[#allocation11_spill] sm:$0xff] %v4837_v39  ;;  %v2309_v44 = vmul.f32 %v2113_v35, %v6068_v12  ;;  %v472_v39 = vld [vmem:[#allocation2 + $0x4a8] sm:$0xff]  ;;  %v3644_v32 = vld [vmem:[#allocation2 + $0x2b0] sm:$0xff] }
 0x329   :  { %v4842_v14 = vpop.eup %3578  ;;  %v2402_v30 = vsel %vm669_vm4, %v2309_v44, 0.0 }
 0x32a   :  { %v4845_v40 = vpop.eup %3580  ;;  %v4848_v23 = vadd.f32 %v2402_v30, %v4741_v34  ;;  %v2117_v36 = vpop.permute.xlu1 %2116  ;;  %2216 = vbcast.lane.b32.xlu0 %v6027_v62, 360  ;;  %v1468_v5 = vsel %vm669_vm4, %v4842_v14, 0.0 }
 0x32b   :  { %v4853_v50 = vpop.eup %3582  ;;  %v2310_v56 = vmul.f32 %v3639_v7, %v2117_v36  ;;  %v1469_v10 = vsel %vm669_vm4, %v4845_v40, 0.0 }
 0x32c   :  { %v4857_v24 = vpop.eup %3584  ;;  %v1470_v22 = vadd.f32 %v1469_v10, %v1468_v5  ;;  %v1471_v34 = vsel %vm669_vm4, %v4853_v50, 0.0  ;;  %v3642_v5 = vld [vmem:[#allocation2 + $0x2e0] sm:$0xff] }
 0x32d   :  { %v2417_v19 = vsel %vm669_vm4, %v2310_v56, 0.0  ;;  %v1473_v27 = vsel %vm669_vm4, %v4857_v24, 0.0 }
 0x32e   :  { %v4862_v15 = vpop.eup %3586  ;;  %v2418_v38 = vadd.f32 %v2417_v19, %v4748_v41  ;;  %v4865_v63 = vpop.permute.xlu1 %2120  ;;  %2224 = vbcast.lane.b32.xlu0 %v6027_v62, 376  ;;  %v1472_v13 = vadd.f32 %v1471_v34, %v1470_v22 }
 0x32f   :  { %v1475_v21 = vsel %vm669_vm4, %v4862_v15, 0.0  ;;  %v4875_v62 = vpop.trf.xlu0 }
 0x330   :  { %v3589_v48 = vpop.eup %3588  ;;  %v1474_v52 = vadd.f32 %v1473_v27, %v1472_v13 }
 0x331   :  { %v3591_v54 = vpop.eup %3590  ;;  %v1477_v58 = vsel %vm669_vm4, %v3589_v48, 0.0 }
 0x332   :  { %v2129_v47 = vpop.permute.xlu1 %2128  ;;  %2228 = vbcast.lane.b32.xlu0 %v6044_v20, 320  ;;  %v1476_v4 = vadd.f32 %v1475_v21, %v1474_v52  ;;  %v3593_v45 = vpop.eup %3592  ;;  %v1479_v53 = vsel %vm669_vm4, %v3591_v54, 0.0 }
 0x333   :  { %v2313_v41 = vmul.f32 %v2129_v47, %v4612_v61  ;;  %v1481_v61 = vsel %vm669_vm4, %v3593_v45, 0.0  ;;  %v4889_v2 = vpop.trf.xlu0 }
 0x334   :  { %v1478_v16 = vadd.f32 %v1477_v58, %v1476_v4 }
 0x335   :  { %v2462_v0 = vsel %vm669_vm4, %v2313_v41, 0.0 }
 0x336   :  { %v4880_v11 = vadd.f32 %v2462_v0, %v4770_v37  ;;  %v2133_v18 = vpop.permute.xlu1 %2132  ;;  %2236 = vbcast.lane.b32.xlu0 %v6044_v20, 336  ;;  %v1480_v46 = vadd.f32 %v1479_v53, %v1478_v16  ;;  %v455_v53 = vld [vmem:[#allocation2 + $0x420] sm:$0xff] }
 0x337   :  { %v2314_v60 = vmul.f32 %v3640_v6, %v2133_v18  ;;  %v4895_v7 = vpop.trf.xlu0  ;;  %v456_v18 = vld [vmem:[#allocation2 + $0x428] sm:$0xff] }
 0x338   :  { %v1482_v3 = vadd.f32 %v1481_v61, %v1480_v46  ;;  %v6072_v46 = vld [vmem:[#allocation23_spill] sm:$0xff] }
 0x339   :  { %v2359_v51 = vsel %vm669_vm4, %v2314_v60, 0.0  ;;  %v2311_v6 = vmul.f32 %v4865_v63, %v6072_v46  ;;  %v452_v60 = vld [vmem:[#allocation2 + $0x408] sm:$0xff]  ;;  %v453_v61 = vld [vmem:[#allocation2 + $0x410] sm:$0xff] }
 0x33a   :  { %v4886_v26 = vadd.f32 %v2359_v51, %v4798_v42  ;;  %v2141_v8 = vpop.permute.xlu1 %2140  ;;  %2244 = vbcast.lane.b32.xlu0 %v6044_v20, 352  ;;  %v1483_v37 = vrot.slane %v1482_v3, 4  ;;  %v3643_v51 = vld [vmem:[#allocation2 + $0x2f0] sm:$0xff] }
 0x33b   :  { %v2316_v57 = vmul.f32 %v3641_v55, %v2141_v8 }
 0x33c   :  { %v1484_v35 = vadd.f32 %v1483_v37, %v1482_v3  ;;  %v457_v3 = vld [vmem:[#allocation2 + $0x430] sm:$0xff]  ;;  %v458_v37 = vld [vmem:[#allocation2 + $0x438] sm:$0xff] }
 0x33d   :  { %v2389_v12 = vsel %vm669_vm4, %v2316_v57, 0.0  ;;  %v459_v57 = vld [vmem:[#allocation2 + $0x440] sm:$0xff] }
 0x33e   :  { %v4892_v44 = vadd.f32 %v2389_v12, %v2388_v31  ;;  %v2149_v30 = vpop.permute.xlu1 %2148  ;;  %2252 = vbcast.lane.b32.xlu0 %v6044_v20, 368  ;;  %v1485_v36 = vrot.slane %v1484_v35, 2  ;;  %v4902_v31 = vpop.trf.xlu0  ;;  %v230_v20 = vld [vmem:[%s5935_s2 + $0x18] sm:$0xff]  ;;  %v461_v12 = vld [vmem:[#allocation2 + $0x450] sm:$0xff] }
 0x33f   :  { %v2318_v42 = vmul.f32 %v3642_v5, %v2149_v30  ;;  %v462_v5 = vld [vmem:[#allocation2 + $0x458] sm:$0xff] }
 0x340   :  { %v1486_v56 = vadd.f32 %v1485_v36, %v1484_v35  ;;  %v460_v35 = vld [vmem:[#allocation2 + $0x448] sm:$0xff] }
 0x341   :  { %v2419_v10 = vsel %vm669_vm4, %v2318_v42, 0.0  ;;  %v463_v42 = vld [vmem:[#allocation2 + $0x460] sm:$0xff] }
 0x342   :  { %v4898_v22 = vadd.f32 %v2419_v10, %v2418_v38  ;;  %2260 = vbcast.lane.b32.xlu0 %v6055_v59, 320  ;;  %v1487_v19 = vrot.slane %v1486_v56, 1  ;;  %v4908_v13 = vpop.trf.xlu0  ;;  %v6069_v38 = vld [vmem:[#allocation22_spill] sm:$0xff] }
 0x343   :  { %v318_v27 = vadd.f32 %v6069_v38, %v230_v20  ;;  %v2432_v38 = vsel %vm669_vm4, %v2311_v6, 0.0  ;;  %v467_v6 = vld [vmem:[#allocation2 + $0x480] sm:$0xff] }
 0x344   :  { %v1488_v34 = vadd.f32 %v1487_v19, %v1486_v56  ;;  %v464_v56 = vld [vmem:[#allocation2 + $0x468] sm:$0xff] }
 0x346   :  { %2268 = vbcast.lane.b32.xlu0 %v6055_v59, 336  ;;  %3594 = vrcp.f32 %v1488_v34  ;;  %v4912_v52 = vpop.trf.xlu0 }
 0x34a   :  { %2276 = vbcast.lane.b32.xlu0 %v6055_v59, 352 }
 0x34e   :  { %2284 = vbcast.lane.b32.xlu0 %v6055_v59, 368 }
 0x352   :  { %2957 = vrot.lane.b32.xlu0 %v318_v27, %s3815_s21 }
 0x353   :  { %v3595_v21 = vpop.eup %3594 }
 0x354   :  { %v4915_v47 = vmul.f32 %v3595_v21, %v3589_v48  ;;  %v4917_v4 = vmul.f32 %v3595_v21, %v3593_v45  ;;  %v4919_v41 = vmul.f32 %v3595_v21, %v3591_v54  ;;  %v4922_v58 = vmul.f32 %v3595_v21, %v4862_v15  ;;  %v4939_v15 = vpop.trf.xlu0  ;;  %v451_v54 = vld [vmem:[#allocation2 + $0x400] sm:$0xff] }
 0x355   :  { %v4925_v16 = vmul.f32 %v3595_v21, %v4857_v24  ;;  %v4928_v59 = vmul.f32 %v3595_v21, %v4853_v50  ;;  %v4931_v0 = vmul.f32 %v3595_v21, %v4845_v40  ;;  %v4935_v48 = vmul.f32 %v3595_v21, %v4842_v14  ;;  %v6071_v40 = vld [vmem:[#allocation47_spill] sm:$0xff]  ;;  %v2157_v24 = vpop.permute.xlu1 %2156  ;;  %v6073_v21 = vld [vmem:[#allocation48_spill] sm:$0xff] }
 0x356   :  { %3491 = vmatpush3.msra.mxu0 %v4917_v4  ;;  %v6070_v45 = vmov 0.0   ;;  %v2303_v50 = vmul.f32 %v4750_v9, %v6071_v40  ;;  %v2320_v8 = vmul.f32 %v3643_v51, %v2157_v24  ;;  %v454_v9 = vld [vmem:[#allocation2 + $0x418] sm:$0xff]  ;;  %v4960_v63 = vmul.f32 %v4922_v58, %v455_v53  ;;  %v465_v24 = vld [vmem:[#allocation2 + $0x470] sm:$0xff] }
 0x357   :  { %3492 = vmatprep.subr.mxu0 %v6070_v45  ;;  %v4963_v30 = vmul.f32 %v4915_v47, %v456_v18  ;;  %v1498_v10 = vmul.f32 %v4935_v48, %v451_v54  ;;  %v1499_v19 = vmul.f32 %v4931_v0, %v452_v60  ;;  %v1500_v34 = vmul.f32 %v4928_v59, %v453_v61  ;;  %v466_v53 = vld [vmem:[#allocation2 + $0x478] sm:$0xff]  ;;  %v468_v60 = vld [vmem:[#allocation2 + $0x488] sm:$0xff]  ;;  %v469_v61 = vld [vmem:[#allocation2 + $0x490] sm:$0xff] }
 0x358   :  { %3493 = vmatpush3.msra.mxu0 %v4919_v41  ;;  %v4947_v14 = vpop.trf.xlu0  ;;  %v2430_v55 = vsel %vm669_vm4, %v2303_v50, 0.0  ;;  %v4970_v20 = vmul.f32 %v4919_v41, %v457_v3  ;;  %v6074_v50 = vld [vmem:[#allocation42_spill] sm:$0xff]  ;;  %v1501_v18 = vmul.f32 %v4925_v16, %v454_v9  ;;  %v4978_v54 = vmul.f32 %v4917_v4, %v458_v37  ;;  %v470_v37 = vld [vmem:[#allocation2 + $0x498] sm:$0xff] }
 0x359   :  { %3494 = vmatprep.subr.mxu0 %v6070_v45  ;;  %v2449_v46 = vsel %vm669_vm4, %v2320_v8, 0.0  ;;  %v1506_v3 = vmul.f32 %v4935_v48, %v459_v57  ;;  %v1508_v51 = vmul.f32 %v4928_v59, %v461_v12  ;;  %v1509_v8 = vmul.f32 %v4925_v16, %v462_v5  ;;  %v473_v57 = vld [vmem:[#allocation2 + $0x4b0] sm:$0xff] }
 0x35a   :  { %3495 = vmatpush3.msra.mxu0 %v4915_v47  ;;  %v4999_v12 = vmul.f32 %v4917_v4, %v466_v53  ;;  %v475_v53 = vld [vmem:[#allocation2 + $0x4c0] sm:$0xff] }
 0x35b   :  { %3496 = vmatprep.subr.mxu0 %v6070_v45 }
 0x35c   :  { %3497 = vmatpush3.msra.mxu0 %v4922_v58 }
 0x35d   :  { %3498 = vmatprep.subr.mxu0 %v6070_v45 }
 0x35e   :  { %3499 = vmatpush3.msra.mxu0 %v4925_v16 }
 0x35f   :  { %3500 = vmatprep.subr.mxu0 %v6070_v45 }
 0x360   :  { %3501 = vmatpush3.msra.mxu0 %v4928_v59 }
 0x361   :  { %3502 = vmatprep.subr.mxu0 %v6070_v45 }
 0x362   :  { %3503 = vmatpush3.msra.mxu0 %v4931_v0 }
 0x363   :  { %3504 = vmatprep.subr.mxu0 %v6070_v45 }
 0x364   :  { %3505 = vmatpush3.msra.mxu0 %v4935_v48  ;;  %v2057_v36 = vpop.permute.xlu0 %2056 }
 0x365   :  { %v2295_v40 = vmul.f32 %v2057_v36, %v6073_v21  ;;  %3509 = vmatprep.subr.mxu0 %v6074_v50  ;;  %3507 = vmatmul.mubr.msk.f32.vlgmr.msra.gmra.mxu0 %vm669_vm4, %v318_v27  ;;  %v1507_v27 = vmul.f32 %v4931_v0, %v460_v35  ;;  %v471_v36 = vld [vmem:[#allocation2 + $0x4a0] sm:$0xff]  ;;  %v4990_v21 = vmul.f32 %v4922_v58, %v463_v42  ;;  %v474_v42 = vld [vmem:[#allocation2 + $0x4b8] sm:$0xff] }
 0x366   :  { %3510 = vmatpush3.msra.mxu0 %v6074_v50  ;;  %3511 = vmatprep.mubr.msk.f32.mxu0 %vm231_vm2, %v4875_v62  ;;  %v4993_v62 = vmul.f32 %v4915_v47, %v464_v56  ;;  %v4996_v35 = vmul.f32 %v4919_v41, %v465_v24  ;;  %v1514_v56 = vmul.f32 %v4935_v48, %v467_v6  ;;  %v477_v6 = vld [vmem:[#allocation2 + $0x4d0] sm:$0xff] }
 0x367   :  { %v2429_v9 = vsel %vm669_vm4, %v2295_v40, 0.0  ;;  %v1562_v40 = vsel %vm669_vm4, %v1498_v10, 0.0  ;;  %v1517_v10 = vmul.f32 %v4925_v16, %v470_v37  ;;  %v479_v37 = vld [vmem:[#allocation2 + $0x4e0] sm:$0xff] }
 0x368   :  { %v2431_v50 = vadd.f32 %v2430_v55, %v2429_v9  ;;  %v2125_v45 = vpop.permute.xlu0 %2124  ;;  %v1515_v55 = vmul.f32 %v4931_v0, %v468_v60  ;;  %v1516_v9 = vmul.f32 %v4928_v59, %v469_v61  ;;  %v5016_v60 = vmul.f32 %v4915_v47, %v472_v39 }
 0x369   :  { %v2312_v5 = vmul.f32 %v3644_v32, %v2125_v45  ;;  %3512 = vmatmul.mubr.msk.f32.vlgmr.msra.gmra.mxu0 %vm231_vm2, %v4889_v2  ;;  %v1518_v32 = vmul.f32 %v4922_v58, %v471_v36  ;;  %v1563_v2 = vsel %vm669_vm4, %v1499_v19, 0.0  ;;  %v5019_v61 = vmul.f32 %v4919_v41, %v473_v57 }
 0x36a   :  { %3514 = vmatprep.mubr.msk.f32.mxu0 %vm231_vm2, %v4895_v7  ;;  %v5009_v24 = vadd.f32 %v2432_v38, %v2431_v50  ;;  %v1564_v7 = vadd.f32 %v1563_v2, %v1562_v40  ;;  %v5025_v36 = vmul.f32 %v4917_v4, %v474_v42  ;;  %v1565_v19 = vsel %vm669_vm4, %v1500_v34, 0.0 }
 0x36b   :  { %v2447_v45 = vsel %vm669_vm4, %v2312_v5, 0.0  ;;  %v1583_v5 = vsel %vm669_vm4, %v1506_v3, 0.0  ;;  %v1522_v39 = vmul.f32 %v4935_v48, %v475_v53  ;;  %v1523_v57 = vmul.f32 %v4931_v0, %v476_v25 }
 0x36c   :  { %v2448_v38 = vadd.f32 %v2447_v45, %v4763_v33  ;;  %v5022_v50 = vpop.permute.xlu0 %1834  ;;  %v1566_v40 = vadd.f32 %v1565_v19, %v1564_v7  ;;  %v1584_v33 = vsel %vm669_vm4, %v1507_v27, 0.0  ;;  %v1524_v42 = vmul.f32 %v4928_v59, %v477_v6 }
 0x36d   :  { %3515 = vmatmul.mubr.msk.f32.gmra.mxu0 %vm231_vm2, %v4902_v31  ;;  %v1567_v34 = vsel %vm669_vm4, %v1501_v18, 0.0  ;;  %v1585_v3 = vadd.f32 %v1584_v33, %v1583_v5  ;;  %v1525_v45 = vmul.f32 %v4925_v16, %v478_v17  ;;  %v5042_v31 = vmul.f32 %v4922_v58, %v479_v37 }
 0x36e   :  { %3517 = vmatprep.mubr.msk.f32.mxu0 %vm231_vm2, %v4908_v13  ;;  %v5036_v2 = vadd.f32 %v2449_v46, %v2448_v38  ;;  %v1568_v53 = vadd.f32 %v1567_v34, %v1566_v40  ;;  %v1586_v25 = vsel %vm669_vm4, %v1508_v51, 0.0  ;;  %v1569_v27 = vsel %vm669_vm4, %v4960_v63, 0.0  ;;  %v6076_v38 = vld [vmem:[#allocation21_spill] sm:$0xff] }
 0x36f   :  { %v1587_v13 = vadd.f32 %v1586_v25, %v1585_v3  ;;  %v1604_v46 = vsel %vm669_vm4, %v1514_v56, 0.0  ;;  %v1605_v6 = vsel %vm669_vm4, %v1515_v55, 0.0  ;;  %v1588_v37 = vsel %vm669_vm4, %v1509_v8, 0.0  ;;  %v3645_v3 = vld [vmem:[#allocation2 + $0x2d8] sm:$0xff] }
 0x370   :  { %6075 = vst [vmem:[#allocation8_spill] sm:$0xff] %v5036_v2  ;;  %v2137_v7 = vpop.permute.xlu0 %2136  ;;  %v1570_v17 = vadd.f32 %v1569_v27, %v1568_v53  ;;  %v1606_v19 = vadd.f32 %v1605_v6, %v1604_v46  ;;  %v1571_v63 = vsel %vm669_vm4, %v4963_v30, 0.0  ;;  %v1573_v51 = vsel %vm669_vm4, %v4970_v20, 0.0  ;;  %v513_v2 = vld [vmem:[#allocation2 + $0x5f0] sm:$0xff] }
 0x371   :  { %v2315_v18 = vmul.f32 %v2137_v7, %v6076_v38  ;;  %3518 = vmatmul.mubr.msk.f32.gmra.mxu0 %vm231_vm2, %v4912_v52  ;;  %v1589_v56 = vadd.f32 %v1588_v37, %v1587_v13  ;;  %v1607_v55 = vsel %vm669_vm4, %v1516_v9, 0.0  ;;  %v1590_v52 = vsel %vm669_vm4, %v4990_v21, 0.0 }
 0x372   :  { %3520 = vmatprep.mubr.msk.f32.mxu0 %vm231_vm2, %v4939_v15  ;;  %v1572_v40 = vadd.f32 %v1571_v63, %v1570_v17  ;;  %v1608_v8 = vadd.f32 %v1607_v55, %v1606_v19  ;;  %v1575_v30 = vsel %vm669_vm4, %v4978_v54, 0.0  ;;  %v1609_v20 = vsel %vm669_vm4, %v1517_v10, 0.0 }
 0x373   :  { %v2374_v5 = vsel %vm669_vm4, %v2315_v18, 0.0  ;;  %v1591_v34 = vadd.f32 %v1590_v52, %v1589_v56  ;;  %v1592_v21 = vsel %vm669_vm4, %v4993_v62, 0.0  ;;  %v1625_v27 = vsel %vm669_vm4, %v1522_v39, 0.0  ;;  %v480_v62 = vld [vmem:[#allocation2 + $0x4e8] sm:$0xff] }
 0x374   :  { %v5064_v33 = vadd.f32 %v2374_v5, %v4822_v49  ;;  %v2145_v15 = vpop.permute.xlu0 %2144  ;;  %v1574_v9 = vadd.f32 %v1573_v51, %v1572_v40  ;;  %v1610_v25 = vadd.f32 %v1609_v20, %v1608_v8  ;;  %v1611_v49 = vsel %vm669_vm4, %v1518_v32, 0.0  ;;  %v3646_v39 = vld [vmem:[#allocation2 + $0x2e8] sm:$0xff]  ;;  %v483_v8 = vld [vmem:[#allocation2 + $0x500] sm:$0xff] }
 0x375   :  { %v2317_v53 = vmul.f32 %v3645_v3, %v2145_v15  ;;  %3521 = vmatmul.mubr.msk.f32.gmra.mxu0 %vm231_vm2, %v4947_v14  ;;  %v1593_v7 = vadd.f32 %v1592_v21, %v1591_v34  ;;  %v1626_v54 = vsel %vm669_vm4, %v1523_v57, 0.0  ;;  %v1594_v46 = vsel %vm669_vm4, %v4996_v35, 0.0  ;;  %v481_v35 = vld [vmem:[#allocation2 + $0x4f0] sm:$0xff] }
 0x376   :  { %v1576_v10 = vadd.f32 %v1575_v30, %v1574_v9  ;;  %v1612_v6 = vadd.f32 %v1611_v49, %v1610_v25  ;;  %v1613_v32 = vsel %vm669_vm4, %v5016_v60, 0.0  ;;  %v1627_v17 = vadd.f32 %v1626_v54, %v1625_v27  ;;  %v484_v30 = vld [vmem:[#allocation2 + $0x508] sm:$0xff]  ;;  %v485_v34 = vld [vmem:[#allocation2 + $0x510] sm:$0xff]  ;;  %v487_v9 = vld [vmem:[#allocation2 + $0x520] sm:$0xff] }
 0x377   :  { %v2404_v13 = vsel %vm669_vm4, %v2317_v53, 0.0  ;;  %v1595_v18 = vadd.f32 %v1594_v46, %v1593_v7  ;;  %v1596_v57 = vsel %vm669_vm4, %v4999_v12, 0.0  ;;  %v1628_v63 = vsel %vm669_vm4, %v1524_v42, 0.0  ;;  %v482_v12 = vld [vmem:[#allocation2 + $0x4f8] sm:$0xff]  ;;  %v489_v21 = vld [vmem:[#allocation2 + $0x530] sm:$0xff]  ;;  %v491_v49 = vld [vmem:[#allocation2 + $0x540] sm:$0xff] }
 0x378   :  { %v5080_v14 = vadd.f32 %v2404_v13, %v4848_v23  ;;  %v2153_v38 = vpop.permute.xlu0 %2152  ;;  %v1614_v19 = vadd.f32 %v1613_v32, %v1612_v6  ;;  %v1615_v23 = vsel %vm669_vm4, %v5019_v61, 0.0  ;;  %v1629_v56 = vadd.f32 %v1628_v63, %v1627_v17  ;;  %v486_v61 = vld [vmem:[#allocation2 + $0x518] sm:$0xff]  ;;  %v492_v13 = vld [vmem:[#allocation2 + $0x548] sm:$0xff]  ;;  %v497_v63 = vld [vmem:[#allocation2 + $0x570] sm:$0xff] }
 0x379   :  { %v2319_v37 = vmul.f32 %v3646_v39, %v2153_v38  ;;  %v5087_v51 = vadd.f32 %v1596_v57, %v1595_v18  ;;  %v1527_v60 = vmul.f32 %v4915_v47, %v480_v62  ;;  %v1630_v40 = vsel %vm669_vm4, %v1525_v45, 0.0  ;;  %v488_v45 = vld [vmem:[#allocation2 + $0x528] sm:$0xff]  ;;  %v490_v7 = vld [vmem:[#allocation2 + $0x538] sm:$0xff]  ;;  %v493_v62 = vld [vmem:[#allocation2 + $0x550] sm:$0xff] }
 0x37a   :  { %v1616_v5 = vadd.f32 %v1615_v23, %v1614_v19  ;;  %v1617_v42 = vsel %vm669_vm4, %v5025_v36, 0.0  ;;  %v1631_v15 = vadd.f32 %v1630_v40, %v1629_v56  ;;  %v1528_v20 = vmul.f32 %v4919_v41, %v481_v35  ;;  %v494_v18 = vld [vmem:[#allocation2 + $0x558] sm:$0xff]  ;;  %v495_v57 = vld [vmem:[#allocation2 + $0x560] sm:$0xff]  ;;  %v496_v19 = vld [vmem:[#allocation2 + $0x568] sm:$0xff] }
 0x37b   :  { %v2434_v55 = vsel %vm669_vm4, %v2319_v37, 0.0  ;;  %v1632_v53 = vsel %vm669_vm4, %v5042_v31, 0.0  ;;  %v1529_v27 = vmul.f32 %v4917_v4, %v482_v12  ;;  %v1530_v36 = vmul.f32 %v4935_v48, %v483_v8 }
 0x37c   :  { %v5095_v52 = vadd.f32 %v2434_v55, %v5009_v24  ;;  %v1618_v3 = vadd.f32 %v1617_v42, %v1616_v5  ;;  %v1577_v24 = vrot.slane %v1576_v10, 4  ;;  %v1633_v25 = vadd.f32 %v1632_v53, %v1631_v15  ;;  %v499_v5 = vld [vmem:[#allocation2 + $0x580] sm:$0xff]  ;;  %v500_v15 = vld [vmem:[#allocation2 + $0x588] sm:$0xff]  ;;  %v502_v53 = vld [vmem:[#allocation2 + $0x598] sm:$0xff] }
 0x37d   :  { %v1634_v54 = vsel %vm669_vm4, %v1527_v60, 0.0  ;;  %v1531_v46 = vmul.f32 %v4931_v0, %v484_v30  ;;  %v1532_v6 = vmul.f32 %v4928_v59, %v485_v34  ;;  %v1533_v31 = vmul.f32 %v4925_v16, %v486_v61  ;;  %v498_v60 = vld [vmem:[#allocation2 + $0x578] sm:$0xff] }
 0x37e   :  { %v1635_v38 = vadd.f32 %v1634_v54, %v1633_v25  ;;  %v1534_v32 = vmul.f32 %v4922_v58, %v487_v9  ;;  %v5110_v17 = vmul.f32 %v4915_v47, %v488_v45  ;;  %v5113_v39 = vmul.f32 %v4919_v41, %v489_v21  ;;  %v503_v25 = vld [vmem:[#allocation2 + $0x5a0] sm:$0xff] }
 0x37f   :  { %v1636_v37 = vsel %vm669_vm4, %v1528_v20, 0.0  ;;  %v5117_v35 = vmul.f32 %v4917_v4, %v490_v7  ;;  %v1538_v23 = vmul.f32 %v4935_v48, %v491_v49  ;;  %v1578_v56 = vadd.f32 %v1577_v24, %v1576_v10  ;;  %v501_v10 = vld [vmem:[#allocation2 + $0x590] sm:$0xff]  ;;  %v504_v7 = vld [vmem:[#allocation2 + $0x5a8] sm:$0xff] }
 0x380   :  { %v1637_v55 = vadd.f32 %v1636_v37, %v1635_v38  ;;  %v1539_v40 = vmul.f32 %v4931_v0, %v492_v13  ;;  %v1598_v12 = vrot.slane %v5087_v51, 4  ;;  %v1619_v8 = vrot.slane %v1618_v3, 4  ;;  %v505_v49 = vld [vmem:[#allocation2 + $0x5b0] sm:$0xff]  ;;  %v506_v38 = vld [vmem:[#allocation2 + $0x5b8] sm:$0xff] }
 0x381   :  { %v1638_v42 = vsel %vm669_vm4, %v1529_v27, 0.0  ;;  %v1540_v30 = vmul.f32 %v4928_v59, %v493_v62  ;;  %v5125_v34 = vmul.f32 %v4925_v16, %v494_v18  ;;  %v1646_v20 = vsel %vm669_vm4, %v1530_v36, 0.0  ;;  %v507_v62 = vld [vmem:[#allocation2 + $0x5c0] sm:$0xff] }
 0x382   :  { %v1639_v61 = vadd.f32 %v1638_v42, %v1637_v55  ;;  %v5129_v9 = vmul.f32 %v4922_v58, %v495_v57  ;;  %v5132_v45 = vmul.f32 %v4915_v47, %v496_v19  ;;  %v5135_v21 = vmul.f32 %v4919_v41, %v497_v63 }
 0x383   :  { %v1647_v24 = vsel %vm669_vm4, %v1531_v46, 0.0  ;;  %v5139_v27 = vmul.f32 %v4917_v4, %v498_v60  ;;  %v1546_v36 = vmul.f32 %v4935_v48, %v499_v5  ;;  %v1579_v54 = vrot.slane %v1578_v56, 2  ;;  %v508_v46 = vld [vmem:[#allocation2 + $0x5c8] sm:$0xff] }
 0x384   :  { %v1648_v13 = vadd.f32 %v1647_v24, %v1646_v20  ;;  %v1547_v18 = vmul.f32 %v4931_v0, %v500_v15  ;;  %v1599_v37 = vadd.f32 %v1598_v12, %v5087_v51  ;;  %v1620_v57 = vadd.f32 %v1619_v8, %v1618_v3  ;;  %v510_v3 = vld [vmem:[#allocation2 + $0x5d8] sm:$0xff]  ;;  %v512_v24 = vld [vmem:[#allocation2 + $0x5e8] sm:$0xff] }
 0x385   :  { %v1649_v19 = vsel %vm669_vm4, %v1532_v6, 0.0  ;;  %v1548_v63 = vmul.f32 %v4928_v59, %v501_v10  ;;  %v1549_v55 = vmul.f32 %v4925_v16, %v502_v53  ;;  %v1640_v60 = vrot.slane %v1639_v61, 4  ;;  %v511_v6 = vld [vmem:[#allocation2 + $0x5e0] sm:$0xff] }
 0x386   :  { %v1650_v42 = vadd.f32 %v1649_v19, %v1648_v13  ;;  %v5148_v5 = vmul.f32 %v4922_v58, %v503_v25  ;;  %v5151_v20 = vmul.f32 %v4915_v47, %v504_v7  ;;  %v5154_v15 = vmul.f32 %v4919_v41, %v505_v49 }
 0x387   :  { %v1651_v51 = vsel %vm669_vm4, %v1533_v31, 0.0  ;;  %v5158_v12 = vmul.f32 %v4917_v4, %v506_v38  ;;  %v1554_v8 = vmul.f32 %v4935_v48, %v507_v62  ;;  %v1580_v10 = vadd.f32 %v1579_v54, %v1578_v56 }
 0x388   :  { %v1652_v53 = vadd.f32 %v1651_v51, %v1650_v42  ;;  %v1555_v25 = vmul.f32 %v4931_v0, %v508_v46  ;;  %v1600_v13 = vrot.slane %v1599_v37, 2  ;;  %v1621_v7 = vrot.slane %v1620_v57, 2 }
 0x389   :  { %v1653_v19 = vsel %vm669_vm4, %v1534_v32, 0.0  ;;  %v1556_v49 = vmul.f32 %v4928_v59, %v509_v29  ;;  %v1641_v28 = vadd.f32 %v1640_v60, %v1639_v61  ;;  %v1667_v1 = vsel %vm669_vm4, %v1538_v23, 0.0 }
 0x38a   :  { %v1654_v31 = vadd.f32 %v1653_v19, %v1652_v53  ;;  %v1557_v38 = vmul.f32 %v4925_v16, %v510_v3  ;;  %v5167_v48 = vmul.f32 %v4922_v58, %v511_v6  ;;  %v1655_v56 = vsel %vm669_vm4, %v5110_v17, 0.0 }
 0x38b   :  { %v1668_v0 = vsel %vm669_vm4, %v1539_v40, 0.0  ;;  %v5173_v54 = vmul.f32 %v4915_v47, %v512_v24  ;;  %v1581_v32 = vrot.slane %v1580_v10, 1  ;;  %v1601_v61 = vadd.f32 %v1600_v13, %v1599_v37 }
 0x38c   :  { %v1656_v29 = vadd.f32 %v1655_v56, %v1654_v31  ;;  %v1669_v59 = vadd.f32 %v1668_v0, %v1667_v1  ;;  %v1622_v62 = vadd.f32 %v1621_v7, %v1620_v57  ;;  %v1657_v23 = vsel %vm669_vm4, %v5113_v39, 0.0 }
 0x38d   :  { %v1670_v16 = vsel %vm669_vm4, %v1540_v30, 0.0  ;;  %v5179_v58 = vmul.f32 %v4919_v41, %v513_v2  ;;  %v1642_v46 = vrot.slane %v1641_v28, 2  ;;  %v1659_v47 = vsel %vm669_vm4, %v5117_v35, 0.0 }
 0x38e   :  { %v1658_v17 = vadd.f32 %v1657_v23, %v1656_v29  ;;  %v1671_v60 = vadd.f32 %v1670_v16, %v1669_v59  ;;  %v1672_v1 = vsel %vm669_vm4, %v5125_v34, 0.0  ;;  %v1688_v40 = vsel %vm669_vm4, %v1546_v36, 0.0 }
 0x38f   :  { %v1689_v37 = vsel %vm669_vm4, %v1547_v18, 0.0  ;;  %v1582_v39 = vadd.f32 %v1581_v32, %v1580_v10  ;;  %v1602_v41 = vrot.slane %v1601_v61, 1  ;;  %v1623_v2 = vrot.slane %v1622_v62, 1 }
 0x390   :  { %v1660_v57 = vadd.f32 %v1659_v47, %v1658_v17  ;;  %v1673_v30 = vadd.f32 %v1672_v1, %v1671_v60  ;;  %v1690_v42 = vadd.f32 %v1689_v37, %v1688_v40  ;;  %v1674_v51 = vsel %vm669_vm4, %v5129_v9, 0.0 }
 0x391   :  { %v1691_v3 = vsel %vm669_vm4, %v1548_v63, 0.0  ;;  %v1643_v35 = vadd.f32 %v1642_v46, %v1641_v28  ;;  %v1676_v36 = vsel %vm669_vm4, %v5132_v45, 0.0  ;;  %v1693_v18 = vsel %vm669_vm4, %v1549_v55, 0.0  ;;  %v514_v45 = vld [vmem:[#allocation2 + $0x5f8] sm:$0xff] }
 0x392   :  { %v1661_v6 = vrot.slane %v1660_v57, 4  ;;  %v1675_v53 = vadd.f32 %v1674_v51, %v1673_v30  ;;  %v1692_v34 = vadd.f32 %v1691_v3, %v1690_v42  ;;  %v1709_v10 = vsel %vm669_vm4, %v1554_v8, 0.0 }
 0x393   :  { %v1710_v24 = vsel %vm669_vm4, %v1555_v25, 0.0  ;;  %v1603_v63 = vadd.f32 %v1602_v41, %v1601_v61  ;;  %v1624_v28 = vadd.f32 %v1623_v2, %v1622_v62  ;;  %v1678_v31 = vsel %vm669_vm4, %v5135_v21, 0.0 }
 0x394   :  { %v1662_v13 = vadd.f32 %v1661_v6, %v1660_v57  ;;  %v1677_v7 = vadd.f32 %v1676_v36, %v1675_v53  ;;  %v1694_v9 = vadd.f32 %v1693_v18, %v1692_v34  ;;  %v1711_v19 = vadd.f32 %v1710_v24, %v1709_v10 }
 0x395   :  { %v1695_v56 = vsel %vm669_vm4, %v5148_v5, 0.0  ;;  %v1712_v8 = vsel %vm669_vm4, %v1556_v49, 0.0  ;;  %v1644_v25 = vrot.slane %v1643_v35, 1  ;;  %v1680_v29 = vsel %vm669_vm4, %v5139_v27, 0.0 }
 0x396   :  { %v1663_v0 = vrot.slane %v1662_v13, 2  ;;  %v1679_v55 = vadd.f32 %v1678_v31, %v1677_v7  ;;  %v1696_v32 = vadd.f32 %v1695_v56, %v1694_v9  ;;  %v1697_v59 = vsel %vm669_vm4, %v5151_v20, 0.0 }
 0x397   :  { %v1713_v61 = vadd.f32 %v1712_v8, %v1711_v19  ;;  %v1714_v16 = vsel %vm669_vm4, %v1557_v38, 0.0  ;;  %v1561_v5 = vmul.f32 %v4917_v4, %v514_v45  ;;  %v1699_v46 = vsel %vm669_vm4, %v5154_v15, 0.0 }
 0x398   :  { %v1664_v62 = vadd.f32 %v1663_v0, %v1662_v13  ;;  %v1681_v23 = vadd.f32 %v1680_v29, %v1679_v55  ;;  %v1698_v21 = vadd.f32 %v1697_v59, %v1696_v32  ;;  %v1739_v49 = vsel %vm1738_vm5, %v1603_v63, %v1582_v39 }
 0x399   :  { %v1715_v17 = vadd.f32 %v1714_v16, %v1713_v61  ;;  %v1716_v20 = vsel %vm669_vm4, %v5167_v48, 0.0  ;;  %v1645_v1 = vadd.f32 %v1644_v25, %v1643_v35  ;;  %v1701_v40 = vsel %vm669_vm4, %v5158_v12, 0.0  ;;  %v2161_v25 = vpop.permute.xlu0 %2160 }
 0x39a   :  { %v1665_v60 = vrot.slane %v1664_v62, 1  ;;  %v1682_v47 = vrot.slane %v1681_v23, 4  ;;  %v1700_v27 = vadd.f32 %v1699_v46, %v1698_v21  ;;  %v1741_v38 = vsel %vm1740_vm6, %v1624_v28, %v1739_v49 }
 0x39b   :  { %v1717_v37 = vadd.f32 %v1716_v20, %v1715_v17  ;;  %v1718_v15 = vsel %vm669_vm4, %v5173_v54, 0.0  ;;  %v1743_v42 = vsel %vm1742_vm7, %v1645_v1, %v1741_v38  ;;  %v1720_v48 = vsel %vm669_vm4, %v5179_v58, 0.0  ;;  %v1837_v58 = vpop.permute.xlu1 %1836 }
 0x39c   :  { %v1666_v4 = vadd.f32 %v1665_v60, %v1664_v62  ;;  %v1683_v57 = vadd.f32 %v1682_v47, %v1681_v23  ;;  %v1702_v30 = vadd.f32 %v1701_v40, %v1700_v27  ;;  %v1722_v6 = vsel %vm669_vm4, %v1561_v5, 0.0 }
 0x39d   :  { %v1719_v39 = vadd.f32 %v1718_v15, %v1717_v37  ;;  %v5226_v59 = vpop.permute.xlu0 %2164 }
 0x39e   :  { %v1684_v41 = vrot.slane %v1683_v57, 2  ;;  %v1703_v2 = vrot.slane %v1702_v30, 4  ;;  %v1745_v51 = vsel %vm1744_vm8, %v1666_v4, %v1743_v42  ;;  %v3647_v4 = vld [vmem:[#allocation2 + $0x148] sm:$0xff] }
 0x39f   :  { %v1721_v12 = vadd.f32 %v1720_v48, %v1719_v39  ;;  %v2169_v45 = vpop.permute.xlu1 %2168  ;;  %v3649_v39 = vld [vmem:[#allocation2 + $0x158] sm:$0xff]  ;;  %v3651_v48 = vld [vmem:[#allocation2 + $0x168] sm:$0xff] }
 0x3a0   :  { %v1685_v3 = vadd.f32 %v1684_v41, %v1683_v57  ;;  %v1704_v35 = vadd.f32 %v1703_v2, %v1702_v30  ;;  %v1891_v57 = vmul.f32 %v3647_v4, %v1837_v58  ;;  %v3648_v30 = vld [vmem:[#allocation2 + $0x140] sm:$0xff]  ;;  %v1893_v42 = vmul.f32 %v3649_v39, %v1837_v58  ;;  %v3650_v41 = vld [vmem:[#allocation2 + $0x150] sm:$0xff] }
 0x3a1   :  { %v1723_v53 = vadd.f32 %v1722_v6, %v1721_v12  ;;  %v5228_v62 = vpop.permute.xlu0 %2172  ;;  %v1890_v15 = vmul.f32 %v3648_v30, %v1837_v58  ;;  %v1892_v2 = vmul.f32 %v3650_v41, %v1837_v58  ;;  %v3653_v6 = vld [vmem:[#allocation2 + $0x178] sm:$0xff]  ;;  %v3661_v41 = vld [vmem:[#allocation2 + $0x350] sm:$0xff] }
 0x3a2   :  { %v1686_v34 = vrot.slane %v1685_v3, 1  ;;  %v1705_v36 = vrot.slane %v1704_v35, 2 }
 0x3a3   :  { %v1724_v18 = vrot.slane %v1723_v53, 4  ;;  %v2177_v55 = vpop.permute.xlu1 %2176 }
 0x3a4   :  { %v1687_v54 = vadd.f32 %v1686_v34, %v1685_v3  ;;  %v1706_v10 = vadd.f32 %v1705_v36, %v1704_v35  ;;  %v3652_v3 = vld [vmem:[#allocation2 + $0x160] sm:$0xff]  ;;  %v5255_v36 = vsel %vm669_vm4, %v1891_v57, 0.0 }
 0x3a5   :  { %v1725_v24 = vadd.f32 %v1724_v18, %v1723_v53  ;;  %v5230_v21 = vpop.permute.xlu0 %2180  ;;  %v1894_v35 = vmul.f32 %v3652_v3, %v1837_v58  ;;  %v1897_v53 = vmul.f32 %v3653_v6, %v1837_v58  ;;  %v5258_v18 = vsel %vm669_vm4, %v1890_v15, 0.0  ;;  %v3659_v57 = vld [vmem:[#allocation2 + $0x340] sm:$0xff]  ;;  %v3660_v15 = vld [vmem:[#allocation2 + $0x2f8] sm:$0xff] }
 0x3a6   :  { %v1707_v13 = vrot.slane %v1706_v10, 1  ;;  %v1747_v7 = vsel %vm1746_vm9, %v1687_v54, %v1745_v51  ;;  %v1895_v51 = vmul.f32 %v3651_v48, %v1837_v58  ;;  %v5261_v54 = vsel %vm669_vm4, %v1893_v42, 0.0  ;;  %v3662_v48 = vld [vmem:[#allocation2 + $0x360] sm:$0xff] }
 0x3a7   :  { %v1726_v9 = vrot.slane %v1725_v24, 2  ;;  %v2185_v32 = vpop.permute.xlu1 %2184  ;;  %v2321_v39 = vmul.f32 %v3660_v15, %v2161_v25  ;;  %v3670_v15 = vld [vmem:[#allocation2 + $0x320] sm:$0xff] }
 0x3a8   :  { %v1708_v19 = vadd.f32 %v1707_v13, %v1706_v10  ;;  %v3654_v10 = vld [vmem:[#allocation2 + $0x170] sm:$0xff]  ;;  %v3655_v13 = vld [vmem:[#allocation2 + $0x308] sm:$0xff]  ;;  %v5267_v42 = vsel %vm669_vm4, %v1895_v51, 0.0 }
 0x3a9   :  { %v1727_v63 = vadd.f32 %v1726_v9, %v1725_v24  ;;  %v5232_v5 = vpop.permute.xlu0 %2188  ;;  %v1896_v24 = vmul.f32 %v3654_v10, %v1837_v58  ;;  %v3656_v9 = vld [vmem:[#allocation2 + $0x318] sm:$0xff] }
 0x3aa   :  { %v1749_v28 = vsel %vm1748_vm10, %v1708_v19, %v1747_v7  ;;  %v2323_v7 = vmul.f32 %v3655_v13, %v2169_v45  ;;  %v2325_v19 = vmul.f32 %v3656_v9, %v2177_v55  ;;  %v5270_v55 = vsel %vm669_vm4, %v1894_v35, 0.0  ;;  %v3666_v10 = vld [vmem:[#allocation2 + $0x398] sm:$0xff]  ;;  %v3667_v9 = vld [vmem:[#allocation2 + $0x3a8] sm:$0xff] }
 0x3ab   :  { %v1728_v31 = vrot.slane %v1727_v63, 1  ;;  %v2193_v8 = vpop.permute.xlu1 %2192  ;;  %v5277_v51 = vsel %vm669_vm4, %v1896_v24, 0.0 }
 0x3ad   :  { %v1729_v56 = vadd.f32 %v1728_v31, %v1727_v63  ;;  %v5236_v17 = vpop.permute.xlu0 %1838  ;;  %v3657_v63 = vld [vmem:[#allocation2 + $0x328] sm:$0xff]  ;;  %v5264_v31 = vsel %vm669_vm4, %v1892_v2, 0.0  ;;  %v3663_v2 = vld [vmem:[#allocation2 + $0x370] sm:$0xff] }
 0x3af   :  { %v5224_v0 = vsel %vm1750_vm11, %v1729_v56, %v1749_v28  ;;  %v2197_v29 = vpop.permute.xlu1 %2196  ;;  %v2327_v28 = vmul.f32 %v3657_v63, %v2185_v32  ;;  %v3658_v56 = vld [vmem:[#allocation2 + $0x338] sm:$0xff]  ;;  %v5273_v32 = vsel %vm669_vm4, %v1897_v53, 0.0 }
 0x3b0   :  { %v2329_v4 = vmul.f32 %v3658_v56, %v2193_v8  ;;  %v2330_v30 = vmul.f32 %v3659_v57, %v2197_v29  ;;  %v3664_v8 = vld [vmem:[#allocation2 + $0x388] sm:$0xff]  ;;  %v3665_v29 = vld [vmem:[#allocation2 + $0x300] sm:$0xff] }
 0x3b1   :  { %v5238_v60 = vpop.permute.xlu0 %2200  ;;  %v2322_v25 = vmul.f32 %v3665_v29, %v5226_v59  ;;  %v2436_v35 = vsel %vm669_vm4, %v2327_v28, 0.0  ;;  %v2464_v59 = vsel %vm669_vm4, %v2321_v39, 0.0  ;;  %v3669_v28 = vld [vmem:[#allocation2 + $0x310] sm:$0xff]  ;;  %v2326_v39 = vmul.f32 %v3670_v15, %v5230_v21  ;;  %v3679_v15 = vld [vmem:[#allocation2 + $0x378] sm:$0xff] }
 0x3b2   :  { %v2324_v57 = vmul.f32 %v3669_v28, %v5228_v62 }
 0x3b3   :  { %v2205_v61 = vpop.permute.xlu1 %2204 }
 0x3b4   :  { %v2332_v58 = vmul.f32 %v3661_v41, %v2205_v61  ;;  %v2376_v61 = vsel %vm669_vm4, %v2323_v7, 0.0 }
 0x3b5   :  { %v5240_v27 = vpop.permute.xlu0 %2208  ;;  %v2377_v62 = vadd.f32 %v2376_v61, %v5064_v33  ;;  %v2391_v33 = vsel %vm669_vm4, %v2324_v57, 0.0 }
 0x3b6   :  { %v5288_v56 = vsel %vm669_vm4, %v2332_v58, 0.0  ;;  %v2465_v58 = vadd.f32 %v2464_v59, %v4880_v11  ;;  %v3677_v59 = vld [vmem:[#allocation2 + $0x3e8] sm:$0xff]  ;;  %v2392_v57 = vadd.f32 %v2391_v33, %v4892_v44  ;;  %v3684_v33 = vld [vmem:[#allocation2 + $0x118] sm:$0xff] }
 0x3b7   :  { %v2213_v23 = vpop.permute.xlu1 %2212  ;;  %v3681_v44 = vld [vmem:[#allocation2 + $0x188] sm:$0xff] }
 0x3b8   :  { %v2334_v45 = vmul.f32 %v3662_v48, %v2213_v23  ;;  %v2406_v23 = vsel %vm669_vm4, %v2325_v19, 0.0  ;;  %v3668_v19 = vld [vmem:[#allocation2 + $0x3b8] sm:$0xff] }
 0x3b9   :  { %v5242_v1 = vpop.permute.xlu0 %2216 }
 0x3ba   :  { %v5291_v7 = vsel %vm669_vm4, %v2334_v45, 0.0 }
 0x3bb   :  { %v2221_v16 = vpop.permute.xlu1 %2220 }
 0x3bc   :  { %v2336_v3 = vmul.f32 %v3663_v2, %v2221_v16  ;;  %v2466_v16 = vsel %vm669_vm4, %v2329_v4, 0.0  ;;  %v3672_v2 = vld [vmem:[#allocation2 + $0x348] sm:$0xff] }
 0x3bd   :  { %v5246_v37 = vpop.permute.xlu0 %2224  ;;  %v2467_v28 = vadd.f32 %v2466_v16, %v2465_v58  ;;  %v1899_v58 = vmul.f32 %v3681_v44, %v5236_v17  ;;  %v3690_v44 = vld [vmem:[#allocation2 + $0x198] sm:$0xff] }
 0x3be   :  { %v5296_v4 = vsel %vm669_vm4, %v2336_v3, 0.0  ;;  %v2331_v3 = vmul.f32 %v3672_v2, %v5238_v60 }
 0x3bf   :  { %v5234_v46 = vpop.permute.xlu1 %1840 }
 0x3c1   :  { %v5250_v12 = vpop.permute.xlu0 %2228 }
 0x3c3   :  { %v2233_v49 = vpop.permute.xlu1 %2232 }
 0x3c4   :  { %v2339_v6 = vmul.f32 %v3664_v8, %v2233_v49  ;;  %v2363_v49 = vsel %vm669_vm4, %v2330_v30, 0.0  ;;  %v2361_v30 = vsel %vm669_vm4, %v2322_v25, 0.0  ;;  %v2407_v8 = vadd.f32 %v2406_v23, %v5080_v14  ;;  %v3674_v25 = vld [vmem:[#allocation2 + $0x3d8] sm:$0xff] }
 0x3c5   :  { %v5282_v53 = vpop.permute.xlu0 %2236  ;;  %v2362_v11 = vadd.f32 %v2361_v30, %v4886_v26  ;;  %v3676_v23 = vld [vmem:[#allocation2 + $0x358] sm:$0xff]  ;;  %v2378_v30 = vsel %vm669_vm4, %v2331_v3, 0.0 }
 0x3c6   :  { %v2379_v2 = vadd.f32 %v2378_v30, %v2377_v62  ;;  %v3686_v30 = vld [vmem:[#allocation2 + $0x390] sm:$0xff] }
 0x3c7   :  { %v2241_v47 = vpop.permute.xlu1 %2240 }
 0x3c8   :  { %v2341_v13 = vmul.f32 %v3666_v10, %v2241_v47  ;;  %v2421_v10 = vsel %vm669_vm4, %v2326_v39, 0.0  ;;  %v3680_v39 = vld [vmem:[#allocation2 + $0x3f8] sm:$0xff] }
 0x3c9   :  { %v5321_v61 = vpop.permute.xlu0 %2244 }
 0x3ca   :  { %v5304_v41 = vsel %vm669_vm4, %v2341_v13, 0.0  ;;  %v3675_v13 = vld [vmem:[#allocation2 + $0x330] sm:$0xff] }
 0x3cb   :  { %v2249_v20 = vpop.permute.xlu1 %2248  ;;  %v2328_v14 = vmul.f32 %v3675_v13, %v5232_v5  ;;  %v2337_v5 = vmul.f32 %v3679_v15, %v5246_v37 }
 0x3cc   :  { %v2343_v63 = vmul.f32 %v3667_v9, %v2249_v20  ;;  %v5299_v20 = vsel %vm669_vm4, %v2339_v6, 0.0  ;;  %v3673_v6 = vld [vmem:[#allocation2 + $0x108] sm:$0xff]  ;;  %v2333_v9 = vmul.f32 %v3676_v23, %v5240_v27 }
 0x3cd   :  { %v1883_v21 = vmul.f32 %v3673_v6, %v5022_v50  ;;  %v3683_v6 = vld [vmem:[#allocation2 + $0x380] sm:$0xff]  ;;  %v3685_v23 = vld [vmem:[#allocation2 + $0x1c8] sm:$0xff] }
 0x3ce   :  { %v5310_v45 = vsel %vm669_vm4, %v2343_v63, 0.0  ;;  %v2437_v63 = vadd.f32 %v2436_v35, %v5095_v52  ;;  %v2422_v35 = vadd.f32 %v2421_v10, %v4898_v22  ;;  %v2408_v16 = vsel %vm669_vm4, %v2333_v9, 0.0  ;;  %v5345_v22 = vpop.permute.xlu0 %2252 }
 0x3cf   :  { %v5244_v40 = vpop.permute.xlu1 %2256  ;;  %v1936_v27 = vsel %vm669_vm4, %v1883_v21, 0.0  ;;  %v2338_v21 = vmul.f32 %v3683_v6, %v5250_v12  ;;  %v1885_v10 = vmul.f32 %v3684_v33, %v5022_v50  ;;  %v2409_v12 = vadd.f32 %v2408_v16, %v2407_v8  ;;  %v6079_v6 = vld [vmem:[#allocation27_spill] sm:$0xff] }
 0x3d0   :  { %v2345_v47 = vmul.f32 %v3668_v19, %v5244_v40  ;;  %v3671_v40 = vld [vmem:[#allocation2 + $0x3c8] sm:$0xff]  ;;  %v1907_v9 = vmul.f32 %v3685_v23, %v5234_v46  ;;  %v2340_v8 = vmul.f32 %v3686_v30, %v5282_v53  ;;  %v3694_v23 = vld [vmem:[#allocation2 + $0x190] sm:$0xff] }
 0x3d1   :  { %v3678_v19 = vld [vmem:[#allocation2 + $0x368] sm:$0xff]  ;;  %v1966_v15 = vsel %vm669_vm4, %v1885_v10, 0.0 }
 0x3d2   :  { %v5316_v29 = vsel %vm669_vm4, %v2345_v47, 0.0  ;;  %v2335_v47 = vmul.f32 %v3678_v19, %v5242_v1  ;;  %v2451_v1 = vsel %vm669_vm4, %v2328_v14, 0.0  ;;  %v5361_v14 = vadd.f32 %v5291_v7, %v2422_v35  ;;  %v3687_v7 = vld [vmem:[#allocation2 + $0x180] sm:$0xff]  ;;  %v6080_v30 = vld [vmem:[#allocation18_spill] sm:$0xff] }
 0x3d3   :  { %v5248_v38 = vpop.permute.xlu1 %2264  ;;  %v2411_v35 = vadd.f32 %v5304_v41, %v2409_v12  ;;  %v1942_v53 = vsel %vm669_vm4, %v1907_v9, 0.0  ;;  %v1900_v9 = vmul.f32 %v3694_v23, %v5236_v17 }
 0x3d4   :  { %v2347_v48 = vmul.f32 %v3671_v40, %v5248_v38  ;;  %v2364_v40 = vadd.f32 %v2363_v49, %v2362_v11  ;;  %v2438_v3 = vsel %vm669_vm4, %v2335_v47, 0.0  ;;  %v1937_v49 = vadd.f32 %v1936_v27, %v4794_v43 }
 0x3d5   :  { %v2439_v43 = vadd.f32 %v2438_v3, %v2437_v63  ;;  %v2365_v47 = vsel %vm669_vm4, %v2338_v21, 0.0  ;;  %v1898_v63 = vmul.f32 %v3687_v7, %v5236_v17  ;;  %v1967_v21 = vadd.f32 %v1966_v15, %v6079_v6  ;;  %v3702_v6 = vld [vmem:[#allocation2 + $0x3c0] sm:$0xff] }
 0x3d6   :  { %v5328_v26 = vsel %vm669_vm4, %v2347_v48, 0.0  ;;  %v3682_v48 = vld [vmem:[#allocation2 + $0x100] sm:$0xff] }
 0x3d7   :  { %v5252_v34 = vpop.permute.xlu1 %2272  ;;  %v1882_v37 = vmul.f32 %v3682_v48, %v5022_v50  ;;  %v5377_v16 = vadd.f32 %v5310_v45, %v2439_v43  ;;  %v3691_v48 = vld [vmem:[#allocation2 + $0x128] sm:$0xff]  ;;  %v2395_v45 = vsel %vm669_vm4, %v2340_v8, 0.0 }
 0x3d8   :  { %v2349_v38 = vmul.f32 %v3674_v25, %v5252_v34  ;;  %v2468_v25 = vsel %vm669_vm4, %v2337_v5, 0.0  ;;  %v3688_v5 = vld [vmem:[#allocation2 + $0x110] sm:$0xff] }
 0x3d9   :  { %v2469_v19 = vadd.f32 %v2468_v25, %v2467_v28  ;;  %v1884_v27 = vmul.f32 %v3688_v5, %v5022_v50  ;;  %v3689_v28 = vld [vmem:[#allocation2 + $0x1c0] sm:$0xff]  ;;  %v3692_v25 = vld [vmem:[#allocation2 + $0x1d8] sm:$0xff]  ;;  %v3697_v5 = vld [vmem:[#allocation2 + $0x1a8] sm:$0xff] }
 0x3da   :  { %v5336_v52 = vsel %vm669_vm4, %v2349_v38, 0.0  ;;  %v2394_v38 = vadd.f32 %v5288_v56, %v2392_v57  ;;  %v1921_v56 = vsel %vm669_vm4, %v1882_v37, 0.0  ;;  %v1939_v57 = vadd.f32 %v5255_v36, %v1937_v49 }
 0x3db   :  { %v2281_v24 = vpop.permute.xlu1 %2280  ;;  %v1887_v37 = vmul.f32 %v3691_v48, %v5022_v50  ;;  %v5383_v41 = vadd.f32 %v5316_v29, %v2469_v19  ;;  %v1925_v49 = vsel %vm669_vm4, %v1898_v63, 0.0  ;;  %v1909_v33 = vmul.f32 %v3692_v25, %v5234_v46  ;;  %v3696_v63 = vld [vmem:[#allocation2 + $0x1d0] sm:$0xff] }
 0x3dc   :  { %v2351_v34 = vmul.f32 %v3677_v59, %v2281_v24  ;;  %v1940_v59 = vsel %vm669_vm4, %v1899_v58, 0.0  ;;  %v1901_v58 = vmul.f32 %v3690_v44, %v5236_v17  ;;  %v1951_v10 = vsel %vm669_vm4, %v1884_v27, 0.0  ;;  %v3700_v44 = vld [vmem:[#allocation2 + $0x130] sm:$0xff] }
 0x3dd   :  { %v5402_v19 = vadd.f32 %v2395_v45, %v2394_v38  ;;  %v1972_v8 = vsel %vm669_vm4, %v1909_v33, 0.0  ;;  %v5408_v7 = vadd.f32 %v5336_v52, %v2411_v35  ;;  %v1908_v15 = vmul.f32 %v3696_v63, %v5234_v46  ;;  %v3701_v48 = vld [vmem:[#allocation2 + $0x3b0] sm:$0xff] }
 0x3de   :  { %v5349_v11 = vsel %vm669_vm4, %v2351_v34, 0.0  ;;  %v2381_v34 = vadd.f32 %v5299_v20, %v2379_v2  ;;  %v1941_v20 = vadd.f32 %v1940_v59, %v1939_v57  ;;  %v5385_v2 = vadd.f32 %v2365_v47, %v2364_v40 }
 0x3df   :  { %v2289_v60 = vpop.permute.xlu1 %2288  ;;  %v1970_v43 = vsel %vm669_vm4, %v1901_v58, 0.0  ;;  %v1996_v59 = vsel %vm669_vm4, %v1887_v37, 0.0  ;;  %v1903_v27 = vmul.f32 %v3697_v5, %v5236_v17  ;;  %v1888_v58 = vmul.f32 %v3700_v44, %v5022_v50 }
 0x3e0   :  { %v2353_v24 = vmul.f32 %v3680_v39, %v2289_v60  ;;  %v6077_v60 = vld [vmem:[#allocation8_spill] sm:$0xff]  ;;  %v2261_v39 = vpop.permute.xlu0 %2260  ;;  %v5388_v3 = vadd.f32 %v5328_v26, %v2381_v34  ;;  %v1943_v12 = vadd.f32 %v1942_v53, %v1941_v20  ;;  %v3699_v53 = vld [vmem:[#allocation2 + $0x1e8] sm:$0xff]  ;;  %v5422_v37 = vmul.f32 %v3701_v48, %v5345_v22 }
 0x3e1   :  { %v5358_v13 = vadd.f32 %v2451_v1, %v6077_v60  ;;  %v6078_v1 = vld [vmem:[#allocation25_spill] sm:$0xff]  ;;  %v1911_v52 = vmul.f32 %v3699_v53, %v5234_v46 }
 0x3e2   :  { %v5355_v62 = vsel %vm669_vm4, %v2353_v24, 0.0  ;;  %v1906_v24 = vmul.f32 %v3689_v28, %v5234_v46  ;;  %v1922_v36 = vadd.f32 %v1921_v56, %v6078_v1  ;;  %v3693_v60 = vld [vmem:[#allocation2 + $0x3a0] sm:$0xff] }
 0x3e3   :  { %v2342_v29 = vmul.f32 %v3693_v60, %v5321_v61  ;;  %v3695_v56 = vld [vmem:[#allocation2 + $0x120] sm:$0xff]  ;;  %v1969_v61 = vadd.f32 %v5261_v54, %v1967_v21  ;;  %v3698_v54 = vld [vmem:[#allocation2 + $0x138] sm:$0xff]  ;;  %v2346_v21 = vmul.f32 %v3702_v6, %v2261_v39  ;;  %v2000_v60 = vsel %vm669_vm4, %v1903_v27, 0.0  ;;  %v6083_v39 = vld [vmem:[#allocation30_spill] sm:$0xff] }
 0x3e4   :  { %v1924_v40 = vadd.f32 %v5258_v18, %v1922_v36  ;;  %v1927_v26 = vsel %vm669_vm4, %v1906_v24, 0.0  ;;  %v1886_v34 = vmul.f32 %v3695_v56, %v5022_v50  ;;  %v2269_v47 = vpop.permute.xlu0 %2268  ;;  %v1952_v18 = vadd.f32 %v1951_v10, %v6080_v30  ;;  %v6081_v28 = vld [vmem:[#allocation9_spill] sm:$0xff] }
 0x3e5   :  { %v5413_v38 = vsel %vm669_vm4, %v2342_v29, 0.0  ;;  %v1971_v20 = vadd.f32 %v1970_v43, %v1969_v61  ;;  %v1997_v24 = vadd.f32 %v1996_v59, %v6081_v28  ;;  %v1889_v1 = vmul.f32 %v3698_v54, %v5022_v50  ;;  %v3703_v29 = vld [vmem:[#allocation2 + $0x1a0] sm:$0xff]  ;;  %v6084_v28 = vld [vmem:[#allocation10_spill] sm:$0xff] }
 0x3e6   :  { %v1926_v57 = vadd.f32 %v1925_v49, %v1924_v40  ;;  %v1955_v36 = vsel %vm669_vm4, %v1900_v9, 0.0  ;;  %v1981_v35 = vsel %vm669_vm4, %v1886_v34, 0.0  ;;  %v1954_v25 = vadd.f32 %v5264_v31, %v1952_v18  ;;  %v3704_v31 = vld [vmem:[#allocation2 + $0x3d0] sm:$0xff]  ;;  %v3705_v18 = vld [vmem:[#allocation2 + $0x1e0] sm:$0xff] }
 0x3e7   :  { %v1957_v10 = vsel %vm669_vm4, %v1908_v15, 0.0  ;;  %v1902_v50 = vmul.f32 %v3703_v29, %v5236_v17  ;;  %v1999_v23 = vadd.f32 %v5267_v42, %v1997_v24  ;;  %v1982_v9 = vadd.f32 %v1981_v35, %v6083_v39  ;;  %v3706_v15 = vld [vmem:[#allocation2 + $0x1b8] sm:$0xff]  ;;  %v3708_v24 = vld [vmem:[#allocation2 + $0x3e0] sm:$0xff]  ;;  %v3711_v39 = vld [vmem:[#allocation2 + $0x3f0] sm:$0xff] }
 0x3e8   :  { %v1928_v49 = vadd.f32 %v1927_v26, %v1926_v57  ;;  %v2277_v40 = vpop.permute.xlu0 %2276  ;;  %v1956_v22 = vadd.f32 %v1955_v36, %v1954_v25  ;;  %v2026_v26 = vsel %vm669_vm4, %v1889_v1, 0.0  ;;  %v2348_v59 = vmul.f32 %v3704_v31, %v2269_v47  ;;  %v3709_v25 = vld [vmem:[#allocation2 + $0x1f8] sm:$0xff] }
 0x3e9   :  { %v2002_v56 = vsel %vm669_vm4, %v1911_v52, 0.0  ;;  %v2011_v34 = vsel %vm669_vm4, %v1888_v58, 0.0  ;;  %v2367_v57 = vsel %vm669_vm4, %v2346_v21, 0.0  ;;  %v2001_v30 = vadd.f32 %v2000_v60, %v1999_v23  ;;  %v6085_v52 = vld [vmem:[#allocation11_spill] sm:$0xff] }
 0x3ea   :  { %v1910_v63 = vmul.f32 %v3705_v18, %v5234_v46  ;;  %v1905_v42 = vmul.f32 %v3706_v15, %v5236_v17  ;;  %v1985_v27 = vsel %vm669_vm4, %v1902_v50, 0.0  ;;  %v2027_v47 = vadd.f32 %v2026_v26, %v6084_v28 }
 0x3eb   :  { %v2350_v54 = vmul.f32 %v3708_v24, %v2277_v40  ;;  %v1958_v36 = vadd.f32 %v1957_v10, %v1956_v22  ;;  %v1984_v53 = vadd.f32 %v5270_v55, %v1982_v9  ;;  %v2012_v35 = vadd.f32 %v2011_v34, %v6085_v52 }
 0x3ec   :  { %v2368_v44 = vadd.f32 %v2367_v57, %v5385_v2  ;;  %v2397_v58 = vsel %vm669_vm4, %v2348_v59, 0.0  ;;  %v2285_v6 = vpop.permute.xlu0 %2284  ;;  %v1913_v60 = vmul.f32 %v3709_v25, %v5234_v46  ;;  %v2030_v10 = vsel %vm669_vm4, %v1905_v42, 0.0 }
 0x3ed   :  { %v2029_v2 = vadd.f32 %v5273_v32, %v2027_v47  ;;  %v2014_v23 = vadd.f32 %v5277_v51, %v2012_v35  ;;  %v2352_v9 = vmul.f32 %v3711_v39, %v2285_v6  ;;  %v2426_v32 = vadd.f32 %v5413_v38, %v5361_v14 }
 0x3ee   :  { %v2443_v51 = vadd.f32 %v5349_v11, %v5377_v16  ;;  %v2032_v14 = vsel %vm669_vm4, %v1913_v60, 0.0  ;;  %v2473_v11 = vadd.f32 %v5355_v62, %v5383_v41 }
 0x3ef   :  { %v2031_v59 = vadd.f32 %v2030_v10, %v2029_v2 }
 0x3f1   :  { %v2033_v42 = vadd.f32 %v2032_v14, %v2031_v59 }
 0x425   :  { %v1822_v45 = vpop.f32.mrf.mxu0 }
 0x426   :  { %v5426_v33 = vadd.f32 %v1822_v45, %v5224_v0  ;;  %v1973_v0 = vadd.f32 %v1972_v8, %v1971_v20  ;;  %v3707_v8 = vld [vmem:[#allocation2 + $0x1b0] sm:$0xff]  ;;  %v2003_v45 = vadd.f32 %v2002_v56, %v2001_v30  ;;  %v1987_v56 = vsel %vm669_vm4, %v1910_v63, 0.0 }
 0x427   :  { %v3508_v43 = vpop.f32.mrf.mxu0  ;;  %v1904_v20 = vmul.f32 %v3707_v8, %v5236_v17  ;;  %v1986_v17 = vadd.f32 %v1985_v27, %v1984_v53 }
 0x428   :  { %6082 = vst [vmem:[#allocation40_spill] sm:$0xff] %v5426_v33  ;;  %v3710_v43 = vld [vmem:[#allocation2 + $0x1f0] sm:$0xff] }
 0x429   :  { %v3513_v61 = vpop.f32.mrf.mxu0  ;;  %v2015_v50 = vsel %vm669_vm4, %v1904_v20, 0.0  ;;  %v1912_v22 = vmul.f32 %v3710_v43, %v5234_v46 }
 0x42a   :  { %v2609_v5 = vadd.f32 %v3513_v61, %v1943_v12  ;;  %v2016_v34 = vadd.f32 %v2015_v50, %v2014_v23  ;;  %v1988_v61 = vadd.f32 %v1987_v56, %v1986_v17 }
 0x42b   :  { %v2603_v1 = vpop.f32.mrf.mxu0  ;;  %v2017_v38 = vsel %vm669_vm4, %v1912_v22, 0.0 }
 0x42c   :  { %v5447_v12 = vadd.f32 %v2609_v5, %v5388_v3  ;;  %v2604_v48 = vadd.f32 %v2603_v1, %v1928_v49  ;;  %v2398_v3 = vadd.f32 %v2397_v58, %v5402_v19  ;;  %v2427_v49 = vsel %vm669_vm4, %v2350_v54, 0.0 }
 0x42d   :  { %v3516_v21 = vpop.f32.mrf.mxu0  ;;  %v2455_v19 = vsel %vm669_vm4, %v5422_v37, 0.0  ;;  %v2428_v30 = vadd.f32 %v2427_v49, %v2426_v32  ;;  %v2457_v37 = vsel %vm669_vm4, %v2352_v9, 0.0  ;;  %v2018_v27 = vadd.f32 %v2017_v38, %v2016_v34 }
 0x42e   :  { %v5451_v55 = vadd.f32 %v2604_v48, %v2368_v44  ;;  %v2619_v29 = vadd.f32 %v3516_v21, %v1973_v0 }
 0x42f   :  { %v2613_v40 = vpop.f32.mrf.mxu0 }
 0x430   :  { %v5460_v26 = vadd.f32 %v2619_v29, %v5408_v7  ;;  %v2614_v31 = vadd.f32 %v2613_v40, %v1958_v36  ;;  %v2454_v7 = vadd.f32 %v5296_v4, %v5358_v13  ;;  %v2651_v4 = vsel %vm669_vm4, %v5447_v12, -inf }
 0x431   :  { %v3519_v0 = vpop.f32.mrf.mxu0  ;;  %v2650_v54 = vsel %vm669_vm4, %v5451_v55, -inf }
 0x432   :  { %v2644_v46 = vadd.f32 %v2614_v31, %v2398_v3  ;;  %v2629_v57 = vadd.f32 %v3519_v0, %v2003_v45  ;;  %v2456_v5 = vadd.f32 %v2455_v19, %v2454_v7  ;;  %v2653_v41 = vsel %vm669_vm4, %v5460_v26, -inf }
 0x433   :  { %v2623_v18 = vpop.f32.mrf.mxu0 }
 0x434   :  { %v2647_v15 = vadd.f32 %v2629_v57, %v2443_v51  ;;  %v2624_v63 = vadd.f32 %v2623_v18, %v1988_v61  ;;  %v2458_v8 = vadd.f32 %v2457_v37, %v2456_v5  ;;  %v2652_v48 = vsel %vm669_vm4, %v2644_v46, -inf }
 0x435   :  { %v3522_v16 = vpop.f32.mrf.mxu0 }
 0x436   :  { %v2656_v13 = vsel %vm669_vm4, %v2647_v15, -inf  ;;  %v2646_v28 = vadd.f32 %v2624_v63, %v2428_v30  ;;  %v2639_v47 = vadd.f32 %v3522_v16, %v2033_v42 }
 0x437   :  { %v2657_v20 = vmax.f32 %v2651_v4, %v2656_v13  ;;  %v2633_v24 = vpop.f32.mrf.mxu0 }
 0x438   :  { %v2654_v1 = vsel %vm669_vm4, %v2646_v28, -inf  ;;  %v2649_v36 = vadd.f32 %v2639_v47, %v2473_v11  ;;  %v2634_v53 = vadd.f32 %v2633_v24, %v2018_v27 }
 0x439   :  { %v2655_v62 = vmax.f32 %v2650_v54, %v2654_v1 }
 0x43a   :  { %v2660_v52 = vsel %vm669_vm4, %v2649_v36, -inf  ;;  %v2648_v35 = vadd.f32 %v2634_v53, %v2458_v8 }
 0x43b   :  { %v2662_v44 = vmax.f32 %v2655_v62, %v2657_v20  ;;  %v2661_v58 = vmax.f32 %v2653_v41, %v2660_v52 }
 0x43c   :  { %v2658_v6 = vsel %vm669_vm4, %v2648_v35, -inf }
 0x43d   :  { %v2659_v21 = vmax.f32 %v2652_v48, %v2658_v6 }
 0x43f   :  { %v2663_v45 = vmax.f32 %v2659_v21, %v2661_v58  ;;  %v6087_v21 = vmov 0.0  }
 0x441   :  { %v2664_v17 = vmax.f32 %v2662_v44, %v2663_v45  ;;  %v3712_v45 = vld [vmem:[#allocation2 + $0x420] sm:$0xff] }
 0x443   :  { %v2665_v25 = vrot.slane %v2664_v17, 4 }
 0x445   :  { %v2666_v60 = vmax.f32 %v2664_v17, %v2665_v25  ;;  %v3713_v25 = vld [vmem:[#allocation2 + $0x428] sm:$0xff] }
 0x447   :  { %v2667_v10 = vrot.slane %v2666_v60, 2 }
 0x449   :  { %v2668_v29 = vmax.f32 %v2666_v60, %v2667_v10  ;;  %v3714_v10 = vld [vmem:[#allocation2 + $0x400] sm:$0xff] }
 0x44b   :  { %v2669_v2 = vrot.slane %v2668_v29, 1 }
 0x44d   :  { %v2670_v50 = vmax.f32 %v2668_v29, %v2669_v2  ;;  %v3715_v2 = vld [vmem:[#allocation2 + $0x408] sm:$0xff] }
 0x44f   :  { %v2671_v3 = vsub.f32 %v5451_v55, %v2670_v50  ;;  %v2672_v49 = vsub.f32 %v5447_v12, %v2670_v50  ;;  %v2673_v40 = vsub.f32 %v2644_v46, %v2670_v50  ;;  %v2674_v43 = vsub.f32 %v5460_v26, %v2670_v50 }
 0x450   :  { %v2675_v22 = vsub.f32 %v2646_v28, %v2670_v50  ;;  %v2676_v23 = vsub.f32 %v2647_v15, %v2670_v50  ;;  %v2677_v39 = vsub.f32 %v2648_v35, %v2670_v50  ;;  %v2678_v9 = vsub.f32 %v2649_v36, %v2670_v50 }
 0x451   :  { %v2679_v31 = vmul.f32 1.442695, %v2671_v3  ;;  %v2681_v59 = vmul.f32 1.442695, %v2672_v49  ;;  %v2683_v32 = vmul.f32 1.442695, %v2673_v40 }
 0x452   :  { %v2685_v19 = vmul.f32 1.442695, %v2674_v43  ;;  %v2687_v0 = vmul.f32 1.442695, %v2675_v22  ;;  %v2689_v56 = vmul.f32 1.442695, %v2676_v23 }
 0x453   :  { %3596 = vpow2.f32 %v2679_v31  ;;  %v2691_v55 = vmul.f32 1.442695, %v2677_v39  ;;  %v2693_v12 = vmul.f32 1.442695, %v2678_v9  ;;  %v3716_v3 = vld [vmem:[#allocation2 + $0x430] sm:$0xff]  ;;  %v3717_v40 = vld [vmem:[#allocation2 + $0x438] sm:$0xff] }
 0x454   :  { %3598 = vpow2.f32 %v2681_v59  ;;  %v3718_v22 = vld [vmem:[#allocation2 + $0x410] sm:$0xff]  ;;  %v3719_v39 = vld [vmem:[#allocation2 + $0x418] sm:$0xff]  ;;  %v3720_v31 = vld [vmem:[#allocation2 + $0x440] sm:$0xff] }
 0x455   :  { %3600 = vpow2.f32 %v2683_v32  ;;  %v3721_v32 = vld [vmem:[#allocation2 + $0x448] sm:$0xff] }
 0x456   :  { %3602 = vpow2.f32 %v2685_v19 }
 0x457   :  { %3604 = vpow2.f32 %v2687_v0  ;;  %v3722_v0 = vld [vmem:[#allocation2 + $0x450] sm:$0xff] }
 0x458   :  { %3606 = vpow2.f32 %v2689_v56 }
 0x459   :  { %3608 = vpow2.f32 %v2691_v55  ;;  %v3723_v55 = vld [vmem:[#allocation2 + $0x458] sm:$0xff] }
 0x45a   :  { %3610 = vpow2.f32 %v2693_v12 }
 0x460   :  { %v3597_v26 = vpop.eup %3596 }
 0x461   :  { %v3599_v34 = vpop.eup %3598  ;;  %v2695_v46 = vsel %vm669_vm4, %v3597_v26, 0.0 }
 0x462   :  { %v3601_v51 = vpop.eup %3600  ;;  %v2696_v57 = vsel %vm669_vm4, %v3599_v34, 0.0 }
 0x463   :  { %v3603_v61 = vpop.eup %3602  ;;  %v2697_v7 = vadd.f32 %v2696_v57, %v2695_v46  ;;  %v2698_v30 = vsel %vm669_vm4, %v3601_v51, 0.0  ;;  %v3725_v46 = vld [vmem:[#allocation2 + $0x468] sm:$0xff]  ;;  %v3726_v57 = vld [vmem:[#allocation2 + $0x470] sm:$0xff] }
 0x464   :  { %v3605_v18 = vpop.eup %3604  ;;  %v2700_v38 = vsel %vm669_vm4, %v3603_v61, 0.0 }
 0x465   :  { %v2699_v14 = vadd.f32 %v2698_v30, %v2697_v7  ;;  %v3607_v37 = vpop.eup %3606  ;;  %v2702_v63 = vsel %vm669_vm4, %v3605_v18, 0.0  ;;  %v3727_v7 = vld [vmem:[#allocation2 + $0x478] sm:$0xff] }
 0x466   :  { %v3609_v42 = vpop.eup %3608  ;;  %v2704_v11 = vsel %vm669_vm4, %v3607_v37, 0.0 }
 0x467   :  { %v2701_v15 = vadd.f32 %v2700_v38, %v2699_v14  ;;  %v3611_v16 = vpop.eup %3610  ;;  %v2706_v4 = vsel %vm669_vm4, %v3609_v42, 0.0  ;;  %v3729_v38 = vld [vmem:[#allocation2 + $0x488] sm:$0xff] }
 0x468   :  { %v2708_v28 = vsel %vm669_vm4, %v3611_v16, 0.0 }
 0x469   :  { %v2703_v5 = vadd.f32 %v2702_v63, %v2701_v15  ;;  %v3730_v15 = vld [vmem:[#allocation2 + $0x490] sm:$0xff] }
 0x46b   :  { %v2705_v27 = vadd.f32 %v2704_v11, %v2703_v5  ;;  %v3732_v11 = vld [vmem:[#allocation2 + $0x4a0] sm:$0xff] }
 0x46d   :  { %v2707_v13 = vadd.f32 %v2706_v4, %v2705_v27  ;;  %v3733_v27 = vld [vmem:[#allocation2 + $0x4a8] sm:$0xff] }
 0x46f   :  { %v2709_v47 = vadd.f32 %v2708_v28, %v2707_v13  ;;  %v3734_v13 = vld [vmem:[#allocation2 + $0x4b0] sm:$0xff] }
 0x471   :  { %v2710_v8 = vrot.slane %v2709_v47, 4 }
 0x473   :  { %v2711_v20 = vadd.f32 %v2710_v8, %v2709_v47  ;;  %v3735_v47 = vld [vmem:[#allocation2 + $0x4b8] sm:$0xff] }
 0x475   :  { %v2712_v24 = vrot.slane %v2711_v20, 2 }
 0x477   :  { %v2713_v54 = vadd.f32 %v2712_v24, %v2711_v20  ;;  %v3736_v20 = vld [vmem:[#allocation2 + $0x4c0] sm:$0xff] }
 0x479   :  { %v2714_v1 = vrot.slane %v2713_v54, 1 }
 0x47b   :  { %v2715_v36 = vadd.f32 %v2714_v1, %v2713_v54  ;;  %v3737_v54 = vld [vmem:[#allocation2 + $0x4c8] sm:$0xff] }
 0x47d   :  { %3612 = vrcp.f32 %v2715_v36  ;;  %v3738_v36 = vld [vmem:[#allocation2 + $0x4d0] sm:$0xff] }
 0x48a   :  { %v3613_v53 = vpop.eup %3612 }
 0x48b   :  { %v5498_v62 = vmul.f32 %v3613_v53, %v3609_v42  ;;  %v5500_v41 = vmul.f32 %v3613_v53, %v3611_v16  ;;  %v5502_v52 = vmul.f32 %v3613_v53, %v3607_v37  ;;  %v5504_v35 = vmul.f32 %v3613_v53, %v3605_v18  ;;  %v3728_v18 = vld [vmem:[#allocation2 + $0x480] sm:$0xff]  ;;  %v3731_v42 = vld [vmem:[#allocation2 + $0x498] sm:$0xff] }
 0x48c   :  { %v5506_v44 = vmul.f32 %v3613_v53, %v3603_v61  ;;  %v5508_v58 = vmul.f32 %v3613_v53, %v3601_v51  ;;  %v5510_v48 = vmul.f32 %v3613_v53, %v3599_v34  ;;  %v5512_v6 = vmul.f32 %v3613_v53, %v3597_v26  ;;  %v3724_v26 = vld [vmem:[#allocation2 + $0x460] sm:$0xff] }
 0x48d   :  { %6086 = vst [vmem:[#allocation35_spill] sm:$0xff] %v5500_v41  ;;  %3524 = vmatpush3.msra.mxu1 %v5500_v41  ;;  %v5517_v17 = vmul.f32 %v3712_v45, %v5504_v35  ;;  %v5520_v60 = vmul.f32 %v3713_v25, %v5502_v52  ;;  %v5530_v49 = vmul.f32 %v3716_v3, %v5498_v62  ;;  %v3739_v45 = vld [vmem:[#allocation2 + $0x4d8] sm:$0xff]  ;;  %v3741_v3 = vld [vmem:[#allocation2 + $0x4e8] sm:$0xff] }
 0x48e   :  { %3525 = vmatprep.subr.mxu1 %v6087_v21  ;;  %v5524_v29 = vmul.f32 %v3714_v10, %v5512_v6  ;;  %v5527_v50 = vmul.f32 %v3715_v2, %v5510_v48  ;;  %v5533_v43 = vmul.f32 %v3717_v40, %v5500_v41  ;;  %v5537_v23 = vmul.f32 %v3718_v22, %v5508_v58  ;;  %v3740_v10 = vld [vmem:[#allocation2 + $0x4e0] sm:$0xff]  ;;  %v3742_v22 = vld [vmem:[#allocation2 + $0x4f0] sm:$0xff] }
 0x48f   :  { %3526 = vmatpush3.msra.mxu1 %v5498_v62  ;;  %v5540_v9 = vmul.f32 %v3719_v39, %v5506_v44  ;;  %v5543_v59 = vmul.f32 %v3720_v31, %v5512_v6  ;;  %v5546_v19 = vmul.f32 %v3721_v32, %v5510_v48  ;;  %v5550_v56 = vmul.f32 %v3722_v0, %v5508_v58  ;;  %v3743_v31 = vld [vmem:[#allocation2 + $0x4f8] sm:$0xff]  ;;  %v3744_v0 = vld [vmem:[#allocation2 + $0x500] sm:$0xff] }
 0x490   :  { %3527 = vmatprep.subr.mxu1 %v6087_v21  ;;  %v5553_v12 = vmul.f32 %v3723_v55, %v5506_v44  ;;  %v5556_v34 = vmul.f32 %v3724_v26, %v5504_v35  ;;  %v5559_v51 = vmul.f32 %v3725_v46, %v5502_v52  ;;  %v5563_v61 = vmul.f32 %v3726_v57, %v5498_v62  ;;  %v3745_v26 = vld [vmem:[#allocation2 + $0x508] sm:$0xff]  ;;  %v3746_v57 = vld [vmem:[#allocation2 + $0x510] sm:$0xff] }
 0x491   :  { %3528 = vmatpush3.msra.mxu1 %v5502_v52  ;;  %v5566_v30 = vmul.f32 %v3727_v7, %v5500_v41  ;;  %v5569_v14 = vmul.f32 %v3728_v18, %v5512_v6  ;;  %v5572_v37 = vmul.f32 %v3729_v38, %v5510_v48  ;;  %v5576_v63 = vmul.f32 %v3730_v15, %v5508_v58  ;;  %v3747_v18 = vld [vmem:[#allocation2 + $0x518] sm:$0xff]  ;;  %v3748_v15 = vld [vmem:[#allocation2 + $0x520] sm:$0xff] }
 0x492   :  { %3529 = vmatprep.subr.mxu1 %v6087_v21  ;;  %v5579_v5 = vmul.f32 %v3731_v42, %v5506_v44  ;;  %v5582_v16 = vmul.f32 %v3732_v11, %v5504_v35  ;;  %v5585_v4 = vmul.f32 %v3733_v27, %v5502_v52  ;;  %v5589_v28 = vmul.f32 %v3734_v13, %v5498_v62  ;;  %v3749_v11 = vld [vmem:[#allocation2 + $0x528] sm:$0xff]  ;;  %v3750_v13 = vld [vmem:[#allocation2 + $0x530] sm:$0xff] }
 0x493   :  { %3530 = vmatpush3.msra.mxu1 %v5504_v35  ;;  %v5592_v8 = vmul.f32 %v3735_v47, %v5500_v41  ;;  %v5595_v24 = vmul.f32 %v3736_v20, %v5512_v6  ;;  %v5598_v1 = vmul.f32 %v3737_v54, %v5510_v48  ;;  %v5602_v53 = vmul.f32 %v3738_v36, %v5508_v58  ;;  %v3751_v20 = vld [vmem:[#allocation2 + $0x538] sm:$0xff]  ;;  %v3752_v36 = vld [vmem:[#allocation2 + $0x540] sm:$0xff] }
 0x494   :  { %3531 = vmatprep.subr.mxu1 %v6087_v21  ;;  %v5605_v25 = vmul.f32 %v3739_v45, %v5506_v44  ;;  %v5608_v2 = vmul.f32 %v3740_v10, %v5504_v35  ;;  %v5611_v40 = vmul.f32 %v3741_v3, %v5502_v52  ;;  %v5615_v39 = vmul.f32 %v3742_v22, %v5498_v62  ;;  %v3753_v10 = vld [vmem:[#allocation2 + $0x548] sm:$0xff]  ;;  %v3754_v22 = vld [vmem:[#allocation2 + $0x550] sm:$0xff] }
 0x495   :  { %3532 = vmatpush3.msra.mxu1 %v5506_v44  ;;  %v5618_v32 = vmul.f32 %v3743_v31, %v5500_v41  ;;  %v5621_v55 = vmul.f32 %v3744_v0, %v5512_v6  ;;  %v5624_v46 = vmul.f32 %v3745_v26, %v5510_v48  ;;  %v5628_v7 = vmul.f32 %v3746_v57, %v5508_v58  ;;  %v3755_v0 = vld [vmem:[#allocation2 + $0x558] sm:$0xff]  ;;  %v3756_v57 = vld [vmem:[#allocation2 + $0x560] sm:$0xff] }
 0x496   :  { %3533 = vmatprep.subr.mxu1 %v6087_v21  ;;  %v5631_v38 = vmul.f32 %v3747_v18, %v5506_v44  ;;  %v5634_v42 = vmul.f32 %v3748_v15, %v5504_v35  ;;  %v5637_v27 = vmul.f32 %v3749_v11, %v5502_v52  ;;  %v5641_v47 = vmul.f32 %v3750_v13, %v5498_v62  ;;  %v3757_v15 = vld [vmem:[#allocation2 + $0x568] sm:$0xff]  ;;  %v3758_v13 = vld [vmem:[#allocation2 + $0x570] sm:$0xff] }
 0x497   :  { %3534 = vmatpush3.msra.mxu1 %v5508_v58  ;;  %v5644_v54 = vmul.f32 %v3751_v20, %v5500_v41  ;;  %v5647_v45 = vmul.f32 %v3752_v36, %v5512_v6  ;;  %v5650_v3 = vmul.f32 %v3753_v10, %v5510_v48  ;;  %v5654_v31 = vmul.f32 %v3754_v22, %v5508_v58  ;;  %v3759_v36 = vld [vmem:[#allocation2 + $0x578] sm:$0xff]  ;;  %v3760_v22 = vld [vmem:[#allocation2 + $0x580] sm:$0xff] }
 0x498   :  { %3535 = vmatprep.subr.mxu1 %v6087_v21  ;;  %v5657_v26 = vmul.f32 %v3755_v0, %v5506_v44  ;;  %v5660_v18 = vmul.f32 %v3756_v57, %v5504_v35  ;;  %v5663_v11 = vmul.f32 %v3757_v15, %v5502_v52  ;;  %v5667_v20 = vmul.f32 %v3758_v13, %v5498_v62  ;;  %v3761_v57 = vld [vmem:[#allocation2 + $0x588] sm:$0xff]  ;;  %v2958_v15 = vpop.permute.xlu0 %2957  ;;  %v3763_v13 = vld [vmem:[#allocation2 + $0x598] sm:$0xff] }
 0x499   :  { %3536 = vmatpush3.msra.mxu1 %v5510_v48  ;;  %v5670_v10 = vmul.f32 %v3759_v36, %v5500_v41  ;;  %v5673_v0 = vmul.f32 %v3760_v22, %v5512_v6  ;;  %v5676_v33 = vmul.f32 %v3761_v57, %v5510_v48  ;;  %v3764_v36 = vld [vmem:[#allocation2 + $0x5a0] sm:$0xff]  ;;  %v3765_v22 = vld [vmem:[#allocation2 + $0x5a8] sm:$0xff]  ;;  %v3766_v57 = vld [vmem:[#allocation2 + $0x5b0] sm:$0xff] }
 0x49a   :  { %6088 = vst [vmem:[#allocation16_spill] sm:$0xff] %v5660_v18  ;;  %6089 = vst [vmem:[#allocation34_spill] sm:$0xff] %v5663_v11  ;;  %3537 = vmatprep.subr.mxu1 %v6087_v21  ;;  %v3762_v11 = vld [vmem:[#allocation2 + $0x590] sm:$0xff] }
 0x49b   :  { %6090 = vst [vmem:[#allocation12_spill] sm:$0xff] %v5667_v20  ;;  %6091 = vst [vmem:[#allocation41_spill] sm:$0xff] %v5670_v10  ;;  %3538 = vmatpush3.msra.mxu1 %v5512_v6  ;;  %v5680_v18 = vmul.f32 %v3762_v11, %v5508_v58  ;;  %v5683_v20 = vmul.f32 %v3763_v13, %v5506_v44  ;;  %v5686_v10 = vmul.f32 %v3764_v36, %v5504_v35  ;;  %v3767_v11 = vld [vmem:[#allocation2 + $0x5b8] sm:$0xff]  ;;  %v3768_v13 = vld [vmem:[#allocation2 + $0x5c0] sm:$0xff] }
 0x49c   :  { %6092 = vst [vmem:[#allocation43_spill] sm:$0xff] %v5673_v0  ;;  %6093 = vst [vmem:[#allocation7_spill] sm:$0xff] %v5676_v33  ;;  %v5689_v0 = vmul.f32 %v3765_v22, %v5502_v52  ;;  %3540 = vmatmul.mubr.msk.f32.vlgmr.msra.gmra.mxu1 %vm669_vm4, %v2958_v15  ;;  %v5693_v33 = vmul.f32 %v3766_v57, %v5498_v62  ;;  %v3769_v36 = vld [vmem:[#allocation2 + $0x5c8] sm:$0xff]  ;;  %v3770_v22 = vld [vmem:[#allocation2 + $0x5d0] sm:$0xff]  ;;  %3542 = vmatprep.subr.mxu1 %v6087_v21 }
 0x49d   :  { %6094 = vst [vmem:[#allocation13_spill] sm:$0xff] %v5680_v18  ;;  %6095 = vst [vmem:[#allocation5_spill] sm:$0xff] %v5683_v20  ;;  %v5696_v18 = vmul.f32 %v3767_v11, %v5500_v41  ;;  %v5699_v20 = vmul.f32 %v3768_v13, %v5512_v6  ;;  %v3771_v15 = vld [vmem:[#allocation2 + $0x5d8] sm:$0xff]  ;;  %v2789_v11 = vsel %vm669_vm4, %v5524_v29, 0.0  ;;  %v2790_v41 = vsel %vm669_vm4, %v5527_v50, 0.0  ;;  %3546 = vmatprep.mubr.msk.f32.mxu1 %vm3806_vm0, %v6087_v21 }
 0x49e   :  { %6096 = vst [vmem:[#allocation38_spill] sm:$0xff] %v5686_v10  ;;  %6097 = vst [vmem:[#allocation19_spill] sm:$0xff] %v5689_v0  ;;  %v5702_v10 = vmul.f32 %v3769_v36, %v5510_v48  ;;  %v5705_v0 = vmul.f32 %v3770_v22, %v5508_v58  ;;  %v5708_v57 = vmul.f32 %v3771_v15, %v5506_v44  ;;  %v3772_v48 = vld [vmem:[#allocation2 + $0x5e0] sm:$0xff]  ;;  %v3773_v58 = vld [vmem:[#allocation2 + $0x5e8] sm:$0xff]  ;;  %v2792_v29 = vsel %vm669_vm4, %v5537_v23, 0.0 }
 0x49f   :  { %v5718_v6 = vmul.f32 %v3772_v48, %v5504_v35  ;;  %v5721_v13 = vmul.f32 %v3773_v58, %v5502_v52  ;;  %v2791_v44 = vadd.f32 %v2790_v41, %v2789_v11  ;;  %v2794_v50 = vsel %vm669_vm4, %v5540_v9, 0.0 }
 0x4a0   :  { %v2796_v36 = vsel %vm669_vm4, %v5517_v17, 0.0  ;;  %v2810_v22 = vsel %vm669_vm4, %v5543_v59, 0.0  ;;  %v2811_v35 = vsel %vm669_vm4, %v5546_v19, 0.0  ;;  %v2798_v52 = vsel %vm669_vm4, %v5520_v60, 0.0 }
 0x4a1   :  { %v2793_v15 = vadd.f32 %v2792_v29, %v2791_v44  ;;  %v2800_v41 = vsel %vm669_vm4, %v5530_v49, 0.0  ;;  %v2812_v23 = vadd.f32 %v2811_v35, %v2810_v22  ;;  %v2802_v9 = vsel %vm669_vm4, %v5533_v43, 0.0 }
 0x4a2   :  { %v2813_v17 = vsel %vm669_vm4, %v5550_v56, 0.0  ;;  %v2815_v59 = vsel %vm669_vm4, %v5553_v12, 0.0  ;;  %v2831_v19 = vsel %vm669_vm4, %v5569_v14, 0.0  ;;  %v2817_v60 = vsel %vm669_vm4, %v5556_v34, 0.0 }
 0x4a3   :  { %v2795_v11 = vadd.f32 %v2794_v50, %v2793_v15  ;;  %v2814_v48 = vadd.f32 %v2813_v17, %v2812_v23  ;;  %v2832_v49 = vsel %vm669_vm4, %v5572_v37, 0.0  ;;  %v2819_v43 = vsel %vm669_vm4, %v5559_v51, 0.0 }
 0x4a4   :  { %v2821_v56 = vsel %vm669_vm4, %v5563_v61, 0.0  ;;  %v2823_v12 = vsel %vm669_vm4, %v5566_v30, 0.0  ;;  %v2833_v58 = vadd.f32 %v2832_v49, %v2831_v19  ;;  %v2834_v29 = vsel %vm669_vm4, %v5576_v63, 0.0 }
 0x4a5   :  { %v2797_v44 = vadd.f32 %v2796_v36, %v2795_v11  ;;  %v2816_v14 = vadd.f32 %v2815_v59, %v2814_v48  ;;  %v2836_v34 = vsel %vm669_vm4, %v5579_v5, 0.0  ;;  %v2838_v37 = vsel %vm669_vm4, %v5582_v16, 0.0 }
 0x4a6   :  { %v2835_v50 = vadd.f32 %v2834_v29, %v2833_v58  ;;  %v2852_v51 = vsel %vm669_vm4, %v5595_v24, 0.0  ;;  %v2853_v61 = vsel %vm669_vm4, %v5598_v1, 0.0  ;;  %v2840_v36 = vsel %vm669_vm4, %v5585_v4, 0.0 }
 0x4a7   :  { %v2799_v30 = vadd.f32 %v2798_v52, %v2797_v44  ;;  %v2818_v22 = vadd.f32 %v2817_v60, %v2816_v14  ;;  %v2854_v35 = vadd.f32 %v2853_v61, %v2852_v51  ;;  %v2842_v5 = vsel %vm669_vm4, %v5589_v28, 0.0 }
 0x4a8   :  { %v2837_v63 = vadd.f32 %v2836_v34, %v2835_v50  ;;  %v2844_v15 = vsel %vm669_vm4, %v5592_v8, 0.0  ;;  %v2855_v16 = vsel %vm669_vm4, %v5602_v53, 0.0  ;;  %v2857_v1 = vsel %vm669_vm4, %v5605_v25, 0.0 }
 0x4a9   :  { %v2801_v24 = vadd.f32 %v2800_v41, %v2799_v30  ;;  %v2820_v23 = vadd.f32 %v2819_v43, %v2818_v22  ;;  %v2856_v17 = vadd.f32 %v2855_v16, %v2854_v35  ;;  %v2859_v4 = vsel %vm669_vm4, %v5608_v2, 0.0 }
 0x4aa   :  { %v2839_v52 = vadd.f32 %v2838_v37, %v2837_v63  ;;  %v2873_v59 = vsel %vm669_vm4, %v5621_v55, 0.0  ;;  %v2874_v28 = vsel %vm669_vm4, %v5624_v46, 0.0  ;;  %v2861_v48 = vsel %vm669_vm4, %v5611_v40, 0.0 }
 0x4ab   :  { %v2803_v8 = vadd.f32 %v2802_v9, %v2801_v24  ;;  %v2822_v19 = vadd.f32 %v2821_v56, %v2820_v23  ;;  %v2858_v11 = vadd.f32 %v2857_v1, %v2856_v17  ;;  %v2875_v53 = vadd.f32 %v2874_v28, %v2873_v59  ;;  %v6099_v1 = vld [vmem:[#allocation43_spill] sm:$0xff] }
 0x4ac   :  { %v2841_v41 = vadd.f32 %v2840_v36, %v2839_v52  ;;  %v2863_v25 = vsel %vm669_vm4, %v5615_v39, 0.0  ;;  %v2876_v2 = vsel %vm669_vm4, %v5628_v7, 0.0  ;;  %v2865_v46 = vsel %vm669_vm4, %v5618_v32, 0.0 }
 0x4ad   :  { %v2804_v60 = vrot.slane %v2803_v8, 4  ;;  %v2824_v49 = vadd.f32 %v2823_v12, %v2822_v19  ;;  %v2860_v55 = vadd.f32 %v2859_v4, %v2858_v11  ;;  %v2877_v43 = vadd.f32 %v2876_v2, %v2875_v53  ;;  %v6100_v4 = vld [vmem:[#allocation7_spill] sm:$0xff]  ;;  %v6101_v19 = vld [vmem:[#allocation34_spill] sm:$0xff] }
 0x4ae   :  { %v2843_v58 = vadd.f32 %v2842_v5, %v2841_v41  ;;  %v2878_v9 = vsel %vm669_vm4, %v5631_v38, 0.0  ;;  %v2894_v40 = vsel %vm669_vm4, %v5647_v45, 0.0  ;;  %v2880_v7 = vsel %vm669_vm4, %v5634_v42, 0.0 }
 0x4af   :  { %v2805_v56 = vadd.f32 %v2804_v60, %v2803_v8  ;;  %v2825_v44 = vrot.slane %v2824_v49, 4  ;;  %v2862_v39 = vadd.f32 %v2861_v48, %v2860_v55  ;;  %v2879_v14 = vadd.f32 %v2878_v9, %v2877_v43  ;;  %v6102_v60 = vld [vmem:[#allocation12_spill] sm:$0xff]  ;;  %v6103_v55 = vld [vmem:[#allocation13_spill] sm:$0xff] }
 0x4b0   :  { %v2845_v29 = vadd.f32 %v2844_v15, %v2843_v58  ;;  %v2882_v12 = vsel %vm669_vm4, %v5637_v27, 0.0  ;;  %v2895_v32 = vsel %vm669_vm4, %v5650_v3, 0.0  ;;  %v2884_v45 = vsel %vm669_vm4, %v5641_v47, 0.0  ;;  %v6098_v47 = vld [vmem:[#allocation16_spill] sm:$0xff]  ;;  %v6104_v9 = vld [vmem:[#allocation41_spill] sm:$0xff] }
 0x4b1   :  { %v2806_v34 = vrot.slane %v2805_v56, 2  ;;  %v2826_v50 = vadd.f32 %v2825_v44, %v2824_v49  ;;  %v2864_v38 = vadd.f32 %v2863_v25, %v2862_v39  ;;  %v2881_v37 = vadd.f32 %v2880_v7, %v2879_v14 }
 0x4b2   :  { %v2846_v51 = vrot.slane %v2845_v29, 4  ;;  %v2896_v61 = vadd.f32 %v2895_v32, %v2894_v40  ;;  %v2897_v30 = vsel %vm669_vm4, %v5654_v31, 0.0  ;;  %v2886_v3 = vsel %vm669_vm4, %v5644_v54, 0.0 }
 0x4b3   :  { %v2807_v22 = vadd.f32 %v2806_v34, %v2805_v56  ;;  %v2827_v42 = vrot.slane %v2826_v50, 2  ;;  %v2866_v36 = vadd.f32 %v2865_v46, %v2864_v38  ;;  %v2883_v35 = vadd.f32 %v2882_v12, %v2881_v37 }
 0x4b4   :  { %v2847_v27 = vadd.f32 %v2846_v51, %v2845_v29  ;;  %v2898_v63 = vadd.f32 %v2897_v30, %v2896_v61  ;;  %v2899_v5 = vsel %vm669_vm4, %v5657_v26, 0.0  ;;  %v2901_v23 = vsel %vm669_vm4, %v6098_v47, 0.0  ;;  %v6105_v29 = vld [vmem:[#allocation5_spill] sm:$0xff] }
 0x4b5   :  { %v2828_v15 = vadd.f32 %v2827_v42, %v2826_v50  ;;  %v2867_v16 = vrot.slane %v2866_v36, 4  ;;  %v2885_v24 = vadd.f32 %v2884_v45, %v2883_v35  ;;  %v2915_v52 = vsel %vm669_vm4, %v6099_v1, 0.0  ;;  %v6106_v50 = vld [vmem:[#allocation38_spill] sm:$0xff]  ;;  %v3774_v35 = vld [vmem:[#allocation2 + $0x5f0] sm:$0xff] }
 0x4b6   :  { %v2848_v17 = vrot.slane %v2847_v27, 2  ;;  %v2900_v31 = vadd.f32 %v2899_v5, %v2898_v63  ;;  %v2916_v59 = vsel %vm669_vm4, %v6100_v4, 0.0  ;;  %v2808_v28 = vrot.slane %v2807_v22, 1  ;;  %v6107_v63 = vld [vmem:[#allocation19_spill] sm:$0xff] }
 0x4b7   :  { %v2868_v54 = vadd.f32 %v2867_v16, %v2866_v36  ;;  %v2887_v8 = vadd.f32 %v2886_v3, %v2885_v24  ;;  %v2903_v26 = vsel %vm669_vm4, %v6101_v19, 0.0  ;;  %v2829_v11 = vrot.slane %v2828_v15, 1 }
 0x4b8   :  { %v2849_v53 = vadd.f32 %v2848_v17, %v2847_v27  ;;  %v2902_v41 = vadd.f32 %v2901_v23, %v2900_v31  ;;  %v2917_v48 = vadd.f32 %v2916_v59, %v2915_v52  ;;  %v2905_v49 = vsel %vm669_vm4, %v6102_v60, 0.0 }
 0x4b9   :  { %v2869_v25 = vrot.slane %v2868_v54, 2  ;;  %v2888_v2 = vrot.slane %v2887_v8, 4  ;;  %v2918_v43 = vsel %vm669_vm4, %v6103_v55, 0.0  ;;  %v2907_v40 = vsel %vm669_vm4, %v6104_v9, 0.0 }
 0x4ba   :  { %v2850_v58 = vrot.slane %v2849_v53, 1  ;;  %v2904_v46 = vadd.f32 %v2903_v26, %v2902_v41  ;;  %v2919_v56 = vadd.f32 %v2918_v43, %v2917_v48  ;;  %v2809_v44 = vadd.f32 %v2808_v28, %v2807_v22  ;;  %v6108_v26 = vld [vmem:[#allocation35_spill] sm:$0xff] }
 0x4bb   :  { %v2870_v39 = vadd.f32 %v2869_v25, %v2868_v54  ;;  %v2889_v14 = vadd.f32 %v2888_v2, %v2887_v8  ;;  %v2920_v7 = vsel %vm669_vm4, %v6105_v29, 0.0  ;;  %v2830_v12 = vadd.f32 %v2829_v11, %v2828_v15 }
 0x4bc   :  { %v2906_v32 = vadd.f32 %v2905_v49, %v2904_v46  ;;  %v2921_v34 = vadd.f32 %v2920_v7, %v2919_v56  ;;  %v2922_v38 = vsel %vm669_vm4, %v6106_v50, 0.0  ;;  %v2936_v45 = vsel %vm669_vm4, %v5699_v20, 0.0 }
 0x4bd   :  { %v2871_v37 = vrot.slane %v2870_v39, 1  ;;  %v2890_v51 = vrot.slane %v2889_v14, 2  ;;  %v2937_v61 = vsel %vm669_vm4, %v5702_v10, 0.0  ;;  %v2851_v30 = vadd.f32 %v2850_v58, %v2849_v53 }
 0x4be   :  { %v2908_v22 = vadd.f32 %v2907_v40, %v2906_v32  ;;  %v2923_v42 = vadd.f32 %v2922_v38, %v2921_v34  ;;  %v2938_v36 = vadd.f32 %v2937_v61, %v2936_v45  ;;  %v2787_v27 = vmul.f32 %v3774_v35, %v5498_v62  ;;  %v3052_v45 = vld [vmem:[%s5935_s2 + $0x28] sm:$0xff] }
 0x4bf   :  { %v2891_v3 = vadd.f32 %v2890_v51, %v2889_v14  ;;  %v2924_v5 = vsel %vm669_vm4, %v6107_v63, 0.0  ;;  %v2939_v15 = vsel %vm669_vm4, %v5705_v0, 0.0  ;;  %v2926_v20 = vsel %vm669_vm4, %v5693_v33, 0.0  ;;  %v150_v51 = vld [vmem:[%s5935_s2 + $0x20] sm:$0xff]  ;;  %v3056_v63 = vld [vmem:[%s5934_s1 + $0x28] sm:$0xff] }
 0x4c0   :  { %v2909_v16 = vrot.slane %v2908_v22, 4  ;;  %v2925_v24 = vadd.f32 %v2924_v5, %v2923_v42  ;;  %v2940_v10 = vadd.f32 %v2939_v15, %v2938_v36  ;;  %v2872_v47 = vadd.f32 %v2871_v37, %v2870_v39  ;;  %v6110_v42 = vld [vmem:[#allocation26_spill] sm:$0xff]  ;;  %v3057_v5 = vld [vmem:[%s5935_s2 + $0x30] sm:$0xff] }
 0x4c1   :  { %v2892_v23 = vrot.slane %v2891_v3, 1  ;;  %v2941_v17 = vsel %vm669_vm4, %v5708_v57, 0.0  ;;  %v2967_v62 = vsel %vm1738_vm5, %v2830_v12, %v2809_v44  ;;  %v2928_v0 = vsel %vm669_vm4, %v5696_v18, 0.0  ;;  %v3775_v57 = vld [vmem:[#allocation2 + $0x5f8] sm:$0xff] }
 0x4c2   :  { %v2910_v31 = vadd.f32 %v2909_v16, %v2908_v22  ;;  %v2927_v1 = vadd.f32 %v2926_v20, %v2925_v24  ;;  %v2942_v52 = vadd.f32 %v2941_v17, %v2940_v10  ;;  %v2968_v4 = vsel %vm1740_vm6, %v2851_v30, %v2967_v62  ;;  %v6109_v30 = vld [vmem:[#allocation40_spill] sm:$0xff]  ;;  %v3133_v10 = vld [vmem:[%s5934_s1 + $0x30] sm:$0xff] }
 0x4c3   :  { %v2893_v59 = vadd.f32 %v2892_v23, %v2891_v3  ;;  %v2943_v33 = vsel %vm669_vm4, %v5718_v6, 0.0  ;;  %v2969_v28 = vsel %vm1742_vm7, %v2872_v47, %v2968_v4  ;;  %v2788_v11 = vmul.f32 %v3775_v57, %v6108_v26  ;;  %v3217_v47 = vld [vmem:[%s5934_s1 + $0x38] sm:$0xff]  ;;  %v3222_v57 = vld [vmem:[%s5935_s2 + $0x48] sm:$0xff] }
 0x4c4   :  { %v2911_v54 = vrot.slane %v2910_v31, 2  ;;  %v2929_v8 = vadd.f32 %v2928_v0, %v2927_v1  ;;  %v2944_v19 = vadd.f32 %v2943_v33, %v2942_v52  ;;  %v2945_v53 = vsel %vm669_vm4, %v5721_v13, 0.0  ;;  %3556 = vmatprep.mubr.msk.f32.mxu0 %vm231_vm2, %v3217_v47  ;;  %v3134_v23 = vld [vmem:[%s5935_s2 + $0x38] sm:$0xff] }
 0x4c5   :  { %v2970_v41 = vsel %vm1744_vm8, %v2893_v59, %v2969_v28  ;;  %v2947_v18 = vsel %vm669_vm4, %v2787_v27, 0.0  ;;  %v2949_v55 = vsel %vm669_vm4, %v2788_v11, 0.0  ;;  %v222_v36 = vadd.f32 %v6110_v42, %v150_v51  ;;  %v3224_v26 = vld [vmem:[%s5935_s2 + $0x58] sm:$0xff] }
 0x4c6   :  { %v2912_v48 = vadd.f32 %v2911_v54, %v2910_v31  ;;  %v2930_v25 = vrot.slane %v2929_v8, 4  ;;  %v2946_v2 = vadd.f32 %v2945_v53, %v2944_v19  ;;  %v3220_v19 = vld [vmem:[%s5934_s1 + $0x50] sm:$0xff] }
 0x4c7   :  { %v3054_v3 = vmax.f32 %v222_v36, 0.0 }
 0x4c8   :  { %v2913_v60 = vrot.slane %v2912_v48, 1  ;;  %v2931_v6 = vadd.f32 %v2930_v25, %v2929_v8  ;;  %v2948_v49 = vadd.f32 %v2947_v18, %v2946_v2  ;;  %v3218_v8 = vld [vmem:[%s5934_s1 + $0x40] sm:$0xff] }
 0x4ca   :  { %v2914_v43 = vadd.f32 %v2913_v60, %v2912_v48  ;;  %v2932_v58 = vrot.slane %v2931_v6, 2  ;;  %v2950_v46 = vadd.f32 %v2949_v55, %v2948_v49  ;;  %v3223_v48 = vld [vmem:[%s5935_s2 + $0x50] sm:$0xff]  ;;  %v3777_v55 = vld [vmem:[%s5933_s0 + $0x18] sm:$0xff] }
 0x4cc   :  { %v2933_v9 = vadd.f32 %v2932_v58, %v2931_v6  ;;  %v2951_v40 = vrot.slane %v2950_v46, 4  ;;  %v2971_v56 = vsel %vm1746_vm9, %v2914_v43, %v2970_v41  ;;  %v3221_v41 = vld [vmem:[%s5935_s2 + $0x40] sm:$0xff]  ;;  %v3776_v6 = vld [vmem:[%s5933_s0 + $0x8] sm:$0xff] }
 0x4ce   :  { %v2934_v13 = vrot.slane %v2933_v9, 1  ;;  %v2952_v44 = vadd.f32 %v2951_v40, %v2950_v46 }
 0x4d0   :  { %v2935_v39 = vadd.f32 %v2934_v13, %v2933_v9  ;;  %v2953_v14 = vrot.slane %v2952_v44, 2 }
 0x4d2   :  { %v2954_v29 = vadd.f32 %v2953_v14, %v2952_v44  ;;  %v2972_v7 = vsel %vm1748_vm10, %v2935_v39, %v2971_v56  ;;  %v3778_v56 = vld [vmem:[%s5933_s0] sm:$0xff]  ;;  %v3779_v44 = vld [vmem:[%s5933_s0 + $0x10] sm:$0xff] }
 0x4d4   :  { %v2955_v12 = vrot.slane %v2954_v29, 1 }
 0x4d6   :  { %v2956_v32 = vadd.f32 %v2955_v12, %v2954_v29 }
 0x4d8   :  { %v2973_v34 = vsel %vm1750_vm11, %v2956_v32, %v2972_v7 }
 0x55c   :  { %v3043_v50 = vpop.f32.mrf.mxu1 }
 0x55d   :  { %v3044_v38 = vadd.f32 %v3043_v50, %v2973_v34 }
 0x55e   :  { %v3541_v37 = vpop.f32.mrf.mxu1 }
 0x55f   :  { %3048 = vrot.lane.b32.xlu1 %v3044_v38, %s3815_s21 }
 0x5d1   :  { %v3049_v61 = vpop.permute.xlu1 %3048 }
 0x5d2   :  { %v3051_v22 = vsel %vm669_vm4, %v6109_v30, %v3049_v61 }
 0x5d3   :  { %v3053_v35 = vadd.f32 %v3052_v45, %v3051_v22 }
 0x5d5   :  { %v3055_v27 = vmax.f32 %v3053_v35, 0.0 }
 0x5d7   :  { %3543 = vmatpush3.msra.mxu1 %v3055_v27 }
 0x5d8   :  { %3544 = vmatprep.subr.mxu1 %v6087_v21 }
 0x5d9   :  { %3545 = vmatpush3.msra.mxu1 %v3054_v3 }
 0x5da   :  { %3547 = vmatmul.mubr.msk.f32.vlgmr.msra.gmra.mxu1 %vm3058_vm12, %v3056_v63  ;;  %3549 = vmatprep.subr.mxu1 %v6087_v21 }
 0x5db   :  { %3551 = vmatprep.mubr.msk.f32.mxu1 %vm3806_vm0, %v6087_v21  ;;  %v3219_v21 = vld [vmem:[%s5934_s1 + $0x48] sm:$0xff] }
 0x69a   :  { %v3128_v15 = vpop.f32.mrf.mxu1 }
 0x69b   :  { %v3129_v16 = vadd.f32 %v3128_v15, %v3057_v5 }
 0x69c   :  { %v3548_v24 = vpop.f32.mrf.mxu1 }
 0x69d   :  { %v3132_v20 = vmax.f32 %v3129_v16, 0.0 }
 0x69f   :  { %3550 = vmatpush3.msra.mxu1 %v3132_v20 }
 0x6a0   :  { %3552 = vmatmul.mubr.msk.f32.vlgmr.msra.gmra.mxu1 %vm231_vm2, %v3133_v10 }
 0x6a1   :  { %3559 = vmatprep.mubr.msk.f32.mxu1 %vm231_vm2, %v3219_v21 }
 0x760   :  { %v3204_v17 = vpop.f32.mrf.mxu1 }
 0x761   :  { %v3205_v62 = vadd.f32 %v3204_v17, %v3134_v23 }
 0x762   :  { %v3553_v31 = vpop.f32.mrf.mxu1 }
 0x763   :  { %v3208_v1 = vsub.f32 0.0, %v3205_v62 }
 0x765   :  { %v3209_v52 = vmul.f32 1.442695, %v3208_v1 }
 0x767   :  { %3614 = vpow2.f32 %v3209_v52 }
 0x774   :  { %v3615_v4 = vpop.eup %3614 }
 0x775   :  { %v3211_v59 = vadd.f32 1.0, %v3615_v4 }
 0x777   :  { %3616 = vrcp.f32 %v3211_v59 }
 0x784   :  { %v3617_v0 = vpop.eup %3616 }
 0x785   :  { %v3214_v33 = vmul.f32 %v3617_v0, %v3053_v35 }
 0x787   :  { %v3215_v28 = vadd.f32 %v3214_v33, %v222_v36 }
 0x789   :  { %v3216_v54 = vmax.f32 %v3215_v28, 0.0 }
 0x78b   :  { %3554 = vmatprep.subr.mxu0 %v3216_v54  ;;  %3562 = vmatprep.subr.mxu1 %v3216_v54 }
 0x78c   :  { %3555 = vmatpush3.msra.mxu0 %v3216_v54  ;;  %3563 = vmatpush3.msra.mxu1 %v3216_v54 }
 0x78d   :  { %3557 = vmatmul.mubr.msk.f32.vlgmr.msra.gmra.mxu0 %vm231_vm2, %v3218_v8  ;;  %3560 = vmatmul.mubr.msk.f32.vlgmr.msra.gmra.mxu1 %vm231_vm2, %v3220_v19 }
 0x84d   :  { %v3558_v11 = vpop.f32.mrf.mxu0  ;;  %v3561_v53 = vpop.f32.mrf.mxu1 }
 0x84e   :  { %v3309_v25 = vadd.f32 %v3558_v11, %v3222_v57  ;;  %v3319_v2 = vadd.f32 %v3561_v53, %v3224_v26 }
 0x84f   :  { %v3303_v18 = vpop.f32.mrf.mxu0  ;;  %v3313_v60 = vpop.f32.mrf.mxu1 }
 0x850   :  { %v3323_v49 = vadd.f32 %v3776_v6, %v3309_v25  ;;  %v3325_v43 = vadd.f32 %v3777_v55, %v3319_v2  ;;  %v3304_v58 = vadd.f32 %v3303_v18, %v3221_v41  ;;  %v3314_v46 = vadd.f32 %v3313_v60, %v3223_v48 }
 0x852   :  { %v3327_v9 = vmax.f32 %v3323_v49, 0.0  ;;  %v3329_v40 = vmax.f32 %v3325_v43, 0.0  ;;  %v3322_v13 = vadd.f32 %v3778_v56, %v3304_v58  ;;  %v3324_v39 = vadd.f32 %v3779_v44, %v3314_v46 }
 0x854   :  { %3331 = vst [vmem:[%s5938_s5 + $0x8] sm:$0xff] %v3327_v9  ;;  %3333 = vst [vmem:[%s5938_s5 + $0x18] sm:$0xff] %v3329_v40  ;;  %v3326_v14 = vmax.f32 %v3322_v13, 0.0  ;;  %v3328_v29 = vmax.f32 %v3324_v39, 0.0 }
 0x856   :  { %3330 = vst [vmem:[%s5938_s5] sm:$0xff] %v3326_v14  ;;  %3332 = vst [vmem:[%s5938_s5 + $0x10] sm:$0xff] %v3328_v29 }
 0x857   :  { %3338 = vsyncpa [#allocation3], 1 }

</bundles_post_ra>
